<compile_context>
chip_gen: v7x
topology: tpu7x:2x2x1
jax: 0.10.0
libtpu: 0.0.40
codegen_flags: <defaults>
</compile_context>

<pallas_src>
import functools

import jax
import jax.numpy as jnp
from jax import lax
from jax.experimental import pallas as pl
from jax.experimental.pallas import tpu as pltpu

LANE = 128  # lane width: channels (Cin, Cout) are zero-padded to this


def _round_up(x, m):
    return (x + m - 1) // m * m


def _conv_taps_kernel(xp_ref, w_ref, b_ref, o_ref, *, tap_offsets, p_out, apply_relu):
    """3x3 conv as 9 accumulating MXU taps over a flattened padded image.

    xp_ref : (r_in, LANE)  bf16  reflect-padded image, spatial dims flattened,
                                 channels zero-padded to LANE.
    w_ref  : (9, LANE, LANE) bf16  per-tap (Cin_pad, Cout_pad) weight matrices.
    b_ref  : (1, LANE)     f32
    o_ref  : (p_out, LANE) f32   lane-dense output rows (p = h*Wp + w).
    """
    acc = jnp.zeros((p_out, LANE), jnp.float32)
    for t, off in enumerate(tap_offsets):      # static unroll: 9 taps
        lhs = xp_ref[off:off + p_out, :]       # shifted window == im2col tap
        acc = acc + jnp.dot(lhs, w_ref[t], preferred_element_type=jnp.float32)
    acc = acc + b_ref[...]
    if apply_relu:
        acc = jnp.maximum(acc, 0.0)
    o_ref[...] = acc


def conv3x3_reflect(x_nhwc, w_oihw, bias, *, apply_relu):
    """Conv2d(k=3, stride=1, padding=1, padding_mode='reflect') + bias (+ReLU)."""
    N, H, W, Cin = x_nhwc.shape
    assert H >= 2 and W >= 2, "reflection padding requires H, W >= 2"
    Cout, Cin_w, KH, KW = w_oihw.shape
    assert (Cin_w, KH, KW) == (Cin, 3, 3)
    assert Cin <= LANE and Cout <= LANE

    Hp, Wp = H + 2, W + 2

    # --- host-side glue (pure index shuffles / zero padding; exact) ---------
    xp = jnp.pad(x_nhwc, ((0, 0), (1, 1), (1, 1), (0, 0)), mode="reflect")
    xp = jnp.pad(xp, ((0, 0), (0, 0), (0, 0), (0, LANE - Cin))).astype(jnp.bfloat16)

    p_out = _round_up(H * Wp, 8)              # output rows computed per image
    r_in = _round_up(p_out + 2 * Wp + 2, 8)   # rows read by the furthest tap
    xp2 = xp.reshape(N, Hp * Wp, LANE)
    xp2 = jnp.pad(xp2, ((0, 0), (0, r_in - Hp * Wp), (0, 0)))  # zero tail rows

    # weights: (Cout, Cin, 3, 3) -> (3, 3, Cin, Cout) -> lane-pad -> (9, LANE, LANE)
    w = jnp.transpose(w_oihw, (2, 3, 1, 0))
    w = jnp.pad(w, ((0, 0), (0, 0), (0, LANE - Cin), (0, LANE - Cout)))
    w = w.reshape(9, LANE, LANE).astype(jnp.bfloat16)
    b = jnp.pad(bias, (0, LANE - Cout)).reshape(1, LANE).astype(jnp.float32)

    # flattened row offset of tap (dy, dx); matches the (3,3)->9 reshape order
    tap_offsets = tuple(dy * Wp + dx for dy in range(3) for dx in range(3))

    # VMEM need (double-buffered): ~2*r_in*128*2 + 2*9*128^2*2 + 2*p_out*128*4
    # + acc  ->  well under 2 MiB at decoder sizes; keep a generous explicit cap.
    assert r_in * LANE * 6 < 8 * 1024 * 1024, "image too large for single-block kernel"

    out = pl.pallas_call(
        functools.partial(
            _conv_taps_kernel,
            tap_offsets=tap_offsets, p_out=p_out, apply_relu=apply_relu),
        out_shape=jax.ShapeDtypeStruct((N, p_out, LANE), jnp.float32),
        grid=(N,),
        in_specs=[
            pl.BlockSpec((None, r_in, LANE), lambda n: (n, 0, 0)),  # one image/block
            pl.BlockSpec((9, LANE, LANE), lambda n: (0, 0, 0)),     # all tap weights
            pl.BlockSpec((1, LANE), lambda n: (0, 0)),              # bias row
        ],
        out_specs=pl.BlockSpec((None, p_out, LANE), lambda n: (n, 0, 0)),
        compiler_params=pltpu.CompilerParams(
            dimension_semantics=("parallel",),       # N>=2 blocks -> v7x megacore
            vmem_limit_bytes=32 * 1024 * 1024,
        ),
    )(xp2, w, b)

    # valid output rows are p = h*Wp + w for h<H, w<W; drop lane padding
    y = out[:, :H * Wp, :].reshape(N, H, Wp, LANE)[:, :, :W, :Cout]
    return y


def conv3x3_reflect_ref(x_nhwc, w_oihw, bias, *, apply_relu):
    """Pure-JAX reference (XLA conv, same bf16-in / f32-acc precision)."""
    xp = jnp.pad(x_nhwc, ((0, 0), (1, 1), (1, 1), (0, 0)), mode="reflect")
    xp = xp.astype(jnp.bfloat16)
    w_hwio = jnp.transpose(w_oihw, (2, 3, 1, 0)).astype(jnp.bfloat16)
    y = lax.conv_general_dilated(
        xp, w_hwio, window_strides=(1, 1), padding="VALID",
        dimension_numbers=("NHWC", "HWIO", "NHWC"),
        preferred_element_type=jnp.float32,
    )
    y = y + bias.reshape(1, 1, 1, -1).astype(jnp.float32)
    if apply_relu:
        y = jnp.maximum(y, 0.0)
    return y


def init_decoder_params(key, in_ch, inter_ch, out_ch, out_size):
    """Mirror InterpolateDecoder.__init__ layer construction (deterministic init)."""
    binary = format(out_size, "b")[1:]
    f_in, f_out = in_ch, inter_ch
    layers = []
    for i, bit in enumerate(binary):
        key, kw, kb = jax.random.split(key, 3)
        w = 0.1 * jax.random.normal(kw, (f_out, f_in, 3, 3), jnp.float32)
        b = 0.1 * jax.random.normal(kb, (f_out,), jnp.float32)
        layers.append({"pre_pad": bit == "1", "w": w, "b": b, "relu": True})
        f_in = inter_ch
        if i == len(binary) - 2:
            f_out = out_ch
    layers[-1]["relu"] = False  # trailing ReLU is popped in the PyTorch module
    return layers


def interpolate_decoder_forward(x_nchw, layers, conv_fn):
    x = jnp.transpose(x_nchw, (0, 2, 3, 1))  # NCHW -> NHWC
    for L in layers:
        # nn.Upsample(scale_factor=2), mode='nearest'
        x = jnp.repeat(jnp.repeat(x, 2, axis=1), 2, axis=2)
        if L["pre_pad"]:
            # nn.ReflectionPad2d((1, 0, 1, 0)): left=1, right=0, top=1, bottom=0
            x = jnp.pad(x, ((0, 0), (1, 0), (1, 0), (0, 0)), mode="reflect")
        x = conv_fn(x, L["w"], L["b"], apply_relu=L["relu"])
    return jnp.transpose(x, (0, 3, 1, 2))  # NHWC -> NCHW


if __name__ == "__main__":
    key = jax.random.PRNGKey(0)
    key, kx, kp = jax.random.split(key, 3)

    # InterpolateDecoder(in_ch=4, inter_ch=8, out_ch=3, out_size=12)
    # binary('12') = '1100' -> bits '100' -> 3 layers (first has the (1,0,1,0) pad).
    in_ch, inter_ch, out_ch, out_size = 4, 8, 3, 12
    x = jax.random.normal(kx, (2, in_ch, 2, 2), jnp.float32)  # NCHW latent

    layers = init_decoder_params(kp, in_ch, inter_ch, out_ch, out_size)

    @jax.jit
    def run(x_):
        return interpolate_decoder_forward(x_, layers, conv3x3_reflect)

    out = jax.block_until_ready(run(x))

    # spatial trajectory 2 -> (4+1)=5 -> 10 -> 20, channels 4 -> 8 -> 8 -> 3
    assert out.shape == (2, out_ch, 20, 20), out.shape

    ref = interpolate_decoder_forward(x, layers, conv3x3_reflect_ref)
    assert jnp.allclose(out, ref, atol=2e-2, rtol=2e-2), "mismatch vs JAX reference"

    print("KERNEL_OK")
</pallas_src>

<mosaic_0001>
module attributes {stable_mosaic.version = 11 : i64} {
  func.func @_conv_taps_kernel(%arg0: i32, %arg1: memref<1x56x128xbf16, #tpu.memory_space<vmem>>, %arg2: memref<9x128x128xbf16, #tpu.memory_space<vmem>>, %arg3: memref<1x128xf32, #tpu.memory_space<vmem>>, %arg4: memref<1x40x128xf32, #tpu.memory_space<vmem>>) attributes {dimension_semantics = [#tpu.dimension_semantics<parallel>], iteration_bounds = array<i64: 2>, scalar_prefetch = 0 : i64, scratch_operands = 0 : i64, tpu.core_type = #tpu.core_type<tc>, window_params = [{transform_indices = @transform_0, window_bounds = array<i64: 1, 56, 128>}, {pipeline_mode = #tpu.pipeline_mode<synchronous>, transform_indices = @transform_1, window_bounds = array<i64: 9, 128, 128>}, {pipeline_mode = #tpu.pipeline_mode<synchronous>, transform_indices = @transform_2, window_bounds = array<i64: 1, 128>}, {transform_indices = @transform_3, window_bounds = array<i64: 1, 40, 128>}]} {
    %cst = arith.constant 0.000000e+00 : f32
    %0 = vector.broadcast %cst : f32 to vector<40x128xf32>
    %c0 = arith.constant 0 : index
    %c0_0 = arith.constant 0 : index
    %c0_1 = arith.constant 0 : index
    %1 = vector.load %arg1[%c0, %c0_0, %c0_1] : memref<1x56x128xbf16, #tpu.memory_space<vmem>>, vector<1x40x128xbf16>
    %2 = vector.shape_cast %1 : vector<1x40x128xbf16> to vector<40x128xbf16>
    %c0_2 = arith.constant 0 : index
    %c0_3 = arith.constant 0 : index
    %c0_4 = arith.constant 0 : index
    %3 = vector.load %arg2[%c0_2, %c0_3, %c0_4] : memref<9x128x128xbf16, #tpu.memory_space<vmem>>, vector<1x128x128xbf16>
    %4 = vector.shape_cast %3 : vector<1x128x128xbf16> to vector<128x128xbf16>
    %cst_5 = arith.constant dense<0.000000e+00> : vector<40x128xf32>
    %5 = tpu.matmul %2, %4, %cst_5 {dimension_numbers = #tpu.dot_dimension_numbers<[1], [0], [0], [1], [0, 0, 1, 1], [], []>} : vector<40x128xbf16>, vector<128x128xbf16>, vector<40x128xf32> -> vector<40x128xf32>
    %6 = arith.addf %0, %5 : vector<40x128xf32>
    %c0_6 = arith.constant 0 : index
    %c1 = arith.constant 1 : index
    %c0_7 = arith.constant 0 : index
    %7 = vector.load %arg1[%c0_6, %c1, %c0_7] : memref<1x56x128xbf16, #tpu.memory_space<vmem>>, vector<1x40x128xbf16>
    %8 = vector.shape_cast %7 : vector<1x40x128xbf16> to vector<40x128xbf16>
    %c1_8 = arith.constant 1 : index
    %c0_9 = arith.constant 0 : index
    %c0_10 = arith.constant 0 : index
    %9 = vector.load %arg2[%c1_8, %c0_9, %c0_10] : memref<9x128x128xbf16, #tpu.memory_space<vmem>>, vector<1x128x128xbf16>
    %10 = vector.shape_cast %9 : vector<1x128x128xbf16> to vector<128x128xbf16>
    %cst_11 = arith.constant dense<0.000000e+00> : vector<40x128xf32>
    %11 = tpu.matmul %8, %10, %cst_11 {dimension_numbers = #tpu.dot_dimension_numbers<[1], [0], [0], [1], [0, 0, 1, 1], [], []>} : vector<40x128xbf16>, vector<128x128xbf16>, vector<40x128xf32> -> vector<40x128xf32>
    %12 = arith.addf %6, %11 : vector<40x128xf32>
    %c0_12 = arith.constant 0 : index
    %c2 = arith.constant 2 : index
    %c0_13 = arith.constant 0 : index
    %13 = vector.load %arg1[%c0_12, %c2, %c0_13] : memref<1x56x128xbf16, #tpu.memory_space<vmem>>, vector<1x40x128xbf16>
    %14 = vector.shape_cast %13 : vector<1x40x128xbf16> to vector<40x128xbf16>
    %c2_14 = arith.constant 2 : index
    %c0_15 = arith.constant 0 : index
    %c0_16 = arith.constant 0 : index
    %15 = vector.load %arg2[%c2_14, %c0_15, %c0_16] : memref<9x128x128xbf16, #tpu.memory_space<vmem>>, vector<1x128x128xbf16>
    %16 = vector.shape_cast %15 : vector<1x128x128xbf16> to vector<128x128xbf16>
    %cst_17 = arith.constant dense<0.000000e+00> : vector<40x128xf32>
    %17 = tpu.matmul %14, %16, %cst_17 {dimension_numbers = #tpu.dot_dimension_numbers<[1], [0], [0], [1], [0, 0, 1, 1], [], []>} : vector<40x128xbf16>, vector<128x128xbf16>, vector<40x128xf32> -> vector<40x128xf32>
    %18 = arith.addf %12, %17 : vector<40x128xf32>
    %c0_18 = arith.constant 0 : index
    %c7 = arith.constant 7 : index
    %c0_19 = arith.constant 0 : index
    %19 = vector.load %arg1[%c0_18, %c7, %c0_19] : memref<1x56x128xbf16, #tpu.memory_space<vmem>>, vector<1x40x128xbf16>
    %20 = vector.shape_cast %19 : vector<1x40x128xbf16> to vector<40x128xbf16>
    %c3 = arith.constant 3 : index
    %c0_20 = arith.constant 0 : index
    %c0_21 = arith.constant 0 : index
    %21 = vector.load %arg2[%c3, %c0_20, %c0_21] : memref<9x128x128xbf16, #tpu.memory_space<vmem>>, vector<1x128x128xbf16>
    %22 = vector.shape_cast %21 : vector<1x128x128xbf16> to vector<128x128xbf16>
    %cst_22 = arith.constant dense<0.000000e+00> : vector<40x128xf32>
    %23 = tpu.matmul %20, %22, %cst_22 {dimension_numbers = #tpu.dot_dimension_numbers<[1], [0], [0], [1], [0, 0, 1, 1], [], []>} : vector<40x128xbf16>, vector<128x128xbf16>, vector<40x128xf32> -> vector<40x128xf32>
    %24 = arith.addf %18, %23 : vector<40x128xf32>
    %c0_23 = arith.constant 0 : index
    %c8 = arith.constant 8 : index
    %c0_24 = arith.constant 0 : index
    %25 = vector.load %arg1[%c0_23, %c8, %c0_24] : memref<1x56x128xbf16, #tpu.memory_space<vmem>>, vector<1x40x128xbf16>
    %26 = vector.shape_cast %25 : vector<1x40x128xbf16> to vector<40x128xbf16>
    %c4 = arith.constant 4 : index
    %c0_25 = arith.constant 0 : index
    %c0_26 = arith.constant 0 : index
    %27 = vector.load %arg2[%c4, %c0_25, %c0_26] : memref<9x128x128xbf16, #tpu.memory_space<vmem>>, vector<1x128x128xbf16>
    %28 = vector.shape_cast %27 : vector<1x128x128xbf16> to vector<128x128xbf16>
    %cst_27 = arith.constant dense<0.000000e+00> : vector<40x128xf32>
    %29 = tpu.matmul %26, %28, %cst_27 {dimension_numbers = #tpu.dot_dimension_numbers<[1], [0], [0], [1], [0, 0, 1, 1], [], []>} : vector<40x128xbf16>, vector<128x128xbf16>, vector<40x128xf32> -> vector<40x128xf32>
    %30 = arith.addf %24, %29 : vector<40x128xf32>
    %c0_28 = arith.constant 0 : index
    %c9 = arith.constant 9 : index
    %c0_29 = arith.constant 0 : index
    %31 = vector.load %arg1[%c0_28, %c9, %c0_29] : memref<1x56x128xbf16, #tpu.memory_space<vmem>>, vector<1x40x128xbf16>
    %32 = vector.shape_cast %31 : vector<1x40x128xbf16> to vector<40x128xbf16>
    %c5 = arith.constant 5 : index
    %c0_30 = arith.constant 0 : index
    %c0_31 = arith.constant 0 : index
    %33 = vector.load %arg2[%c5, %c0_30, %c0_31] : memref<9x128x128xbf16, #tpu.memory_space<vmem>>, vector<1x128x128xbf16>
    %34 = vector.shape_cast %33 : vector<1x128x128xbf16> to vector<128x128xbf16>
    %cst_32 = arith.constant dense<0.000000e+00> : vector<40x128xf32>
    %35 = tpu.matmul %32, %34, %cst_32 {dimension_numbers = #tpu.dot_dimension_numbers<[1], [0], [0], [1], [0, 0, 1, 1], [], []>} : vector<40x128xbf16>, vector<128x128xbf16>, vector<40x128xf32> -> vector<40x128xf32>
    %36 = arith.addf %30, %35 : vector<40x128xf32>
    %c0_33 = arith.constant 0 : index
    %c14 = arith.constant 14 : index
    %c0_34 = arith.constant 0 : index
    %37 = vector.load %arg1[%c0_33, %c14, %c0_34] : memref<1x56x128xbf16, #tpu.memory_space<vmem>>, vector<1x40x128xbf16>
    %38 = vector.shape_cast %37 : vector<1x40x128xbf16> to vector<40x128xbf16>
    %c6 = arith.constant 6 : index
    %c0_35 = arith.constant 0 : index
    %c0_36 = arith.constant 0 : index
    %39 = vector.load %arg2[%c6, %c0_35, %c0_36] : memref<9x128x128xbf16, #tpu.memory_space<vmem>>, vector<1x128x128xbf16>
    %40 = vector.shape_cast %39 : vector<1x128x128xbf16> to vector<128x128xbf16>
    %cst_37 = arith.constant dense<0.000000e+00> : vector<40x128xf32>
    %41 = tpu.matmul %38, %40, %cst_37 {dimension_numbers = #tpu.dot_dimension_numbers<[1], [0], [0], [1], [0, 0, 1, 1], [], []>} : vector<40x128xbf16>, vector<128x128xbf16>, vector<40x128xf32> -> vector<40x128xf32>
    %42 = arith.addf %36, %41 : vector<40x128xf32>
    %c0_38 = arith.constant 0 : index
    %c15 = arith.constant 15 : index
    %c0_39 = arith.constant 0 : index
    %43 = vector.load %arg1[%c0_38, %c15, %c0_39] : memref<1x56x128xbf16, #tpu.memory_space<vmem>>, vector<1x40x128xbf16>
    %44 = vector.shape_cast %43 : vector<1x40x128xbf16> to vector<40x128xbf16>
    %c7_40 = arith.constant 7 : index
    %c0_41 = arith.constant 0 : index
    %c0_42 = arith.constant 0 : index
    %45 = vector.load %arg2[%c7_40, %c0_41, %c0_42] : memref<9x128x128xbf16, #tpu.memory_space<vmem>>, vector<1x128x128xbf16>
    %46 = vector.shape_cast %45 : vector<1x128x128xbf16> to vector<128x128xbf16>
    %cst_43 = arith.constant dense<0.000000e+00> : vector<40x128xf32>
    %47 = tpu.matmul %44, %46, %cst_43 {dimension_numbers = #tpu.dot_dimension_numbers<[1], [0], [0], [1], [0, 0, 1, 1], [], []>} : vector<40x128xbf16>, vector<128x128xbf16>, vector<40x128xf32> -> vector<40x128xf32>
    %48 = arith.addf %42, %47 : vector<40x128xf32>
    %c0_44 = arith.constant 0 : index
    %c16 = arith.constant 16 : index
    %c0_45 = arith.constant 0 : index
    %49 = vector.load %arg1[%c0_44, %c16, %c0_45] : memref<1x56x128xbf16, #tpu.memory_space<vmem>>, vector<1x40x128xbf16>
    %50 = vector.shape_cast %49 : vector<1x40x128xbf16> to vector<40x128xbf16>
    %c8_46 = arith.constant 8 : index
    %c0_47 = arith.constant 0 : index
    %c0_48 = arith.constant 0 : index
    %51 = vector.load %arg2[%c8_46, %c0_47, %c0_48] : memref<9x128x128xbf16, #tpu.memory_space<vmem>>, vector<1x128x128xbf16>
    %52 = vector.shape_cast %51 : vector<1x128x128xbf16> to vector<128x128xbf16>
    %cst_49 = arith.constant dense<0.000000e+00> : vector<40x128xf32>
    %53 = tpu.matmul %50, %52, %cst_49 {dimension_numbers = #tpu.dot_dimension_numbers<[1], [0], [0], [1], [0, 0, 1, 1], [], []>} : vector<40x128xbf16>, vector<128x128xbf16>, vector<40x128xf32> -> vector<40x128xf32>
    %54 = arith.addf %48, %53 : vector<40x128xf32>
    %c0_50 = arith.constant 0 : index
    %c0_51 = arith.constant 0 : index
    %55 = vector.load %arg3[%c0_50, %c0_51] : memref<1x128xf32, #tpu.memory_space<vmem>>, vector<1x128xf32>
    %56 = vector.broadcast %55 : vector<1x128xf32> to vector<40x128xf32>
    %57 = arith.addf %54, %56 : vector<40x128xf32>
    %cst_52 = arith.constant 0.000000e+00 : f32
    %58 = vector.broadcast %cst_52 : f32 to vector<40x128xf32>
    %59 = arith.maximumf %57, %58 : vector<40x128xf32>
    %c0_53 = arith.constant 0 : index
    %c0_54 = arith.constant 0 : index
    %c0_55 = arith.constant 0 : index
    %60 = vector.load %arg4[%c0_53, %c0_54, %c0_55] : memref<1x40x128xf32, #tpu.memory_space<vmem>>, vector<1x40x128xf32>
    %61 = vector.shape_cast %60 : vector<1x40x128xf32> to vector<40x128xf32>
    %62 = vector.shape_cast %59 : vector<40x128xf32> to vector<1x40x128xf32>
    tpu.vector_store %arg4[%c0_53, %c0_54, %c0_55], %62 {strides = array<i32>} : memref<1x40x128xf32, #tpu.memory_space<vmem>>, vector<1x40x128xf32>,
    return
  }
  func.func @transform_0(%arg0: i32) -> (i32, i32, i32) {
    %c0_i32 = arith.constant 0 : i32
    %c0_i32_0 = arith.constant 0 : i32
    %c0_i32_1 = arith.constant 0 : i32
    return %arg0, %c0_i32, %c0_i32_0 : i32, i32, i32
  }
  func.func @transform_1(%arg0: i32) -> (i32, i32, i32) {
    %c0_i32 = arith.constant 0 : i32
    %c0_i32_0 = arith.constant 0 : i32
    %c0_i32_1 = arith.constant 0 : i32
    %c0_i32_2 = arith.constant 0 : i32
    return %c0_i32, %c0_i32_0, %c0_i32_1 : i32, i32, i32
  }
  func.func @transform_2(%arg0: i32) -> (i32, i32) {
    %c0_i32 = arith.constant 0 : i32
    %c0_i32_0 = arith.constant 0 : i32
    %c0_i32_1 = arith.constant 0 : i32
    return %c0_i32, %c0_i32_0 : i32, i32
  }
  func.func @transform_3(%arg0: i32) -> (i32, i32, i32) {
    %c0_i32 = arith.constant 0 : i32
    %c0_i32_0 = arith.constant 0 : i32
    %c0_i32_1 = arith.constant 0 : i32
    return %arg0, %c0_i32, %c0_i32_0 : i32, i32, i32
  }
}

module attributes {stable_mosaic.version = 11 : i64} {
  func.func @_conv_taps_kernel(%arg0: i32, %arg1: memref<1x152x128xbf16, #tpu.memory_space<vmem>>, %arg2: memref<9x128x128xbf16, #tpu.memory_space<vmem>>, %arg3: memref<1x128xf32, #tpu.memory_space<vmem>>, %arg4: memref<1x120x128xf32, #tpu.memory_space<vmem>>) attributes {dimension_semantics = [#tpu.dimension_semantics<parallel>], iteration_bounds = array<i64: 2>, scalar_prefetch = 0 : i64, scratch_operands = 0 : i64, tpu.core_type = #tpu.core_type<tc>, window_params = [{transform_indices = @transform_0, window_bounds = array<i64: 1, 152, 128>}, {pipeline_mode = #tpu.pipeline_mode<synchronous>, transform_indices = @transform_1, window_bounds = array<i64: 9, 128, 128>}, {pipeline_mode = #tpu.pipeline_mode<synchronous>, transform_indices = @transform_2, window_bounds = array<i64: 1, 128>}, {transform_indices = @transform_3, window_bounds = array<i64: 1, 120, 128>}]} {
    %cst = arith.constant 0.000000e+00 : f32
    %0 = vector.broadcast %cst : f32 to vector<120x128xf32>
    %c0 = arith.constant 0 : index
    %c0_0 = arith.constant 0 : index
    %c0_1 = arith.constant 0 : index
    %1 = vector.load %arg1[%c0, %c0_0, %c0_1] : memref<1x152x128xbf16, #tpu.memory_space<vmem>>, vector<1x120x128xbf16>
    %2 = vector.shape_cast %1 : vector<1x120x128xbf16> to vector<120x128xbf16>
    %c0_2 = arith.constant 0 : index
    %c0_3 = arith.constant 0 : index
    %c0_4 = arith.constant 0 : index
    %3 = vector.load %arg2[%c0_2, %c0_3, %c0_4] : memref<9x128x128xbf16, #tpu.memory_space<vmem>>, vector<1x128x128xbf16>
    %4 = vector.shape_cast %3 : vector<1x128x128xbf16> to vector<128x128xbf16>
    %cst_5 = arith.constant dense<0.000000e+00> : vector<120x128xf32>
    %5 = tpu.matmul %2, %4, %cst_5 {dimension_numbers = #tpu.dot_dimension_numbers<[1], [0], [0], [1], [0, 0, 1, 1], [], []>} : vector<120x128xbf16>, vector<128x128xbf16>, vector<120x128xf32> -> vector<120x128xf32>
    %6 = arith.addf %0, %5 : vector<120x128xf32>
    %c0_6 = arith.constant 0 : index
    %c1 = arith.constant 1 : index
    %c0_7 = arith.constant 0 : index
    %7 = vector.load %arg1[%c0_6, %c1, %c0_7] : memref<1x152x128xbf16, #tpu.memory_space<vmem>>, vector<1x120x128xbf16>
    %8 = vector.shape_cast %7 : vector<1x120x128xbf16> to vector<120x128xbf16>
    %c1_8 = arith.constant 1 : index
    %c0_9 = arith.constant 0 : index
    %c0_10 = arith.constant 0 : index
    %9 = vector.load %arg2[%c1_8, %c0_9, %c0_10] : memref<9x128x128xbf16, #tpu.memory_space<vmem>>, vector<1x128x128xbf16>
    %10 = vector.shape_cast %9 : vector<1x128x128xbf16> to vector<128x128xbf16>
    %cst_11 = arith.constant dense<0.000000e+00> : vector<120x128xf32>
    %11 = tpu.matmul %8, %10, %cst_11 {dimension_numbers = #tpu.dot_dimension_numbers<[1], [0], [0], [1], [0, 0, 1, 1], [], []>} : vector<120x128xbf16>, vector<128x128xbf16>, vector<120x128xf32> -> vector<120x128xf32>
    %12 = arith.addf %6, %11 : vector<120x128xf32>
    %c0_12 = arith.constant 0 : index
    %c2 = arith.constant 2 : index
    %c0_13 = arith.constant 0 : index
    %13 = vector.load %arg1[%c0_12, %c2, %c0_13] : memref<1x152x128xbf16, #tpu.memory_space<vmem>>, vector<1x120x128xbf16>
    %14 = vector.shape_cast %13 : vector<1x120x128xbf16> to vector<120x128xbf16>
    %c2_14 = arith.constant 2 : index
    %c0_15 = arith.constant 0 : index
    %c0_16 = arith.constant 0 : index
    %15 = vector.load %arg2[%c2_14, %c0_15, %c0_16] : memref<9x128x128xbf16, #tpu.memory_space<vmem>>, vector<1x128x128xbf16>
    %16 = vector.shape_cast %15 : vector<1x128x128xbf16> to vector<128x128xbf16>
    %cst_17 = arith.constant dense<0.000000e+00> : vector<120x128xf32>
    %17 = tpu.matmul %14, %16, %cst_17 {dimension_numbers = #tpu.dot_dimension_numbers<[1], [0], [0], [1], [0, 0, 1, 1], [], []>} : vector<120x128xbf16>, vector<128x128xbf16>, vector<120x128xf32> -> vector<120x128xf32>
    %18 = arith.addf %12, %17 : vector<120x128xf32>
    %c0_18 = arith.constant 0 : index
    %c12 = arith.constant 12 : index
    %c0_19 = arith.constant 0 : index
    %19 = vector.load %arg1[%c0_18, %c12, %c0_19] : memref<1x152x128xbf16, #tpu.memory_space<vmem>>, vector<1x120x128xbf16>
    %20 = vector.shape_cast %19 : vector<1x120x128xbf16> to vector<120x128xbf16>
    %c3 = arith.constant 3 : index
    %c0_20 = arith.constant 0 : index
    %c0_21 = arith.constant 0 : index
    %21 = vector.load %arg2[%c3, %c0_20, %c0_21] : memref<9x128x128xbf16, #tpu.memory_space<vmem>>, vector<1x128x128xbf16>
    %22 = vector.shape_cast %21 : vector<1x128x128xbf16> to vector<128x128xbf16>
    %cst_22 = arith.constant dense<0.000000e+00> : vector<120x128xf32>
    %23 = tpu.matmul %20, %22, %cst_22 {dimension_numbers = #tpu.dot_dimension_numbers<[1], [0], [0], [1], [0, 0, 1, 1], [], []>} : vector<120x128xbf16>, vector<128x128xbf16>, vector<120x128xf32> -> vector<120x128xf32>
    %24 = arith.addf %18, %23 : vector<120x128xf32>
    %c0_23 = arith.constant 0 : index
    %c13 = arith.constant 13 : index
    %c0_24 = arith.constant 0 : index
    %25 = vector.load %arg1[%c0_23, %c13, %c0_24] : memref<1x152x128xbf16, #tpu.memory_space<vmem>>, vector<1x120x128xbf16>
    %26 = vector.shape_cast %25 : vector<1x120x128xbf16> to vector<120x128xbf16>
    %c4 = arith.constant 4 : index
    %c0_25 = arith.constant 0 : index
    %c0_26 = arith.constant 0 : index
    %27 = vector.load %arg2[%c4, %c0_25, %c0_26] : memref<9x128x128xbf16, #tpu.memory_space<vmem>>, vector<1x128x128xbf16>
    %28 = vector.shape_cast %27 : vector<1x128x128xbf16> to vector<128x128xbf16>
    %cst_27 = arith.constant dense<0.000000e+00> : vector<120x128xf32>
    %29 = tpu.matmul %26, %28, %cst_27 {dimension_numbers = #tpu.dot_dimension_numbers<[1], [0], [0], [1], [0, 0, 1, 1], [], []>} : vector<120x128xbf16>, vector<128x128xbf16>, vector<120x128xf32> -> vector<120x128xf32>
    %30 = arith.addf %24, %29 : vector<120x128xf32>
    %c0_28 = arith.constant 0 : index
    %c14 = arith.constant 14 : index
    %c0_29 = arith.constant 0 : index
    %31 = vector.load %arg1[%c0_28, %c14, %c0_29] : memref<1x152x128xbf16, #tpu.memory_space<vmem>>, vector<1x120x128xbf16>
    %32 = vector.shape_cast %31 : vector<1x120x128xbf16> to vector<120x128xbf16>
    %c5 = arith.constant 5 : index
    %c0_30 = arith.constant 0 : index
    %c0_31 = arith.constant 0 : index
    %33 = vector.load %arg2[%c5, %c0_30, %c0_31] : memref<9x128x128xbf16, #tpu.memory_space<vmem>>, vector<1x128x128xbf16>
    %34 = vector.shape_cast %33 : vector<1x128x128xbf16> to vector<128x128xbf16>
    %cst_32 = arith.constant dense<0.000000e+00> : vector<120x128xf32>
    %35 = tpu.matmul %32, %34, %cst_32 {dimension_numbers = #tpu.dot_dimension_numbers<[1], [0], [0], [1], [0, 0, 1, 1], [], []>} : vector<120x128xbf16>, vector<128x128xbf16>, vector<120x128xf32> -> vector<120x128xf32>
    %36 = arith.addf %30, %35 : vector<120x128xf32>
    %c0_33 = arith.constant 0 : index
    %c24 = arith.constant 24 : index
    %c0_34 = arith.constant 0 : index
    %37 = vector.load %arg1[%c0_33, %c24, %c0_34] : memref<1x152x128xbf16, #tpu.memory_space<vmem>>, vector<1x120x128xbf16>
    %38 = vector.shape_cast %37 : vector<1x120x128xbf16> to vector<120x128xbf16>
    %c6 = arith.constant 6 : index
    %c0_35 = arith.constant 0 : index
    %c0_36 = arith.constant 0 : index
    %39 = vector.load %arg2[%c6, %c0_35, %c0_36] : memref<9x128x128xbf16, #tpu.memory_space<vmem>>, vector<1x128x128xbf16>
    %40 = vector.shape_cast %39 : vector<1x128x128xbf16> to vector<128x128xbf16>
    %cst_37 = arith.constant dense<0.000000e+00> : vector<120x128xf32>
    %41 = tpu.matmul %38, %40, %cst_37 {dimension_numbers = #tpu.dot_dimension_numbers<[1], [0], [0], [1], [0, 0, 1, 1], [], []>} : vector<120x128xbf16>, vector<128x128xbf16>, vector<120x128xf32> -> vector<120x128xf32>
    %42 = arith.addf %36, %41 : vector<120x128xf32>
    %c0_38 = arith.constant 0 : index
    %c25 = arith.constant 25 : index
    %c0_39 = arith.constant 0 : index
    %43 = vector.load %arg1[%c0_38, %c25, %c0_39] : memref<1x152x128xbf16, #tpu.memory_space<vmem>>, vector<1x120x128xbf16>
    %44 = vector.shape_cast %43 : vector<1x120x128xbf16> to vector<120x128xbf16>
    %c7 = arith.constant 7 : index
    %c0_40 = arith.constant 0 : index
    %c0_41 = arith.constant 0 : index
    %45 = vector.load %arg2[%c7, %c0_40, %c0_41] : memref<9x128x128xbf16, #tpu.memory_space<vmem>>, vector<1x128x128xbf16>
    %46 = vector.shape_cast %45 : vector<1x128x128xbf16> to vector<128x128xbf16>
    %cst_42 = arith.constant dense<0.000000e+00> : vector<120x128xf32>
    %47 = tpu.matmul %44, %46, %cst_42 {dimension_numbers = #tpu.dot_dimension_numbers<[1], [0], [0], [1], [0, 0, 1, 1], [], []>} : vector<120x128xbf16>, vector<128x128xbf16>, vector<120x128xf32> -> vector<120x128xf32>
    %48 = arith.addf %42, %47 : vector<120x128xf32>
    %c0_43 = arith.constant 0 : index
    %c26 = arith.constant 26 : index
    %c0_44 = arith.constant 0 : index
    %49 = vector.load %arg1[%c0_43, %c26, %c0_44] : memref<1x152x128xbf16, #tpu.memory_space<vmem>>, vector<1x120x128xbf16>
    %50 = vector.shape_cast %49 : vector<1x120x128xbf16> to vector<120x128xbf16>
    %c8 = arith.constant 8 : index
    %c0_45 = arith.constant 0 : index
    %c0_46 = arith.constant 0 : index
    %51 = vector.load %arg2[%c8, %c0_45, %c0_46] : memref<9x128x128xbf16, #tpu.memory_space<vmem>>, vector<1x128x128xbf16>
    %52 = vector.shape_cast %51 : vector<1x128x128xbf16> to vector<128x128xbf16>
    %cst_47 = arith.constant dense<0.000000e+00> : vector<120x128xf32>
    %53 = tpu.matmul %50, %52, %cst_47 {dimension_numbers = #tpu.dot_dimension_numbers<[1], [0], [0], [1], [0, 0, 1, 1], [], []>} : vector<120x128xbf16>, vector<128x128xbf16>, vector<120x128xf32> -> vector<120x128xf32>
    %54 = arith.addf %48, %53 : vector<120x128xf32>
    %c0_48 = arith.constant 0 : index
    %c0_49 = arith.constant 0 : index
    %55 = vector.load %arg3[%c0_48, %c0_49] : memref<1x128xf32, #tpu.memory_space<vmem>>, vector<1x128xf32>
    %56 = vector.broadcast %55 : vector<1x128xf32> to vector<120x128xf32>
    %57 = arith.addf %54, %56 : vector<120x128xf32>
    %cst_50 = arith.constant 0.000000e+00 : f32
    %58 = vector.broadcast %cst_50 : f32 to vector<120x128xf32>
    %59 = arith.maximumf %57, %58 : vector<120x128xf32>
    %c0_51 = arith.constant 0 : index
    %c0_52 = arith.constant 0 : index
    %c0_53 = arith.constant 0 : index
    %60 = vector.load %arg4[%c0_51, %c0_52, %c0_53] : memref<1x120x128xf32, #tpu.memory_space<vmem>>, vector<1x120x128xf32>
    %61 = vector.shape_cast %60 : vector<1x120x128xf32> to vector<120x128xf32>
    %62 = vector.shape_cast %59 : vector<120x128xf32> to vector<1x120x128xf32>
    tpu.vector_store %arg4[%c0_51, %c0_52, %c0_53], %62 {strides = array<i32>} : memref<1x120x128xf32, #tpu.memory_space<vmem>>, vector<1x120x128xf32>,
    return
  }
  func.func @transform_0(%arg0: i32) -> (i32, i32, i32) {
    %c0_i32 = arith.constant 0 : i32
    %c0_i32_0 = arith.constant 0 : i32
    %c0_i32_1 = arith.constant 0 : i32
    return %arg0, %c0_i32, %c0_i32_0 : i32, i32, i32
  }
  func.func @transform_1(%arg0: i32) -> (i32, i32, i32) {
    %c0_i32 = arith.constant 0 : i32
    %c0_i32_0 = arith.constant 0 : i32
    %c0_i32_1 = arith.constant 0 : i32
    %c0_i32_2 = arith.constant 0 : i32
    return %c0_i32, %c0_i32_0, %c0_i32_1 : i32, i32, i32
  }
  func.func @transform_2(%arg0: i32) -> (i32, i32) {
    %c0_i32 = arith.constant 0 : i32
    %c0_i32_0 = arith.constant 0 : i32
    %c0_i32_1 = arith.constant 0 : i32
    return %c0_i32, %c0_i32_0 : i32, i32
  }
  func.func @transform_3(%arg0: i32) -> (i32, i32, i32) {
    %c0_i32 = arith.constant 0 : i32
    %c0_i32_0 = arith.constant 0 : i32
    %c0_i32_1 = arith.constant 0 : i32
    return %arg0, %c0_i32, %c0_i32_0 : i32, i32, i32
  }
}

module attributes {stable_mosaic.version = 11 : i64} {
  func.func @_conv_taps_kernel(%arg0: i32, %arg1: memref<1x488x128xbf16, #tpu.memory_space<vmem>>, %arg2: memref<9x128x128xbf16, #tpu.memory_space<vmem>>, %arg3: memref<1x128xf32, #tpu.memory_space<vmem>>, %arg4: memref<1x440x128xf32, #tpu.memory_space<vmem>>) attributes {dimension_semantics = [#tpu.dimension_semantics<parallel>], iteration_bounds = array<i64: 2>, scalar_prefetch = 0 : i64, scratch_operands = 0 : i64, tpu.core_type = #tpu.core_type<tc>, window_params = [{transform_indices = @transform_0, window_bounds = array<i64: 1, 488, 128>}, {pipeline_mode = #tpu.pipeline_mode<synchronous>, transform_indices = @transform_1, window_bounds = array<i64: 9, 128, 128>}, {pipeline_mode = #tpu.pipeline_mode<synchronous>, transform_indices = @transform_2, window_bounds = array<i64: 1, 128>}, {transform_indices = @transform_3, window_bounds = array<i64: 1, 440, 128>}]} {
    %cst = arith.constant 0.000000e+00 : f32
    %0 = vector.broadcast %cst : f32 to vector<440x128xf32>
    %c0 = arith.constant 0 : index
    %c0_0 = arith.constant 0 : index
    %c0_1 = arith.constant 0 : index
    %1 = vector.load %arg1[%c0, %c0_0, %c0_1] : memref<1x488x128xbf16, #tpu.memory_space<vmem>>, vector<1x440x128xbf16>
    %2 = vector.shape_cast %1 : vector<1x440x128xbf16> to vector<440x128xbf16>
    %c0_2 = arith.constant 0 : index
    %c0_3 = arith.constant 0 : index
    %c0_4 = arith.constant 0 : index
    %3 = vector.load %arg2[%c0_2, %c0_3, %c0_4] : memref<9x128x128xbf16, #tpu.memory_space<vmem>>, vector<1x128x128xbf16>
    %4 = vector.shape_cast %3 : vector<1x128x128xbf16> to vector<128x128xbf16>
    %cst_5 = arith.constant dense<0.000000e+00> : vector<440x128xf32>
    %5 = tpu.matmul %2, %4, %cst_5 {dimension_numbers = #tpu.dot_dimension_numbers<[1], [0], [0], [1], [0, 0, 1, 1], [], []>} : vector<440x128xbf16>, vector<128x128xbf16>, vector<440x128xf32> -> vector<440x128xf32>
    %6 = arith.addf %0, %5 : vector<440x128xf32>
    %c0_6 = arith.constant 0 : index
    %c1 = arith.constant 1 : index
    %c0_7 = arith.constant 0 : index
    %7 = vector.load %arg1[%c0_6, %c1, %c0_7] : memref<1x488x128xbf16, #tpu.memory_space<vmem>>, vector<1x440x128xbf16>
    %8 = vector.shape_cast %7 : vector<1x440x128xbf16> to vector<440x128xbf16>
    %c1_8 = arith.constant 1 : index
    %c0_9 = arith.constant 0 : index
    %c0_10 = arith.constant 0 : index
    %9 = vector.load %arg2[%c1_8, %c0_9, %c0_10] : memref<9x128x128xbf16, #tpu.memory_space<vmem>>, vector<1x128x128xbf16>
    %10 = vector.shape_cast %9 : vector<1x128x128xbf16> to vector<128x128xbf16>
    %cst_11 = arith.constant dense<0.000000e+00> : vector<440x128xf32>
    %11 = tpu.matmul %8, %10, %cst_11 {dimension_numbers = #tpu.dot_dimension_numbers<[1], [0], [0], [1], [0, 0, 1, 1], [], []>} : vector<440x128xbf16>, vector<128x128xbf16>, vector<440x128xf32> -> vector<440x128xf32>
    %12 = arith.addf %6, %11 : vector<440x128xf32>
    %c0_12 = arith.constant 0 : index
    %c2 = arith.constant 2 : index
    %c0_13 = arith.constant 0 : index
    %13 = vector.load %arg1[%c0_12, %c2, %c0_13] : memref<1x488x128xbf16, #tpu.memory_space<vmem>>, vector<1x440x128xbf16>
    %14 = vector.shape_cast %13 : vector<1x440x128xbf16> to vector<440x128xbf16>
    %c2_14 = arith.constant 2 : index
    %c0_15 = arith.constant 0 : index
    %c0_16 = arith.constant 0 : index
    %15 = vector.load %arg2[%c2_14, %c0_15, %c0_16] : memref<9x128x128xbf16, #tpu.memory_space<vmem>>, vector<1x128x128xbf16>
    %16 = vector.shape_cast %15 : vector<1x128x128xbf16> to vector<128x128xbf16>
    %cst_17 = arith.constant dense<0.000000e+00> : vector<440x128xf32>
    %17 = tpu.matmul %14, %16, %cst_17 {dimension_numbers = #tpu.dot_dimension_numbers<[1], [0], [0], [1], [0, 0, 1, 1], [], []>} : vector<440x128xbf16>, vector<128x128xbf16>, vector<440x128xf32> -> vector<440x128xf32>
    %18 = arith.addf %12, %17 : vector<440x128xf32>
    %c0_18 = arith.constant 0 : index
    %c22 = arith.constant 22 : index
    %c0_19 = arith.constant 0 : index
    %19 = vector.load %arg1[%c0_18, %c22, %c0_19] : memref<1x488x128xbf16, #tpu.memory_space<vmem>>, vector<1x440x128xbf16>
    %20 = vector.shape_cast %19 : vector<1x440x128xbf16> to vector<440x128xbf16>
    %c3 = arith.constant 3 : index
    %c0_20 = arith.constant 0 : index
    %c0_21 = arith.constant 0 : index
    %21 = vector.load %arg2[%c3, %c0_20, %c0_21] : memref<9x128x128xbf16, #tpu.memory_space<vmem>>, vector<1x128x128xbf16>
    %22 = vector.shape_cast %21 : vector<1x128x128xbf16> to vector<128x128xbf16>
    %cst_22 = arith.constant dense<0.000000e+00> : vector<440x128xf32>
    %23 = tpu.matmul %20, %22, %cst_22 {dimension_numbers = #tpu.dot_dimension_numbers<[1], [0], [0], [1], [0, 0, 1, 1], [], []>} : vector<440x128xbf16>, vector<128x128xbf16>, vector<440x128xf32> -> vector<440x128xf32>
    %24 = arith.addf %18, %23 : vector<440x128xf32>
    %c0_23 = arith.constant 0 : index
    %c23 = arith.constant 23 : index
    %c0_24 = arith.constant 0 : index
    %25 = vector.load %arg1[%c0_23, %c23, %c0_24] : memref<1x488x128xbf16, #tpu.memory_space<vmem>>, vector<1x440x128xbf16>
    %26 = vector.shape_cast %25 : vector<1x440x128xbf16> to vector<440x128xbf16>
    %c4 = arith.constant 4 : index
    %c0_25 = arith.constant 0 : index
    %c0_26 = arith.constant 0 : index
    %27 = vector.load %arg2[%c4, %c0_25, %c0_26] : memref<9x128x128xbf16, #tpu.memory_space<vmem>>, vector<1x128x128xbf16>
    %28 = vector.shape_cast %27 : vector<1x128x128xbf16> to vector<128x128xbf16>
    %cst_27 = arith.constant dense<0.000000e+00> : vector<440x128xf32>
    %29 = tpu.matmul %26, %28, %cst_27 {dimension_numbers = #tpu.dot_dimension_numbers<[1], [0], [0], [1], [0, 0, 1, 1], [], []>} : vector<440x128xbf16>, vector<128x128xbf16>, vector<440x128xf32> -> vector<440x128xf32>
    %30 = arith.addf %24, %29 : vector<440x128xf32>
    %c0_28 = arith.constant 0 : index
    %c24 = arith.constant 24 : index
    %c0_29 = arith.constant 0 : index
    %31 = vector.load %arg1[%c0_28, %c24, %c0_29] : memref<1x488x128xbf16, #tpu.memory_space<vmem>>, vector<1x440x128xbf16>
    %32 = vector.shape_cast %31 : vector<1x440x128xbf16> to vector<440x128xbf16>
    %c5 = arith.constant 5 : index
    %c0_30 = arith.constant 0 : index
    %c0_31 = arith.constant 0 : index
    %33 = vector.load %arg2[%c5, %c0_30, %c0_31] : memref<9x128x128xbf16, #tpu.memory_space<vmem>>, vector<1x128x128xbf16>
    %34 = vector.shape_cast %33 : vector<1x128x128xbf16> to vector<128x128xbf16>
    %cst_32 = arith.constant dense<0.000000e+00> : vector<440x128xf32>
    %35 = tpu.matmul %32, %34, %cst_32 {dimension_numbers = #tpu.dot_dimension_numbers<[1], [0], [0], [1], [0, 0, 1, 1], [], []>} : vector<440x128xbf16>, vector<128x128xbf16>, vector<440x128xf32> -> vector<440x128xf32>
    %36 = arith.addf %30, %35 : vector<440x128xf32>
    %c0_33 = arith.constant 0 : index
    %c44 = arith.constant 44 : index
    %c0_34 = arith.constant 0 : index
    %37 = vector.load %arg1[%c0_33, %c44, %c0_34] : memref<1x488x128xbf16, #tpu.memory_space<vmem>>, vector<1x440x128xbf16>
    %38 = vector.shape_cast %37 : vector<1x440x128xbf16> to vector<440x128xbf16>
    %c6 = arith.constant 6 : index
    %c0_35 = arith.constant 0 : index
    %c0_36 = arith.constant 0 : index
    %39 = vector.load %arg2[%c6, %c0_35, %c0_36] : memref<9x128x128xbf16, #tpu.memory_space<vmem>>, vector<1x128x128xbf16>
    %40 = vector.shape_cast %39 : vector<1x128x128xbf16> to vector<128x128xbf16>
    %cst_37 = arith.constant dense<0.000000e+00> : vector<440x128xf32>
    %41 = tpu.matmul %38, %40, %cst_37 {dimension_numbers = #tpu.dot_dimension_numbers<[1], [0], [0], [1], [0, 0, 1, 1], [], []>} : vector<440x128xbf16>, vector<128x128xbf16>, vector<440x128xf32> -> vector<440x128xf32>
    %42 = arith.addf %36, %41 : vector<440x128xf32>
    %c0_38 = arith.constant 0 : index
    %c45 = arith.constant 45 : index
    %c0_39 = arith.constant 0 : index
    %43 = vector.load %arg1[%c0_38, %c45, %c0_39] : memref<1x488x128xbf16, #tpu.memory_space<vmem>>, vector<1x440x128xbf16>
    %44 = vector.shape_cast %43 : vector<1x440x128xbf16> to vector<440x128xbf16>
    %c7 = arith.constant 7 : index
    %c0_40 = arith.constant 0 : index
    %c0_41 = arith.constant 0 : index
    %45 = vector.load %arg2[%c7, %c0_40, %c0_41] : memref<9x128x128xbf16, #tpu.memory_space<vmem>>, vector<1x128x128xbf16>
    %46 = vector.shape_cast %45 : vector<1x128x128xbf16> to vector<128x128xbf16>
    %cst_42 = arith.constant dense<0.000000e+00> : vector<440x128xf32>
    %47 = tpu.matmul %44, %46, %cst_42 {dimension_numbers = #tpu.dot_dimension_numbers<[1], [0], [0], [1], [0, 0, 1, 1], [], []>} : vector<440x128xbf16>, vector<128x128xbf16>, vector<440x128xf32> -> vector<440x128xf32>
    %48 = arith.addf %42, %47 : vector<440x128xf32>
    %c0_43 = arith.constant 0 : index
    %c46 = arith.constant 46 : index
    %c0_44 = arith.constant 0 : index
    %49 = vector.load %arg1[%c0_43, %c46, %c0_44] : memref<1x488x128xbf16, #tpu.memory_space<vmem>>, vector<1x440x128xbf16>
    %50 = vector.shape_cast %49 : vector<1x440x128xbf16> to vector<440x128xbf16>
    %c8 = arith.constant 8 : index
    %c0_45 = arith.constant 0 : index
    %c0_46 = arith.constant 0 : index
    %51 = vector.load %arg2[%c8, %c0_45, %c0_46] : memref<9x128x128xbf16, #tpu.memory_space<vmem>>, vector<1x128x128xbf16>
    %52 = vector.shape_cast %51 : vector<1x128x128xbf16> to vector<128x128xbf16>
    %cst_47 = arith.constant dense<0.000000e+00> : vector<440x128xf32>
    %53 = tpu.matmul %50, %52, %cst_47 {dimension_numbers = #tpu.dot_dimension_numbers<[1], [0], [0], [1], [0, 0, 1, 1], [], []>} : vector<440x128xbf16>, vector<128x128xbf16>, vector<440x128xf32> -> vector<440x128xf32>
    %54 = arith.addf %48, %53 : vector<440x128xf32>
    %c0_48 = arith.constant 0 : index
    %c0_49 = arith.constant 0 : index
    %55 = vector.load %arg3[%c0_48, %c0_49] : memref<1x128xf32, #tpu.memory_space<vmem>>, vector<1x128xf32>
    %56 = vector.broadcast %55 : vector<1x128xf32> to vector<440x128xf32>
    %57 = arith.addf %54, %56 : vector<440x128xf32>
    %c0_50 = arith.constant 0 : index
    %c0_51 = arith.constant 0 : index
    %c0_52 = arith.constant 0 : index
    %58 = vector.load %arg4[%c0_50, %c0_51, %c0_52] : memref<1x440x128xf32, #tpu.memory_space<vmem>>, vector<1x440x128xf32>
    %59 = vector.shape_cast %58 : vector<1x440x128xf32> to vector<440x128xf32>
    %60 = vector.shape_cast %57 : vector<440x128xf32> to vector<1x440x128xf32>
    tpu.vector_store %arg4[%c0_50, %c0_51, %c0_52], %60 {strides = array<i32>} : memref<1x440x128xf32, #tpu.memory_space<vmem>>, vector<1x440x128xf32>,
    return
  }
  func.func @transform_0(%arg0: i32) -> (i32, i32, i32) {
    %c0_i32 = arith.constant 0 : i32
    %c0_i32_0 = arith.constant 0 : i32
    %c0_i32_1 = arith.constant 0 : i32
    return %arg0, %c0_i32, %c0_i32_0 : i32, i32, i32
  }
  func.func @transform_1(%arg0: i32) -> (i32, i32, i32) {
    %c0_i32 = arith.constant 0 : i32
    %c0_i32_0 = arith.constant 0 : i32
    %c0_i32_1 = arith.constant 0 : i32
    %c0_i32_2 = arith.constant 0 : i32
    return %c0_i32, %c0_i32_0, %c0_i32_1 : i32, i32, i32
  }
  func.func @transform_2(%arg0: i32) -> (i32, i32) {
    %c0_i32 = arith.constant 0 : i32
    %c0_i32_0 = arith.constant 0 : i32
    %c0_i32_1 = arith.constant 0 : i32
    return %c0_i32, %c0_i32_0 : i32, i32
  }
  func.func @transform_3(%arg0: i32) -> (i32, i32, i32) {
    %c0_i32 = arith.constant 0 : i32
    %c0_i32_0 = arith.constant 0 : i32
    %c0_i32_1 = arith.constant 0 : i32
    return %arg0, %c0_i32, %c0_i32_0 : i32, i32, i32
  }
}

</mosaic_0001>

<bundles_post_ra>
// kernel: run.3
= control target key start
LH: loop header
LB: loop body
LE: loop exit
PB: predicated region body
PF: predicated region fallthrough
CT: control target
= control target key end

     0   :  { %s2303_s12 = smov 0   ;;  %s2820_s0 = inlined_call_operand.vmem [shape: bf16[2,56,128], index: 0, kind: input, shape index: {}]   ;;  %s2821_s1 = inlined_call_operand.vmem [shape: bf16[9,128,128], index: 1, kind: input, shape index: {}]   ;;  %s2822_s2 = inlined_call_operand.vmem [shape: f32[1,128], index: 2, kind: input, shape index: {}]   ;;  %s2823_s3 = inlined_call_operand.vmem [shape: f32[2,40,128], index: 3, kind: output, shape index: {}]  }
   0x1 LB: > { %s1574_s13 = sadd.s32 4294967295, %s2279_s12   ;;  %p1578_p0 = scmp.ge.s32.totalorder %s2279_s12, 1  ;;  %s2279_s12 = sphi %s2303_s12, %s13_s12  }
   0x2   : > { %p137_p1 = scmp.lt.s32.totalorder %s2279_s12, 3 }
   0x4   : > { %p138_p2 = pnand %p1578_p0, %p137_p1 }
   0x5   : > { %v2182_v0 = vld [vmem:[%s2821_s1 + $0x40] sm:$0xff] (!%p138_p2)   ;;  %v2281_v1 = vmov (!%p138_p2), 0.0   ;;  %v2184_v3 = vld [vmem:[%s2821_s1 + $0x48] sm:$0xff] (!%p138_p2)   ;;  %vm2282_vm0 = vmmov (!%p138_p2), 0   ;;  %p161_p3 = scmp.lt.s32.totalorder (!%p138_p2), %s1574_s13, 1  ;;  %v2186_v5 = vld [vmem:[%s2821_s1 + $0x50] sm:$0xff] (!%p138_p2)  }
   0x6   : > { %141 = sbr.rel (%p138_p2) target bundleno = 394 (0x18a), region = 32  ;;  %1902 = vmatprep.subr.bf16.mxu0 (!%p138_p2), %v2281_v1  ;;  %1930 = vmatprep.subr.bf16.mxu1 (!%p138_p2), %v2281_v1  ;;  %v2183_v2 = vld [vmem:[%s2821_s1] sm:$0xff] (!%p138_p2)   ;;  %v2185_v4 = vld [vmem:[%s2821_s1 + $0x8] sm:$0xff] (!%p138_p2)   ;;  %v2187_v6 = vld [vmem:[%s2821_s1 + $0x10] sm:$0xff] (!%p138_p2)   ;;  %vm226_vm1 = vsmask.f32 (!%p138_p2), 7424 }
   0x7   : > { %1903 = vmatpush3.bf16.msra.mxu0 (!%p138_p2), %v2182_v0  ;;  %1918 = vmatprep.mubr.msk.bf16.mxu0 (!%p138_p2), %vm2282_vm0, %v2281_v1  ;;  %v2188_v7 = vld [vmem:[%s2821_s1 + $0x58] sm:$0xff] (!%p138_p2)   ;;  %v2190_v9 = vld [vmem:[%s2821_s1 + $0x60] sm:$0xff] (!%p138_p2)   ;;  %v2192_v17 = vld [vmem:[%s2821_s1 + $0x68] sm:$0xff] (!%p138_p2)   ;;  %vm486_vm2 = vcmask (!%p138_p2), 1046528   ;;  %vm629_vm3 = vsmask.f32 (!%p138_p2), 4352 }
   0x8   : > { %1931 = vmatpush3.bf16.msra.mxu1 (!%p138_p2), %v2183_v2  ;;  %1904 = vmatprep.subr.bf16.mxu0 (!%p138_p2), %v2281_v1  ;;  %v2189_v8 = vld [vmem:[%s2821_s1 + $0x18] sm:$0xff] (!%p138_p2)   ;;  %v2191_v10 = vld [vmem:[%s2821_s1 + $0x20] sm:$0xff] (!%p138_p2)   ;;  %v2193_v19 = vld [vmem:[%s2821_s1 + $0x28] sm:$0xff] (!%p138_p2)   ;;  %vm1093_vm4 = vcmask (!%p138_p2), 1044480  }
   0x9   : > { %1932 = vmatprep.subr.bf16.mxu1 (!%p138_p2), %v2281_v1  ;;  %1946 = vmatprep.mubr.msk.bf16.mxu1 (!%p138_p2), %vm2282_vm0, %v2281_v1  ;;  %v2194_v21 = vld [vmem:[%s2821_s1 + $0x70] sm:$0xff] (!%p138_p2)   ;;  %v2196_v26 = vld [vmem:[%s2821_s1 + $0x78] sm:$0xff] (!%p138_p2)   ;;  %v2200_v34 = vld [vmem:[%s2821_s1 + $0x80] sm:$0xff] (!%p138_p2)  }
   0xa   : > { %v2195_v25 = vld [vmem:[%s2821_s1 + $0x30] sm:$0xff] (!%p138_p2)   ;;  %v2197_v27 = vld [vmem:[%s2821_s1 + $0x38] sm:$0xff] (!%p138_p2)   ;;  %v2201_v38 = vld [vmem:[%s2821_s1 + $0xc0] sm:$0xff] (!%p138_p2)  }
   0xb   : > { %1905 = vmatpush3.bf16.msra.mxu0 (!%p138_p2), %v2184_v3  ;;  %v2202_v39 = vld [vmem:[%s2821_s1 + $0x88] sm:$0xff] (!%p138_p2)   ;;  %v2204_v43 = vld [vmem:[%s2821_s1 + $0x90] sm:$0xff] (!%p138_p2)   ;;  %v2206_v47 = vld [vmem:[%s2821_s1 + $0x98] sm:$0xff] (!%p138_p2)  }
   0xc   : > { %1933 = vmatpush3.bf16.msra.mxu1 (!%p138_p2), %v2185_v4  ;;  %1906 = vmatprep.subr.bf16.mxu0 (!%p138_p2), %v2281_v1  ;;  %v2203_v42 = vld [vmem:[%s2821_s1 + $0xc8] sm:$0xff] (!%p138_p2)   ;;  %v2205_v44 = vld [vmem:[%s2821_s1 + $0xd0] sm:$0xff] (!%p138_p2)   ;;  %v2207_v48 = vld [vmem:[%s2821_s1 + $0xd8] sm:$0xff] (!%p138_p2)  }
   0xd   : > { %s2825_s13 = smov (!%p161_p3, %s1574_s13), 1  ;;  %1934 = vmatprep.subr.bf16.mxu1 %v2281_v1  ;;  %v2209_v52 = vld [vmem:[%s2821_s1 + $0xa0] sm:$0xff]   ;;  %v2211_v56 = vld [vmem:[%s2821_s1 + $0xa8] sm:$0xff]   ;;  %v2214_v0 = vld [vmem:[%s2821_s1 + $0xb0] sm:$0xff]  }
   0xe   : > { %s2170_s26 = smul.u32 28, %s2825_s13  ;;  %v2210_v53 = vld [vmem:[%s2821_s1 + $0xe0] sm:$0xff]   ;;  %v2212_v58 = vld [vmem:[%s2821_s1 + $0xe8] sm:$0xff]  }
   0xf   : > { %1907 = vmatpush3.bf16.msra.mxu0 %v2186_v5  ;;  %v2215_v5 = vld [vmem:[%s2821_s1 + $0xf0] sm:$0xff]   ;;  %s2171_s16 = smul.u32 40, %s2825_s13 }
  0x10   : > { %1935 = vmatpush3.bf16.msra.mxu1 %v2187_v6  ;;  %1908 = vmatprep.subr.bf16.mxu0 %v2281_v1  ;;  %s2353_s6 = scalar_lea.vmem %s2820_s0, %s2170_s26 }
  0x11   : > { %1936 = vmatprep.subr.bf16.mxu1 %v2281_v1  ;;  %v172_v11 = vld [vmem:[%s2353_s6] sm:$0xf]  ;;  %v2365_v12 = vld [vmem:[%s2353_s6 + $0x4] sm:$0xf]  ;;  %v2368_v13 = vld [vmem:[%s2353_s6 + $0x8] sm:$0xf]  ;;  %s170_s21 = scalar_lea.vmem %s2823_s3, %s2171_s16 }
  0x12   : > { %v2371_v14 = vld [vmem:[%s2353_s6 + $0xc] sm:$0xf]  ;;  %v1597_v15 = vcombine.low %v172_v11, %v2365_v12  ;;  %v1684_v16 = vcombine.low %v2365_v12, %v2368_v13  ;;  %v2404_v30 = vld [vmem:[%s2353_s6 + $0x10] sm:$0xf]  ;;  %v193_v31 = vld [vmem:[%s2353_s6 + $0x14] sm:$0x1] }
  0x13   : > { %1909 = vmatpush3.bf16.msra.mxu0 %v2188_v7  ;;  %v2381_v18 = vcombine.low %v2368_v13, %v2371_v14  ;;  %v2409_v32 = vcombine.low %v2404_v30, %v193_v31  ;;  %v1685_v33 = vcombine.low %v2371_v14, %v2404_v30  ;;  %v604_v49 = vld [vmem:[%s2353_s6] sm:$0x8]  ;;  %v1608_v54 = vcombine.low %v2404_v30, %v2404_v30  ;;  %v2481_v60 = vld [vmem:[%s2353_s6 + $0x14] sm:$0xf]  ;;  %v895_v3 = vld [vmem:[%s2353_s6 + $0x4] sm:$0xf] }
  0x14   : > { %1937 = vmatpush3.bf16.msra.mxu1 %v2189_v8  ;;  %1910 = vmatprep.subr.bf16.mxu0 %v2281_v1  ;;  %v230_v20 = vshll.u32 %v1597_v15, 16  ;;  %v228_v23 = vshrl.u32 %v1597_v15, 16  ;;  %v1658_v55 = vcombine.low %v604_v49, %v2365_v12  ;;  %v465_v59 = vld [vmem:[%s2353_s6] sm:$0xe]  ;;  %v2493_v4 = vld [vmem:[%s2353_s6 + $0x8] sm:$0xf]  ;;  %v1659_v6 = vcombine.low %v2404_v30, %v2481_v60 }
  0x15   : > { %1938 = vmatprep.subr.bf16.mxu1 %v2281_v1  ;;  %v235_v22 = vshll.u32 %v2381_v18, 16  ;;  %v239_v36 = vshrl.u32 %v2381_v18, 16  ;;  %v243_v37 = vshll.u32 %v2409_v32, 16  ;;  %v247_v46 = vshrl.u32 %v2409_v32, 16  ;;  %v2503_v7 = vld [vmem:[%s2353_s6 + $0xc] sm:$0xf] }
  0x16   : > { %v232_v24 = vrot.slane %v230_v20, 1  ;;  %v488_v57 = vrot.slane %v2381_v18, 1  ;;  %v631_v61 = vshrl.u32 %v1658_v55, 16  ;;  %v634_v62 = vshll.u32 %v1658_v55, 16  ;;  %v2506_v8 = vld [vmem:[%s2353_s6 + $0x10] sm:$0xf] }
  0x17   : > { %1911 = vmatpush3.bf16.msra.mxu0 %v2190_v9  ;;  %v237_v28 = vrot.slane %v235_v22, 1  ;;  %v245_v41 = vrot.slane %v243_v37, 1  ;;  %v639_v51 = vrot.slane %v235_v22, 4  ;;  %v638_v63 = vrot.slane %v239_v36, 3  ;;  %v900_v37 = vld [vmem:[%s2353_s6 + $0x18] sm:$0x1] }
  0x18   : > { %1939 = vmatpush3.bf16.msra.mxu1 %v2191_v10  ;;  %1912 = vmatprep.subr.bf16.mxu0 %v2281_v1  ;;  %v233_v29 = vor.u32 %v232_v24, %v228_v23  ;;  %v1633_v2 = vcombine.low %v465_v59, %v2365_v12  ;;  %v1711_v9 = vcombine.low %v895_v3, %v2493_v4  ;;  %v2217_v24 = vld [vmem:[%s2821_s1 + $0xf8] sm:$0xff]   ;;  %v2245_v12 = vld [vmem:[%s2821_s1 + $0x190] sm:$0xff]   ;;  %v2251_v30 = vld [vmem:[%s2821_s1 + $0x1a0] sm:$0xff]  }
  0x19   : > { %1940 = vmatprep.subr.bf16.mxu1 %v2281_v1  ;;  %v241_v40 = vor.u32 %v239_v36, %v237_v28  ;;  %v249_v50 = vor.u32 %v247_v46, %v245_v41  ;;  %v2511_v10 = vcombine.low %v2503_v7, %v2506_v8  ;;  %v1789_v11 = vcombine.low %v2493_v4, %v2503_v7  ;;  %v2220_v36 = vld [vmem:[%s2821_s1 + $0x100] sm:$0xff]   ;;  %v2228_v3 = vld [vmem:[%s2821_s1 + $0x158] sm:$0xff]   ;;  %v2246_v13 = vld [vmem:[%s2821_s1 + $0x1d0] sm:$0xff]  }
  0x1a   : > { %v238_v35 = vsel %vm226_vm1, %v233_v29, %v237_v28  ;;  %v936_v20 = vshll.u32 %v1711_v9, 16  ;;  %v487_v22 = vrot.slane %v1633_v2, 1  ;;  %v640_v31 = vor.u32 %v639_v51, %v638_v63  ;;  %v2593_v2 = vld [vmem:[%s2353_s6 + $0x18] sm:$0xf] }
  0x1b   : > { %1913 = vmatpush3.bf16.msra.mxu0 %v2192_v17  ;;  %v246_v45 = vsel %vm226_vm1, %v241_v40, %v245_v41  ;;  %v636_v17 = vrot.slane %v634_v62, 4  ;;  %v941_v23 = vshll.u32 %v2511_v10, 16  ;;  %v490_v51 = vrot.slane %v2409_v32, 1  ;;  %v2224_v32 = vld [vmem:[%s2821_s1 + $0x110] sm:$0xff]  }
  0x1c   : > { %1941 = vmatpush3.bf16.msra.mxu1 %v2193_v19  ;;  %1914 = vmatprep.subr.bf16.mxu0 %v2281_v1  ;;  %v934_v19 = vshrl.u32 %v1711_v9, 16  ;;  %v1686_v14 = vcombine.low %v2481_v60, %v2481_v60  ;;  %v2253_v60 = vld [vmem:[%s2821_s1 + $0x1a8] sm:$0xff]  }
  0x1d   : > { %1942 = vmatprep.subr.bf16.mxu1 %v2281_v1  ;;  %v943_v28 = vrot.slane %v941_v23, 1  ;;  %v491_v55 = vsel %vm486_vm2, %v488_v57, %v490_v51  ;;  %v1241_v63 = vrot.slane %v941_v23, 4 }
  0x1f   : > { %1915 = vmatpush3.bf16.msra.mxu0 %v2194_v21  ;;  %v2216_v21 = vld [vmem:[%s2821_s1 + $0xb8] sm:$0xff]  }
  0x20   : > { %1943 = vmatpush3.bf16.msra.mxu1 %v2195_v25  ;;  %1916 = vmatprep.subr.bf16.mxu0 %v2281_v1  ;;  %v643_v25 = vshrl.u32 %v1659_v6, 16 }
  0x21   : > { %1944 = vmatprep.subr.bf16.mxu1 %v2281_v1 }
  0x23   : > { %1917 = vmatpush3.bf16.msra.mxu0 %v2196_v26  ;;  %v938_v26 = vrot.slane %v936_v20, 1 }
  0x24   : > { %1945 = vmatpush3.bf16.msra.mxu1 %v2197_v27  ;;  %1958 = vmatprep.subr.bf16.mxu0 %v2281_v1  ;;  %v646_v27 = vshll.u32 %v1659_v6, 16 }
  0x25   : > { %1986 = vmatprep.subr.bf16.mxu1 %v2281_v1 }
  0x26   : > { %1919 = vmatmul.mubr.bf16.vlgmr.msra.gmra.mrb[0].mxu0 %v238_v35  ;;  %v2526_v35 = vld [vmem:[%s2353_s6 + $0x14] sm:$0xf]  ;;  %v648_v46 = vrot.slane %v646_v27, 4 }
  0x27   : > { %1947 = vmatmul.mubr.bf16.vlgmr.msra.gmra.mrb[0].mxu1 %v1597_v15  ;;  %1959 = vmatpush3.bf16.msra.mxu0 %v2200_v34  ;;  %v633_v15 = vrot.slane %v631_v61, 3  ;;  %v939_v34 = vor.u32 %v938_v26, %v934_v19  ;;  %v2540_v41 = vcombine.low %v2526_v35, %v900_v37  ;;  %v2231_v26 = vld [vmem:[%s2821_s1 + $0x128] sm:$0xff]   ;;  %v2236_v37 = vld [vmem:[%s2821_s1 + $0x178] sm:$0xff]  }
  0x28   : > { %1987 = vmatpush3.bf16.msra.mxu1 %v2201_v38  ;;  %1960 = vmatprep.subr.bf16.mxu0 %v2281_v1  ;;  %v945_v38 = vshrl.u32 %v2511_v10, 16 }
  0x29   : > { %1988 = vmatprep.subr.bf16.mxu1 %v2281_v1  ;;  %1950 = vmatprep.mubr.msk.bf16.mxu1 %vm2282_vm0, %v2281_v1  ;;  %v637_v29 = vor.u32 %v636_v17, %v633_v15  ;;  %v2537_v40 = vsel %vm226_vm1, %v939_v34, %v943_v28  ;;  %v1764_v15 = vcombine.low %v2526_v35, %v2593_v2  ;;  %v2229_v17 = vld [vmem:[%s2821_s1 + $0x120] sm:$0xff]   ;;  %v2234_v34 = vld [vmem:[%s2821_s1 + $0x170] sm:$0xff]  }
  0x2a   : > { %1922 = vmatprep.mubr.msk.bf16.mxu0 %vm2282_vm0, %v2281_v1  ;;  %v1240_v61 = vrot.slane %v945_v38, 3 }
  0x2b   : > { %1961 = vmatpush3.bf16.msra.mxu0 %v2202_v39  ;;  %v1790_v39 = vcombine.low %v2506_v8, %v2526_v35  ;;  %v1245_v20 = vshrl.u32 %v1764_v15, 16 }
  0x2c   : > { %1989 = vmatpush3.bf16.msra.mxu1 %v2203_v42  ;;  %1962 = vmatprep.subr.bf16.mxu0 %v2281_v1  ;;  %v489_v42 = vsel %vm486_vm2, %v487_v22, %v488_v57  ;;  %v1242_v9 = vor.u32 %v1241_v63, %v1240_v61  ;;  %v2230_v22 = vld [vmem:[%s2821_s1 + $0x160] sm:$0xff]   ;;  %v2265_v61 = vld [vmem:[%s2821_s1 + $0x218] sm:$0xff]   ;;  %v2267_v63 = vld [vmem:[%s2821_s1 + $0x228] sm:$0xff]  }
  0x2d   : > { %1990 = vmatprep.subr.bf16.mxu1 %v2281_v1 }
  0x2e   : > { %1923 = vmatmul.mubr.bf16.gmra.mrb[4].mxu0 %v246_v45  ;;  %v641_v45 = vsel %vm629_vm3, %v637_v29, %v640_v31 }
  0x2f   : > { %1963 = vmatpush3.bf16.msra.mxu0 %v2204_v43  ;;  %1951 = vmatmul.mubr.bf16.gmra.mrb[4].mxu1 %v2381_v18  ;;  %v2221_v43 = vld [vmem:[%s2821_s1 + $0x140] sm:$0xff]   ;;  %v2227_v18 = vld [vmem:[%s2821_s1 + $0x118] sm:$0xff]  }
  0x30   : > { %1991 = vmatpush3.bf16.msra.mxu1 %v2205_v44  ;;  %1964 = vmatprep.subr.bf16.mxu0 %v2281_v1  ;;  %v645_v44 = vrot.slane %v643_v25, 3 }
  0x31   : > { %1992 = vmatprep.subr.bf16.mxu1 %v2281_v1  ;;  %1954 = vmatprep.mubr.msk.bf16.mxu1 %vm2282_vm0, %v2281_v1 }
  0x32   : > { %1926 = vmatprep.mubr.msk.bf16.mxu0 %vm2282_vm0, %v2281_v1 }
  0x33   : > { %1965 = vmatpush3.bf16.msra.mxu0 %v2206_v47  ;;  %v947_v47 = vor.u32 %v945_v38, %v943_v28  ;;  %v2232_v28 = vld [vmem:[%s2821_s1 + $0x168] sm:$0xff]   ;;  %v2240_v38 = vld [vmem:[%s2821_s1 + $0x180] sm:$0xff]  }
  0x34   : > { %1993 = vmatpush3.bf16.msra.mxu1 %v2207_v48  ;;  %1966 = vmatprep.subr.bf16.mxu0 %v2281_v1  ;;  %v949_v48 = vshll.u32 %v2540_v41, 16 }
  0x35   : > { %1994 = vmatprep.subr.bf16.mxu1 %v2281_v1 }
  0x36   : > { %1927 = vmatmul.mubr.bf16.gmra.mrb[8].mxu0 %v249_v50  ;;  %v2552_v49 = vrot.slane %v949_v48, 1  ;;  %v2222_v50 = vld [vmem:[%s2821_s1 + $0x108] sm:$0xff]   ;;  %v2256_v48 = vld [vmem:[%s2821_s1 + $0x1f0] sm:$0xff]  }
  0x37   : > { %1967 = vmatpush3.bf16.msra.mxu0 %v2209_v52  ;;  %1955 = vmatmul.mubr.bf16.gmra.mrb[8].mxu1 %v1608_v54  ;;  %v2223_v52 = vld [vmem:[%s2821_s1 + $0x148] sm:$0xff]  }
  0x38   : > { %1995 = vmatpush3.bf16.msra.mxu1 %v2210_v53  ;;  %1968 = vmatprep.subr.bf16.mxu0 %v2281_v1  ;;  %v649_v53 = vor.u32 %v648_v46, %v645_v44  ;;  %v2564_v54 = vsel %vm226_vm1, %v947_v47, %v2552_v49  ;;  %v2243_v44 = vld [vmem:[%s2821_s1 + $0x1c8] sm:$0xff]   ;;  %v2255_v47 = vld [vmem:[%s2821_s1 + $0x1b0] sm:$0xff]  }
  0x39   : > { %1996 = vmatprep.subr.bf16.mxu1 %v2281_v1  ;;  %1974 = vmatprep.mubr.msk.bf16.mxu0 %vm2282_vm0, %v2281_v1  ;;  %v2254_v46 = vld [vmem:[%s2821_s1 + $0x1e8] sm:$0xff]  }
  0x3a   : > { %2002 = vmatprep.mubr.msk.bf16.mxu1 %vm2282_vm0, %v2281_v1  ;;  %v650_v59 = vsel %vm629_vm3, %v640_v31, %v649_v53  ;;  %v2233_v31 = vld [vmem:[%s2821_s1 + $0x130] sm:$0xff]  }
  0x3b   : > { %1969 = vmatpush3.bf16.msra.mxu0 %v2211_v56  ;;  %v2225_v56 = vld [vmem:[%s2821_s1 + $0x150] sm:$0xff]  }
  0x3c   : > { %1997 = vmatpush3.bf16.msra.mxu1 %v2212_v58  ;;  %1970 = vmatprep.subr.bf16.mxu0 %v2281_v1  ;;  %v1068_v58 = vld [vmem:[%s2353_s6 + $0x4] sm:$0x8] }
  0x3d   : > { %1998 = vmatprep.subr.bf16.mxu1 %v2281_v1  ;;  %v2584_v62 = vcombine.low %v1068_v58, %v2493_v4 }
  0x3f   : > { %1971 = vmatpush3.bf16.msra.mxu0 %v2214_v0  ;;  %v1233_v57 = vshrl.u32 %v2584_v62, 16  ;;  %v1236_v0 = vshll.u32 %v2584_v62, 16 }
  0x40   : > { %1999 = vmatpush3.bf16.msra.mxu1 %v2215_v5  ;;  %1972 = vmatprep.subr.bf16.mxu0 %v2281_v1 }
  0x41   : > { %2000 = vmatprep.subr.bf16.mxu1 %v2281_v1  ;;  %v1235_v5 = vrot.slane %v1233_v57, 3  ;;  %v1238_v6 = vrot.slane %v1236_v0, 4  ;;  %v2269_v57 = vld [vmem:[%s2821_s1 + $0x238] sm:$0xff]   ;;  %v1791_v0 = vcombine.low %v2593_v2, %v2593_v2 }
  0x43   : > { %1973 = vmatpush3.bf16.msra.mxu0 %v2216_v21  ;;  %v1239_v19 = vor.u32 %v1238_v6, %v1235_v5  ;;  %v1248_v21 = vshll.u32 %v1764_v15, 16 }
  0x44   : > { %2001 = vmatpush3.bf16.msra.mxu1 %v2217_v24  ;;  %2014 = vmatprep.subr.bf16.mxu0 %v2281_v1  ;;  %v1247_v24 = vrot.slane %v1245_v20, 3 }
  0x45   : > { %2042 = vmatprep.subr.bf16.mxu1 %v2281_v1  ;;  %v2614_v23 = vsel %vm629_vm3, %v1239_v19, %v1242_v9  ;;  %v1250_v25 = vrot.slane %v1248_v21, 4 }
  0x46   : > { %1975 = vmatmul.mubr.bf16.vlgmr.msra.gmra.mrb[12].mxu0 %v489_v42  ;;  %v2241_v42 = vld [vmem:[%s2821_s1 + $0x1c0] sm:$0xff]  }
  0x47   : > { %2003 = vmatmul.mubr.bf16.vlgmr.msra.gmra.mrb[12].mxu1 %v641_v45  ;;  %2015 = vmatpush3.bf16.msra.mxu0 %v2220_v36  ;;  %v2620_v27 = vor.u32 %v1250_v25, %v1247_v24  ;;  %v2235_v36 = vld [vmem:[%s2821_s1 + $0x138] sm:$0xff]  }
  0x48   : > { %2043 = vmatpush3.bf16.msra.mxu1 %v2221_v43  ;;  %2016 = vmatprep.subr.bf16.mxu0 %v2281_v1  ;;  %v2242_v43 = vld [vmem:[%s2821_s1 + $0x188] sm:$0xff]   ;;  %v2249_v45 = vld [vmem:[%s2821_s1 + $0x1d8] sm:$0xff]  }
  0x49   : > { %2044 = vmatprep.subr.bf16.mxu1 %v2281_v1  ;;  %1978 = vmatprep.mubr.msk.bf16.mxu0 %vm2282_vm0, %v2281_v1  ;;  %v2631_v29 = vsel %vm629_vm3, %v1242_v9, %v2620_v27 }
  0x4a   : > { %2006 = vmatprep.mubr.msk.bf16.mxu1 %vm2282_vm0, %v2281_v1 }
  0x4b   : > { %2017 = vmatpush3.bf16.msra.mxu0 %v2222_v50  ;;  %v1094_v50 = vrot.slane %v2584_v62, 3  ;;  %v2266_v62 = vld [vmem:[%s2821_s1 + $0x220] sm:$0xff]  }
  0x4c   : > { %2045 = vmatpush3.bf16.msra.mxu1 %v2223_v52  ;;  %2018 = vmatprep.subr.bf16.mxu0 %v2281_v1  ;;  %v2258_v52 = vld [vmem:[%s2821_s1 + $0x1f8] sm:$0xff]  }
  0x4d   : > { %2046 = vmatprep.subr.bf16.mxu1 %v2281_v1 }
  0x4e   : > { %1979 = vmatmul.mubr.bf16.gmra.mrb[16].mxu0 %v491_v55  ;;  %v2261_v55 = vld [vmem:[%s2821_s1 + $0x208] sm:$0xff]  }
  0x4f   : > { %2019 = vmatpush3.bf16.msra.mxu0 %v2224_v32  ;;  %2007 = vmatmul.mubr.bf16.gmra.mrb[16].mxu1 %v650_v59  ;;  %v2260_v32 = vld [vmem:[%s2821_s1 + $0x200] sm:$0xff]   ;;  %v2263_v59 = vld [vmem:[%s2821_s1 + $0x210] sm:$0xff]  }
  0x50   : > { %2047 = vmatpush3.bf16.msra.mxu1 %v2225_v56  ;;  %2020 = vmatprep.subr.bf16.mxu0 %v2281_v1 }
  0x51   : > { %2048 = vmatprep.subr.bf16.mxu1 %v2281_v1  ;;  %1982 = vmatprep.mubr.msk.bf16.mxu0 %vm2282_vm0, %v2281_v1 }
  0x52   : > { %2010 = vmatprep.mubr.msk.bf16.mxu1 %vm2282_vm0, %v2281_v1 }
  0x53   : > { %2021 = vmatpush3.bf16.msra.mxu0 %v2227_v18  ;;  %v2268_v18 = vld [vmem:[%s2821_s1 + $0x230] sm:$0xff]  }
  0x54   : > { %2049 = vmatpush3.bf16.msra.mxu1 %v2228_v3  ;;  %2022 = vmatprep.subr.bf16.mxu0 %v2281_v1 }
  0x55   : > { %2050 = vmatprep.subr.bf16.mxu1 %v2281_v1 }
  0x56   : > { %1983 = vmatmul.mubr.bf16.gmra.mrb[20].mxu0 %v490_v51  ;;  %v1095_v51 = vrot.slane %v2511_v10, 3 }
  0x57   : > { %2023 = vmatpush3.bf16.msra.mxu0 %v2229_v17  ;;  %2011 = vmatmul.mubr.bf16.gmra.mrb[20].mxu1 %v649_v53  ;;  %v1069_v53 = vld [vmem:[%s2353_s6 + $0x18] sm:$0x7] }
  0x58   : > { %2051 = vmatpush3.bf16.msra.mxu1 %v2230_v22  ;;  %2024 = vmatprep.subr.bf16.mxu0 %v2281_v1  ;;  %v1739_v10 = vcombine.low %v2526_v35, %v1069_v53 }
  0x59   : > { %2052 = vmatprep.subr.bf16.mxu1 %v2281_v1  ;;  %2030 = vmatprep.mubr.msk.bf16.mxu0 %vm2282_vm0, %v2281_v1 }
  0x5a   : > { %2058 = vmatprep.mubr.msk.bf16.mxu1 %vm2282_vm0, %v2281_v1  ;;  %v1097_v56 = vrot.slane %v1739_v10, 3 }
  0x5b   : > { %2025 = vmatpush3.bf16.msra.mxu0 %v2231_v26 }
  0x5c   : > { %2053 = vmatpush3.bf16.msra.mxu1 %v2232_v28  ;;  %2026 = vmatprep.subr.bf16.mxu0 %v2281_v1  ;;  %v1098_v58 = vsel %vm1093_vm4, %v1095_v51, %v1097_v56 }
  0x5d   : > { %2054 = vmatprep.subr.bf16.mxu1 %v2281_v1 }
  0x5f   : > { %2027 = vmatpush3.bf16.msra.mxu0 %v2233_v31 }
  0x60   : > { %2055 = vmatpush3.bf16.msra.mxu1 %v2234_v34  ;;  %2028 = vmatprep.subr.bf16.mxu0 %v2281_v1 }
  0x61   : > { %2056 = vmatprep.subr.bf16.mxu1 %v2281_v1 }
  0x63   : > { %2029 = vmatpush3.bf16.msra.mxu0 %v2235_v36 }
  0x64   : > { %2057 = vmatpush3.bf16.msra.mxu1 %v2236_v37  ;;  %2070 = vmatprep.subr.bf16.mxu0 %v2281_v1 }
  0x65   : > { %2098 = vmatprep.subr.bf16.mxu1 %v2281_v1 }
  0x66   : > { %2031 = vmatmul.mubr.bf16.vlgmr.msra.gmra.mrb[24].mxu0 %v1684_v16  ;;  %v2248_v16 = vld [vmem:[%s2821_s1 + $0x198] sm:$0xff]  }
  0x67   : > { %2059 = vmatmul.mubr.bf16.vlgmr.msra.gmra.mrb[24].mxu1 %v2537_v40  ;;  %2071 = vmatpush3.bf16.msra.mxu0 %v2240_v38  ;;  %v953_v40 = vshrl.u32 %v2540_v41, 16  ;;  %v2252_v41 = vld [vmem:[%s2821_s1 + $0x1e0] sm:$0xff]  }
  0x68   : > { %2099 = vmatpush3.bf16.msra.mxu1 %v2241_v42  ;;  %2072 = vmatprep.subr.bf16.mxu0 %v2281_v1 }
  0x69   : > { %2100 = vmatprep.subr.bf16.mxu1 %v2281_v1  ;;  %2034 = vmatprep.mubr.msk.bf16.mxu0 %vm2282_vm0, %v2281_v1 }
  0x6a   : > { %2062 = vmatprep.mubr.msk.bf16.mxu1 %vm2282_vm0, %v2281_v1 }
  0x6b   : > { %2073 = vmatpush3.bf16.msra.mxu0 %v2242_v43 }
  0x6c   : > { %2101 = vmatpush3.bf16.msra.mxu1 %v2243_v44  ;;  %2074 = vmatprep.subr.bf16.mxu0 %v2281_v1 }
  0x6d   : > { %2102 = vmatprep.subr.bf16.mxu1 %v2281_v1 }
  0x6e   : > { %2035 = vmatmul.mubr.bf16.gmra.mrb[28].mxu0 %v1685_v33  ;;  %v955_v33 = vor.u32 %v953_v40, %v2552_v49  ;;  %v2257_v49 = vld [vmem:[%s2821_s1 + $0x1b8] sm:$0xff]  }
  0x6f   : > { %2075 = vmatpush3.bf16.msra.mxu0 %v2245_v12  ;;  %2063 = vmatmul.mubr.bf16.gmra.mrb[28].mxu1 %v2564_v54  ;;  %v1096_v54 = vsel %vm1093_vm4, %v1094_v50, %v1095_v51 }
  0x70   : > { %2103 = vmatpush3.bf16.msra.mxu1 %v2246_v13  ;;  %2076 = vmatprep.subr.bf16.mxu0 %v2281_v1 }
  0x71   : > { %2104 = vmatprep.subr.bf16.mxu1 %v2281_v1  ;;  %2038 = vmatprep.mubr.msk.bf16.mxu0 %vm2282_vm0, %v2281_v1 }
  0x72   : > { %2066 = vmatprep.mubr.msk.bf16.mxu1 %vm2282_vm0, %v2281_v1 }
  0x73   : > { %2077 = vmatpush3.bf16.msra.mxu0 %v2248_v16 }
  0x74   : > { %2105 = vmatpush3.bf16.msra.mxu1 %v2249_v45  ;;  %2078 = vmatprep.subr.bf16.mxu0 %v2281_v1 }
  0x75   : > { %2106 = vmatprep.subr.bf16.mxu1 %v2281_v1 }
  0x76   : > { %2039 = vmatmul.mubr.bf16.gmra.mrb[32].mxu0 %v1686_v14 }
  0x77   : > { %2079 = vmatpush3.bf16.msra.mxu0 %v2251_v30  ;;  %2067 = vmatmul.mubr.bf16.gmra.mrb[32].mxu1 %v955_v33 }
  0x78   : > { %2107 = vmatpush3.bf16.msra.mxu1 %v2252_v41  ;;  %2080 = vmatprep.subr.bf16.mxu0 %v2281_v1 }
  0x79   : > { %2108 = vmatprep.subr.bf16.mxu1 %v2281_v1  ;;  %2086 = vmatprep.mubr.msk.bf16.mxu0 %vm2282_vm0, %v2281_v1 }
  0x7a   : > { %2114 = vmatprep.mubr.msk.bf16.mxu1 %vm2282_vm0, %v2281_v1 }
  0x7b   : > { %2081 = vmatpush3.bf16.msra.mxu0 %v2253_v60 }
  0x7c   : > { %2109 = vmatpush3.bf16.msra.mxu1 %v2254_v46  ;;  %2082 = vmatprep.subr.bf16.mxu0 %v2281_v1 }
  0x7d   : > { %2110 = vmatprep.subr.bf16.mxu1 %v2281_v1 }
  0x7f   : > { %2083 = vmatpush3.bf16.msra.mxu0 %v2255_v47 }
  0x80   : > { %2111 = vmatpush3.bf16.msra.mxu1 %v2256_v48  ;;  %2084 = vmatprep.subr.bf16.mxu0 %v2281_v1 }
  0x81   : > { %2112 = vmatprep.subr.bf16.mxu1 %v2281_v1 }
  0x83   : > { %2085 = vmatpush3.bf16.msra.mxu0 %v2257_v49 }
  0x84   : > { %2113 = vmatpush3.bf16.msra.mxu1 %v2258_v52  ;;  %2126 = vmatprep.subr.bf16.mxu0 %v2281_v1 }
  0x85   : > { %2154 = vmatprep.subr.bf16.mxu1 %v2281_v1 }
  0x86   : > { %2087 = vmatmul.mubr.bf16.vlgmr.msra.gmra.mrb[36].mxu0 %v1096_v54 }
  0x87   : > { %2115 = vmatmul.mubr.bf16.vlgmr.msra.gmra.mrb[36].mxu1 %v2614_v23  ;;  %2127 = vmatpush3.bf16.msra.mxu0 %v2260_v32 }
  0x88   : > { %2162 = vmatpush3.bf16.msra.mxu1 %v2260_v32  ;;  %2128 = vmatprep.subr.bf16.mxu0 %v2281_v1 }
  0x89   : > { %2155 = vmatprep.subr.bf16.mxu1 %v2281_v1  ;;  %2090 = vmatprep.mubr.msk.bf16.mxu0 %vm2282_vm0, %v2281_v1 }
  0x8a   : > { %2118 = vmatprep.mubr.msk.bf16.mxu1 %vm2282_vm0, %v2281_v1 }
  0x8b   : > { %2129 = vmatpush3.bf16.msra.mxu0 %v2261_v55 }
  0x8c   : > { %2163 = vmatpush3.bf16.msra.mxu1 %v2261_v55  ;;  %2130 = vmatprep.subr.bf16.mxu0 %v2281_v1 }
  0x8d   : > { %2156 = vmatprep.subr.bf16.mxu1 %v2281_v1 }
  0x8e   : > { %2091 = vmatmul.mubr.bf16.gmra.mrb[40].mxu0 %v1098_v58 }
  0x8f   : > { %2131 = vmatpush3.bf16.msra.mxu0 %v2263_v59  ;;  %2119 = vmatmul.mubr.bf16.gmra.mrb[40].mxu1 %v2631_v29 }
  0x90   : > { %2164 = vmatpush3.bf16.msra.mxu1 %v2263_v59  ;;  %2132 = vmatprep.subr.bf16.mxu0 %v2281_v1 }
  0x91   : > { %2157 = vmatprep.subr.bf16.mxu1 %v2281_v1  ;;  %2094 = vmatprep.mubr.msk.bf16.mxu0 %vm2282_vm0, %v2281_v1 }
  0x92   : > { %2122 = vmatprep.mubr.msk.bf16.mxu1 %vm2282_vm0, %v2281_v1 }
  0x93   : > { %2133 = vmatpush3.bf16.msra.mxu0 %v2265_v61 }
  0x94   : > { %2165 = vmatpush3.bf16.msra.mxu1 %v2265_v61  ;;  %2134 = vmatprep.subr.bf16.mxu0 %v2281_v1 }
  0x95   : > { %2158 = vmatprep.subr.bf16.mxu1 %v2281_v1 }
  0x96   : > { %2095 = vmatmul.mubr.bf16.gmra.mrb[44].mxu0 %v1097_v56 }
  0x97   : > { %2135 = vmatpush3.bf16.msra.mxu0 %v2266_v62  ;;  %2123 = vmatmul.mubr.bf16.gmra.mrb[44].mxu1 %v2620_v27 }
  0x98   : > { %2166 = vmatpush3.bf16.msra.mxu1 %v2266_v62  ;;  %2136 = vmatprep.subr.bf16.mxu0 %v2281_v1 }
  0x99   : > { %2159 = vmatprep.subr.bf16.mxu1 %v2281_v1  ;;  %2142 = vmatprep.mubr.msk.bf16.mxu0 %vm2282_vm0, %v2281_v1 }
  0x9a   : > { %2146 = vmatprep.mubr.msk.bf16.mxu1 %vm2282_vm0, %v2281_v1 }
  0x9b   : > { %2137 = vmatpush3.bf16.msra.mxu0 %v2267_v63 }
  0x9c   : > { %2167 = vmatpush3.bf16.msra.mxu1 %v2267_v63  ;;  %2138 = vmatprep.subr.bf16.mxu0 %v2281_v1 }
  0x9d   : > { %2160 = vmatprep.subr.bf16.mxu1 %v2281_v1 }
  0x9f   : > { %2139 = vmatpush3.bf16.msra.mxu0 %v2268_v18 }
  0xa0   : > { %2168 = vmatpush3.bf16.msra.mxu1 %v2268_v18  ;;  %2140 = vmatprep.subr.bf16.mxu0 %v2281_v1 }
  0xa1   : > { %2161 = vmatprep.subr.bf16.mxu1 %v2281_v1 }
  0xa3   : > { %2141 = vmatpush3.bf16.msra.mxu0 %v2269_v57 }
  0xa4   : > { %2169 = vmatpush3.bf16.msra.mxu1 %v2269_v57 }
  0xa6   : > { %2143 = vmatmul.mubr.bf16.vlgmr.msra.gmra.mrb[48].mxu0 %v1789_v11 }
  0xa7   : > { %2147 = vmatmul.mubr.bf16.vlgmr.msra.gmra.mrb[48].mxu1 %v1790_v39 }
  0xa8   : > { %2150 = vmatprep.mubr.msk.bf16.mxu1 %vm2282_vm0, %v2281_v1 }
  0xaf   : > { %2151 = vmatmul.mubr.bf16.gmra.mrb[52].mxu1 %v1791_v0 }
  0xf9   : > { %v335_v3 = vpop.f32.mrb[0].mxu0 }
  0xfa   : > { %v443_v5 = vpop.f32.mrb[0].mxu1  ;;  %v1920_v6 = vpop.f32.mrb[1].mxu0 }
  0xfb   : > { %v444_v9 = vadd.f32 %v443_v5, %v335_v3  ;;  %v1948_v15 = vpop.f32.mrb[1].mxu1  ;;  %v338_v17 = vpop.f32.mrb[2].mxu0 }
  0xfc   : > { %v446_v19 = vpop.f32.mrb[2].mxu1  ;;  %v1921_v4 = vpop.f32.mrb[3].mxu0 }
  0xfd   : > { %v447_v7 = vadd.f32 %v446_v19, %v338_v17  ;;  %v1949_v11 = vpop.f32.mrb[3].mxu1 }
 0x101   : > { %v343_v20 = vpop.f32.mrb[4].mxu0 }
 0x102   : > { %v451_v8 = vpop.f32.mrb[4].mxu1  ;;  %v1924_v35 = vpop.f32.mrb[5].mxu0 }
 0x103   : > { %v452_v39 = vadd.f32 %v451_v8, %v343_v20  ;;  %v1952_v21 = vpop.f32.mrb[5].mxu1  ;;  %v346_v1 = vpop.f32.mrb[6].mxu0 }
 0x104   : > { %v454_v22 = vpop.f32.mrb[6].mxu1  ;;  %v1925_v23 = vpop.f32.mrb[7].mxu0 }
 0x105   : > { %v455_v2 = vadd.f32 %v454_v22, %v346_v1  ;;  %v1953_v24 = vpop.f32.mrb[7].mxu1 }
 0x109   : > { %v351_v25 = vpop.f32.mrb[8].mxu0 }
 0x10a   : > { %v459_v26 = vpop.f32.mrb[8].mxu1  ;;  %v1928_v27 = vpop.f32.mrb[9].mxu0 }
 0x10b   : > { %v1956_v28 = vpop.f32.mrb[9].mxu1  ;;  %v460_v29 = vadd.f32 %v459_v26, %v351_v25  ;;  %v354_v31 = vpop.f32.mrb[10].mxu0 }
 0x10c   : > { %v462_v34 = vpop.f32.mrb[10].mxu1  ;;  %v1929_v36 = vpop.f32.mrb[11].mxu0 }
 0x10d   : > { %v1957_v37 = vpop.f32.mrb[11].mxu1 }
 0x119   : > { %v577_v38 = vpop.f32.mrb[12].mxu0 }
 0x11a   : > { %v599_v42 = vadd.f32 %v577_v38, %v444_v9  ;;  %v736_v43 = vpop.f32.mrb[12].mxu1  ;;  %v1976_v44 = vpop.f32.mrb[13].mxu0 }
 0x11b   : > { %v2004_v12 = vpop.f32.mrb[13].mxu1  ;;  %v580_v13 = vpop.f32.mrb[14].mxu0 }
 0x11c   : > { %v758_v16 = vadd.f32 %v736_v43, %v599_v42  ;;  %v600_v40 = vadd.f32 %v580_v13, %v447_v7  ;;  %v739_v45 = vpop.f32.mrb[14].mxu1  ;;  %v1977_v14 = vpop.f32.mrb[15].mxu0 }
 0x11d   : > { %v2005_v30 = vpop.f32.mrb[15].mxu1 }
 0x11e   : > { %v759_v33 = vadd.f32 %v739_v45, %v600_v40 }
 0x121   : > { %v585_v41 = vpop.f32.mrb[16].mxu0 }
 0x122   : > { %v601_v60 = vadd.f32 %v585_v41, %v452_v39  ;;  %v1980_v46 = vpop.f32.mrb[17].mxu0  ;;  %v744_v47 = vpop.f32.mrb[16].mxu1 }
 0x123   : > { %v588_v48 = vpop.f32.mrb[18].mxu0  ;;  %v2008_v49 = vpop.f32.mrb[17].mxu1 }
 0x124   : > { %v602_v50 = vadd.f32 %v588_v48, %v455_v2  ;;  %v760_v51 = vadd.f32 %v744_v47, %v601_v60  ;;  %v747_v52 = vpop.f32.mrb[18].mxu1  ;;  %v1981_v53 = vpop.f32.mrb[19].mxu0 }
 0x125   : > { %v2009_v54 = vpop.f32.mrb[19].mxu1 }
 0x126   : > { %v761_v32 = vadd.f32 %v747_v52, %v602_v50 }
 0x129   : > { %v593_v10 = vpop.f32.mrb[20].mxu0 }
 0x12a   : > { %v603_v55 = vadd.f32 %v593_v10, %v460_v29  ;;  %v752_v56 = vpop.f32.mrb[20].mxu1  ;;  %v1984_v58 = vpop.f32.mrb[21].mxu0 }
 0x12b   : > { %v2012_v59 = vpop.f32.mrb[21].mxu1  ;;  %v596_v61 = vpop.f32.mrb[22].mxu0 }
 0x12c   : > { %v762_v62 = vadd.f32 %v752_v56, %v603_v55  ;;  %v755_v63 = vpop.f32.mrb[22].mxu1  ;;  %v1985_v18 = vpop.f32.mrb[23].mxu0 }
 0x12d   : > { %v2013_v57 = vpop.f32.mrb[23].mxu1 }
 0x139   : > { %v868_v0 = vpop.f32.mrb[24].mxu0 }
 0x13a   : > { %v890_v3 = vadd.f32 %v868_v0, %v758_v16  ;;  %v1041_v5 = vpop.f32.mrb[24].mxu1  ;;  %v2032_v6 = vpop.f32.mrb[25].mxu0 }
 0x13b   : > { %v2060_v9 = vpop.f32.mrb[25].mxu1  ;;  %v871_v15 = vpop.f32.mrb[26].mxu0 }
 0x13c   : > { %v1063_v17 = vadd.f32 %v1041_v5, %v890_v3  ;;  %v891_v19 = vadd.f32 %v871_v15, %v759_v33  ;;  %v1044_v4 = vpop.f32.mrb[26].mxu1  ;;  %v2033_v7 = vpop.f32.mrb[27].mxu0  ;;  %v1800_v15 = vld [vmem:[%s2822_s2] ss:$0 sm:$0xff] }
 0x13d   : > { %v2061_v11 = vpop.f32.mrb[27].mxu1 }
 0x13e   : > { %v1064_v20 = vadd.f32 %v1044_v4, %v891_v19 }
 0x141   : > { %v876_v8 = vpop.f32.mrb[28].mxu0 }
 0x142   : > { %v892_v35 = vadd.f32 %v876_v8, %v760_v51  ;;  %v2036_v39 = vpop.f32.mrb[29].mxu0  ;;  %v1049_v21 = vpop.f32.mrb[28].mxu1 }
 0x143   : > { %v879_v1 = vpop.f32.mrb[30].mxu0  ;;  %v2064_v22 = vpop.f32.mrb[29].mxu1 }
 0x144   : > { %v893_v23 = vadd.f32 %v879_v1, %v761_v32  ;;  %v1065_v2 = vadd.f32 %v1049_v21, %v892_v35  ;;  %v1052_v24 = vpop.f32.mrb[30].mxu1  ;;  %v2037_v25 = vpop.f32.mrb[31].mxu0 }
 0x145   : > { %v2065_v26 = vpop.f32.mrb[31].mxu1 }
 0x146   : > { %v1066_v27 = vadd.f32 %v1052_v24, %v893_v23 }
 0x149   : > { %v884_v28 = vpop.f32.mrb[32].mxu0 }
 0x14a   : > { %v894_v29 = vadd.f32 %v884_v28, %v762_v62  ;;  %v1057_v31 = vpop.f32.mrb[32].mxu1  ;;  %v2040_v34 = vpop.f32.mrb[33].mxu0 }
 0x14b   : > { %v2068_v36 = vpop.f32.mrb[33].mxu1  ;;  %v887_v37 = vpop.f32.mrb[34].mxu0 }
 0x14c   : > { %v1067_v38 = vadd.f32 %v1057_v31, %v894_v29  ;;  %v1060_v42 = vpop.f32.mrb[34].mxu1  ;;  %v2041_v43 = vpop.f32.mrb[35].mxu0 }
 0x14d   : > { %v2069_v44 = vpop.f32.mrb[35].mxu1 }
 0x159   : > { %v1184_v12 = vpop.f32.mrb[36].mxu0 }
 0x15a   : > { %v1206_v13 = vadd.f32 %v1184_v12, %v1063_v17  ;;  %v1338_v16 = vpop.f32.mrb[36].mxu1  ;;  %v2088_v40 = vpop.f32.mrb[37].mxu0 }
 0x15b   : > { %v2116_v45 = vpop.f32.mrb[37].mxu1  ;;  %v1187_v14 = vpop.f32.mrb[38].mxu0 }
 0x15c   : > { %v1360_v30 = vadd.f32 %v1338_v16, %v1206_v13  ;;  %v1207_v33 = vadd.f32 %v1187_v14, %v1064_v20  ;;  %v1341_v41 = vpop.f32.mrb[38].mxu1  ;;  %v2089_v60 = vpop.f32.mrb[39].mxu0 }
 0x15d   : > { %v2117_v46 = vpop.f32.mrb[39].mxu1 }
 0x15e   : > { %v1361_v47 = vadd.f32 %v1341_v41, %v1207_v33 }
 0x161   : > { %v1192_v48 = vpop.f32.mrb[40].mxu0 }
 0x162   : > { %v1208_v49 = vadd.f32 %v1192_v48, %v1065_v2  ;;  %v2092_v50 = vpop.f32.mrb[41].mxu0  ;;  %v1346_v51 = vpop.f32.mrb[40].mxu1 }
 0x163   : > { %v1195_v52 = vpop.f32.mrb[42].mxu0  ;;  %v2120_v53 = vpop.f32.mrb[41].mxu1 }
 0x164   : > { %v1209_v54 = vadd.f32 %v1195_v52, %v1066_v27  ;;  %v1362_v32 = vadd.f32 %v1346_v51, %v1208_v49  ;;  %v1349_v10 = vpop.f32.mrb[42].mxu1  ;;  %v2093_v55 = vpop.f32.mrb[43].mxu0 }
 0x165   : > { %v2121_v56 = vpop.f32.mrb[43].mxu1 }
 0x166   : > { %v1363_v58 = vadd.f32 %v1349_v10, %v1209_v54 }
 0x169   : > { %v1200_v59 = vpop.f32.mrb[44].mxu0 }
 0x16a   : > { %v1210_v61 = vadd.f32 %v1200_v59, %v1067_v38  ;;  %v1354_v62 = vpop.f32.mrb[44].mxu1  ;;  %v2096_v63 = vpop.f32.mrb[45].mxu0 }
 0x16b   : > { %v2124_v18 = vpop.f32.mrb[45].mxu1  ;;  %v1203_v57 = vpop.f32.mrb[46].mxu0 }
 0x16c   : > { %v1364_v0 = vadd.f32 %v1354_v62, %v1210_v61  ;;  %v1357_v3 = vpop.f32.mrb[46].mxu1  ;;  %v2097_v5 = vpop.f32.mrb[47].mxu0 }
 0x16d   : > { %v2125_v6 = vpop.f32.mrb[47].mxu1 }
 0x179   : > { %v1470_v9 = vpop.f32.mrb[48].mxu0 }
 0x17a   : > { %v1492_v17 = vadd.f32 %v1470_v9, %v1360_v30  ;;  %v1478_v19 = vpop.f32.mrb[48].mxu1  ;;  %v2144_v4 = vpop.f32.mrb[49].mxu0 }
 0x17b   : > { %v1494_v7 = vadd.f32 %v1478_v19, %v1362_v32  ;;  %v2148_v11 = vpop.f32.mrb[49].mxu1  ;;  %v1473_v20 = vpop.f32.mrb[50].mxu0 }
 0x17c   : > { %v1504_v8 = vadd.f32 %v1800_v15, %v1492_v17  ;;  %v1493_v35 = vadd.f32 %v1473_v20, %v1361_v47  ;;  %v1481_v39 = vpop.f32.mrb[50].mxu1  ;;  %v2145_v21 = vpop.f32.mrb[51].mxu0 }
 0x17d   : > { %v1506_v1 = vadd.f32 %v1800_v15, %v1494_v7  ;;  %v1495_v22 = vadd.f32 %v1481_v39, %v1363_v58  ;;  %v2149_v23 = vpop.f32.mrb[51].mxu1 }
 0x17e   : > { %v1509_v2 = vmax.f32 %v1504_v8, 0.0  ;;  %v1505_v24 = vadd.f32 %v1800_v15, %v1493_v35 }
 0x17f   : > { %v1511_v25 = vmax.f32 %v1506_v1, 0.0  ;;  %v1507_v26 = vadd.f32 %v1800_v15, %v1495_v22 }
 0x180   : > { %1514 = vst [vmem:[%s170_s21] sm:$0xff] %v1509_v2  ;;  %v1510_v27 = vmax.f32 %v1505_v24, 0.0 }
 0x181   : > { %1516 = vst [vmem:[%s170_s21 + $0x10] sm:$0xff] %v1511_v25  ;;  %v1512_v28 = vmax.f32 %v1507_v26, 0.0 }
 0x182   : > { %1515 = vst [vmem:[%s170_s21 + $0x8] sm:$0xff] %v1510_v27  ;;  %v1486_v29 = vpop.f32.mrb[52].mxu1 }
 0x183   : > { %1517 = vst [vmem:[%s170_s21 + $0x18] sm:$0xff] %v1512_v28  ;;  %v1496_v31 = vadd.f32 %v1486_v29, %v1364_v0  ;;  %v2152_v34 = vpop.f32.mrb[53].mxu1 }
 0x184   : > { %v1489_v36 = vpop.f32.mrb[54].mxu1 }
 0x185   : > { %v1508_v37 = vadd.f32 %v1800_v15, %v1496_v31  ;;  %v2153_v38 = vpop.f32.mrb[55].mxu1 }
 0x187   : > { %v1513_v42 = vmax.f32 %v1508_v37, 0.0 }
 0x189   : > { %1518 = vst [vmem:[%s170_s21 + $0x20] sm:$0xff] %v1513_v42 }
 0x18a PF: > { %s13_s12 = sadd.s32 1, %s2279_s12  }
 0x18b   : > { %p10_p4 = scmp.ge.s32.totalorder %s13_s12, 4  }
 0x18d   :  { %12 = sbr.rel (!%p10_p4) target bundleno = 1 (0x1), region = 70 }

// kernel: run.4
= control target key start
LH: loop header
LB: loop body
LE: loop exit
PB: predicated region body
PF: predicated region fallthrough
CT: control target
= control target key end

     0   :  { %s3342_s12 = smov 0   ;;  %s3926_s0 = inlined_call_operand.vmem [shape: bf16[2,152,128], index: 0, kind: input, shape index: {}]   ;;  %s3927_s1 = inlined_call_operand.vmem [shape: bf16[9,128,128], index: 1, kind: input, shape index: {}]   ;;  %s3928_s2 = inlined_call_operand.vmem [shape: f32[1,128], index: 2, kind: input, shape index: {}]   ;;  %s3929_s3 = inlined_call_operand.vmem [shape: f32[2,120,128], index: 3, kind: output, shape index: {}]  }
   0x1 LB: > { %s2404_s13 = sadd.s32 4294967295, %s3320_s12   ;;  %p2408_p0 = scmp.ge.s32.totalorder %s3320_s12, 1  ;;  %s3320_s12 = sphi %s3342_s12, %s13_s12  }
   0x2   : > { %p137_p1 = scmp.lt.s32.totalorder %s3320_s12, 3 }
   0x4   : > { %p138_p2 = pnand %p2408_p0, %p137_p1 }
   0x5   : > { %v3205_v0 = vld [vmem:[%s3927_s1 + $0x40] sm:$0xff] (!%p138_p2)   ;;  %p161_p3 = scmp.lt.s32.totalorder (!%p138_p2), %s2404_s13, 1  ;;  %v3207_v2 = vld [vmem:[%s3927_s1 + $0x48] sm:$0xff] (!%p138_p2)   ;;  %v3209_v4 = vld [vmem:[%s3927_s1 + $0x50] sm:$0xff] (!%p138_p2)   ;;  %vm261_vm0 = vsmask.f32 (!%p138_p2), 7424 }
   0x6   : > { %141 = sbr.rel (%p138_p2) target bundleno = 398 (0x18e), region = 32  ;;  %v3206_v1 = vld [vmem:[%s3927_s1 + $0x100] sm:$0xff] (!%p138_p2)   ;;  %2795 = vmatprep.subr.bf16.mxu1 (!%p138_p2), %v3205_v0  ;;  %v3208_v3 = vld [vmem:[%s3927_s1 + $0x108] sm:$0xff] (!%p138_p2)   ;;  %v3210_v5 = vld [vmem:[%s3927_s1 + $0x110] sm:$0xff] (!%p138_p2)   ;;  %vm1111_vm1 = vsmask.f32 (!%p138_p2), 5376 }
   0x7   : > { %2923 = vmatprep.subr.bf16.mxu0 (!%p138_p2), %v3206_v1  ;;  %2796 = vmatpush3.bf16.msra.mxu1 (!%p138_p2), %v3205_v0  ;;  %v3211_v6 = vld [vmem:[%s3927_s1 + $0x58] sm:$0xff] (!%p138_p2)   ;;  %v3213_v8 = vld [vmem:[%s3927_s1 + $0x60] sm:$0xff] (!%p138_p2)   ;;  %v3215_v10 = vld [vmem:[%s3927_s1 + $0x68] sm:$0xff] (!%p138_p2)   ;;  %vm1371_vm2 = vcmask (!%p138_p2), 1044480   ;;  %vm651_vm3 = vcmask (!%p138_p2), 1046528   ;;  %vm907_vm4 = vcmask (!%p138_p2), 1045504  }
   0x8   : > { %2924 = vmatpush3.bf16.msra.mxu0 (!%p138_p2), %v3206_v1  ;;  %2797 = vmatprep.subr.bf16.mxu1 (!%p138_p2), %v3207_v2  ;;  %v3212_v7 = vld [vmem:[%s3927_s1 + $0x118] sm:$0xff] (!%p138_p2)   ;;  %v3214_v9 = vld [vmem:[%s3927_s1 + $0x120] sm:$0xff] (!%p138_p2)   ;;  %v3216_v11 = vld [vmem:[%s3927_s1 + $0x128] sm:$0xff] (!%p138_p2)  }
   0x9   : > { %2925 = vmatprep.subr.bf16.mxu0 (!%p138_p2), %v3208_v3  ;;  %v3217_v17 = vld [vmem:[%s3927_s1 + $0x70] sm:$0xff] (!%p138_p2)   ;;  %v3219_v32 = vld [vmem:[%s3927_s1 + $0x78] sm:$0xff] (!%p138_p2)   ;;  %v3226_v48 = vld [vmem:[%s3927_s1] sm:$0xff] (!%p138_p2)  }
   0xa   : > { %v3218_v20 = vld [vmem:[%s3927_s1 + $0x130] sm:$0xff] (!%p138_p2)   ;;  %v3220_v36 = vld [vmem:[%s3927_s1 + $0x138] sm:$0xff] (!%p138_p2)   ;;  %v3228_v54 = vld [vmem:[%s3927_s1 + $0x140] sm:$0xff] (!%p138_p2)  }
   0xb   : > { %2798 = vmatpush3.bf16.msra.mxu1 (!%p138_p2), %v3207_v2  ;;  %v3229_v59 = vld [vmem:[%s3927_s1 + $0x8] sm:$0xff] (!%p138_p2)  }
   0xc   : > { %2926 = vmatpush3.bf16.msra.mxu0 (!%p138_p2), %v3208_v3  ;;  %2799 = vmatprep.subr.bf16.mxu1 (!%p138_p2), %v3209_v4  ;;  %v3230_v3 = vld [vmem:[%s3927_s1 + $0x148] sm:$0xff] (!%p138_p2)  }
   0xd   : > { %s3931_s13 = smov (!%p161_p3, %s2404_s13), 1  ;;  %2927 = vmatprep.subr.bf16.mxu0 %v3210_v5 }
   0xe   : > { %s3195_s30 = smul.u32 76, %s3931_s13 }
   0xf   : > { %2800 = vmatpush3.bf16.msra.mxu1 %v3209_v4  ;;  %s3196_s16 = smul.u32 120, %s3931_s13 }
  0x10   : > { %2928 = vmatpush3.bf16.msra.mxu0 %v3210_v5  ;;  %2801 = vmatprep.subr.bf16.mxu1 %v3211_v6  ;;  %s3386_s10 = scalar_lea.vmem %s3926_s0, %s3195_s30 }
  0x11   : > { %2929 = vmatprep.subr.bf16.mxu0 %v3212_v7  ;;  %v172_v12 = vld [vmem:[%s3386_s10] sm:$0xf]  ;;  %v3396_v13 = vld [vmem:[%s3386_s10 + $0x4] sm:$0xf]  ;;  %v3402_v15 = vld [vmem:[%s3386_s10 + $0x8] sm:$0xff]   ;;  %s3887_s20 = scalar_lea.vmem %s3929_s3, %s3196_s16 }
  0x12   : > { %v3399_v14 = vcombine.low %v172_v12, %v3396_v13  ;;  %v3405_v16 = vld [vmem:[%s3386_s10 + $0xc] sm:$0xff]   ;;  %v834_v18 = vld [vmem:[%s3386_s10 + $0x4] sm:$0xc]  ;;  %v3412_v19 = vld [vmem:[%s3386_s10 + $0x8] sm:$0xf]  ;;  %v270_v23 = vshll.u32 %v3402_v15, 16 }
  0x13   : > { %2802 = vmatpush3.bf16.msra.mxu1 %v3211_v6  ;;  %v3421_v24 = vcombine.low %v834_v18, %v3412_v19  ;;  %v3424_v25 = vld [vmem:[%s3386_s10 + $0x10] sm:$0xff]   ;;  %v1121_v26 = vshrl.u32 %v3405_v16, 16  ;;  %v1124_v27 = vshll.u32 %v3405_v16, 16  ;;  %v274_v40 = vshrl.u32 %v3402_v15, 16  ;;  %v3453_v56 = vld [vmem:[%s3386_s10 + $0x18] sm:$0xff]   ;;  %v3464_v62 = vld [vmem:[%s3386_s10 + $0x20] sm:$0xff]  }
  0x14   : > { %2930 = vmatpush3.bf16.msra.mxu0 %v3212_v7  ;;  %2803 = vmatprep.subr.bf16.mxu1 %v3213_v8  ;;  %v263_v21 = vshrl.u32 %v3399_v14, 16  ;;  %v265_v22 = vshll.u32 %v3399_v14, 16  ;;  %v272_v29 = vrot.slane %v270_v23, 1  ;;  %v278_v35 = vshll.u32 %v3424_v25, 16  ;;  %v3439_v41 = vld [vmem:[%s3386_s10 + $0x14] sm:$0xff]   ;;  %v3456_v57 = vld [vmem:[%s3386_s10 + $0x1c] sm:$0xff]  }
  0x15   : > { %2931 = vmatprep.subr.bf16.mxu0 %v3214_v9  ;;  %v1113_v30 = vshrl.u32 %v3421_v24, 16  ;;  %v1116_v31 = vshll.u32 %v3421_v24, 16  ;;  %v1123_v33 = vrot.slane %v1121_v26, 2  ;;  %v1126_v34 = vrot.slane %v1124_v27, 3  ;;  %v3475_v6 = vld [vmem:[%s3386_s10 + $0x24] sm:$0xff]   ;;  %v3234_v18 = vld [vmem:[%s3927_s1 + $0x10] sm:$0xff]  }
  0x16   : > { %v267_v28 = vrot.slane %v265_v22, 1  ;;  %v1130_v45 = vshrl.u32 %v3439_v41, 16  ;;  %v1133_v46 = vshll.u32 %v3439_v41, 16  ;;  %v280_v47 = vrot.slane %v278_v35, 1  ;;  %v3236_v22 = vld [vmem:[%s3927_s1 + $0x150] sm:$0xff]   ;;  %v3237_v27 = vld [vmem:[%s3927_s1 + $0x18] sm:$0xff]  }
  0x17   : > { %2804 = vmatpush3.bf16.msra.mxu1 %v3213_v8  ;;  %v1115_v38 = vrot.slane %v1113_v30, 2  ;;  %v1118_v39 = vrot.slane %v1116_v31, 3  ;;  %v1127_v42 = vor.u32 %v1126_v34, %v1123_v33  ;;  %v282_v49 = vshrl.u32 %v3424_v25, 16  ;;  %v3495_v30 = vld [vmem:[%s3386_s10 + $0x2c] sm:$0xff]   ;;  %v3238_v33 = vld [vmem:[%s3927_s1 + $0x158] sm:$0xff]  }
  0x18   : > { %2932 = vmatpush3.bf16.msra.mxu0 %v3214_v9  ;;  %2805 = vmatprep.subr.bf16.mxu1 %v3215_v10  ;;  %v268_v37 = vor.u32 %v267_v28, %v263_v21  ;;  %v276_v51 = vor.u32 %v274_v40, %v272_v29  ;;  %v1132_v52 = vrot.slane %v1130_v45, 2  ;;  %v1135_v53 = vrot.slane %v1133_v46, 3  ;;  %v3491_v28 = vld [vmem:[%s3386_s10 + $0x28] sm:$0xff]   ;;  %v3511_v45 = vld [vmem:[%s3386_s10 + $0x34] sm:$0xff]  }
  0x19   : > { %2933 = vmatprep.subr.bf16.mxu0 %v3216_v11  ;;  %v1119_v44 = vor.u32 %v1118_v39, %v1115_v38  ;;  %v284_v60 = vor.u32 %v282_v49, %v280_v47  ;;  %v286_v61 = vshll.u32 %v3453_v56, 16  ;;  %v290_v63 = vshrl.u32 %v3453_v56, 16 }
  0x1a   : > { %v273_v43 = vsel %vm261_vm0, %v268_v37, %v272_v29  ;;  %v1136_v55 = vor.u32 %v1135_v53, %v1132_v52  ;;  %v281_v58 = vsel %vm261_vm0, %v276_v51, %v280_v47  ;;  %v1139_v1 = vshrl.u32 %v3456_v57, 16  ;;  %v3504_v37 = vld [vmem:[%s3386_s10 + $0x30] sm:$0xff]   ;;  %v3242_v47 = vld [vmem:[%s3927_s1 + $0x20] sm:$0xff]  }
  0x1b   : > { %2806 = vmatpush3.bf16.msra.mxu1 %v3215_v10  ;;  %2811 = vmatprep.mubr.bf16.mxu1 %v273_v43  ;;  %v1128_v50 = vsel %vm1111_vm1, %v1119_v44, %v1127_v42  ;;  %v1142_v2 = vshll.u32 %v3456_v57, 16  ;;  %v288_v4 = vrot.slane %v286_v61, 1  ;;  %v294_v5 = vshll.u32 %v3464_v62, 16 }
  0x1c   : > { %2934 = vmatpush3.bf16.msra.mxu0 %v3216_v11  ;;  %2807 = vmatprep.subr.bf16.mxu1 %v3217_v17  ;;  %v1137_v0 = vsel %vm1111_vm1, %v1127_v42, %v1136_v55  ;;  %v1141_v7 = vrot.slane %v1139_v1, 2  ;;  %v1148_v12 = vshrl.u32 %v3475_v6, 16  ;;  %v298_v29 = vshrl.u32 %v3464_v62, 16 }
  0x1d   : > { %2935 = vmatprep.subr.bf16.mxu0 %v3218_v20  ;;  %2939 = vmatprep.mubr.bf16.mxu0 %v1128_v50  ;;  %v1144_v8 = vrot.slane %v1142_v2, 3  ;;  %v289_v9 = vsel %vm261_vm0, %v284_v60, %v288_v4  ;;  %v292_v10 = vor.u32 %v290_v63, %v288_v4  ;;  %v296_v11 = vrot.slane %v294_v5, 1  ;;  %v203_v60 = vld [vmem:[%s3386_s10 + $0x3c] sm:$0x1]  ;;  %v3245_v4 = vld [vmem:[%s3927_s1 + $0x28] sm:$0xff]  }
  0x1e   : > { %v1150_v21 = vrot.slane %v1148_v12, 2  ;;  %v302_v35 = vshll.u32 %v3491_v28, 16  ;;  %v1160_v38 = vshll.u32 %v3495_v30, 16  ;;  %v306_v39 = vshrl.u32 %v3491_v28, 16  ;;  %v3533_v2 = vld [vmem:[%s3386_s10 + $0x3c] sm:$0xf] }
  0x1f   : > { %2808 = vmatpush3.bf16.msra.mxu1 %v3217_v17  ;;  %v1145_v17 = vor.u32 %v1144_v8, %v1141_v7  ;;  %v297_v31 = vsel %vm261_vm0, %v292_v10, %v296_v11  ;;  %v300_v34 = vor.u32 %v298_v29, %v296_v11  ;;  %v310_v44 = vshll.u32 %v3504_v37, 16  ;;  %v3246_v10 = vld [vmem:[%s3927_s1 + $0x168] sm:$0xff]  }
  0x20   : > { %2936 = vmatpush3.bf16.msra.mxu0 %v3218_v20  ;;  %2809 = vmatprep.subr.bf16.mxu1 %v3219_v32  ;;  %v1151_v20 = vshll.u32 %v3475_v6, 16  ;;  %v304_v42 = vrot.slane %v302_v35, 1  ;;  %v1162_v46 = vrot.slane %v1160_v38, 3  ;;  %v1166_v51 = vshrl.u32 %v3511_v45, 16 }
  0x21   : > { %2937 = vmatprep.subr.bf16.mxu0 %v3220_v36  ;;  %v1146_v23 = vsel %vm1111_vm1, %v1136_v55, %v1145_v17  ;;  %v312_v50 = vrot.slane %v310_v44, 1  ;;  %v1169_v53 = vshll.u32 %v3511_v45, 16  ;;  %v314_v1 = vshrl.u32 %v3504_v37, 16 }
  0x22   : > { %v1153_v26 = vrot.slane %v1151_v20, 3  ;;  %v308_v49 = vor.u32 %v306_v39, %v304_v42  ;;  %v653_v38 = vrot.slane %v3402_v15, 1  ;;  %v3252_v39 = vld [vmem:[%s3927_s1 + $0x178] sm:$0xff]   ;;  %v657_v44 = vrot.slane %v3453_v56, 1 }
  0x23   : > { %2810 = vmatpush3.bf16.msra.mxu1 %v3219_v32  ;;  %v1171_v63 = vrot.slane %v1169_v53, 3  ;;  %v316_v8 = vor.u32 %v314_v1, %v312_v50  ;;  %v663_v53 = vrot.slane %v3504_v37, 1  ;;  %v1379_v1 = vrot.slane %v3475_v6, 3 }
  0x24   : > { %2938 = vmatpush3.bf16.msra.mxu0 %v3220_v36  ;;  %2827 = vmatprep.subr.bf16.mxu1 %v3226_v48  ;;  %v1154_v32 = vor.u32 %v1153_v26, %v1150_v21  ;;  %v1157_v36 = vshrl.u32 %v3495_v30, 16  ;;  %v313_v55 = vsel %vm261_vm0, %v308_v49, %v312_v50  ;;  %v3249_v21 = vld [vmem:[%s3927_s1 + $0x30] sm:$0xff]   ;;  %v1350_v26 = vld [vmem:[%s3386_s10 + $0x4] sm:$0x8]  ;;  %v661_v50 = vrot.slane %v3491_v28, 1 }
  0x25   : > { %2955 = vmatprep.subr.bf16.mxu0 %v3228_v54  ;;  %v2550_v29 = vcombine.low %v1350_v26, %v3412_v19  ;;  %v3251_v19 = vld [vmem:[%s3927_s1 + $0x38] sm:$0xff]  }
  0x26   : > { %2812 = vmatmul.mubr.bf16.vlgmr.msra.gmra.mrb[0].mxu1 %v281_v58  ;;  %v1155_v40 = vsel %vm1111_vm1, %v1145_v17, %v1154_v32  ;;  %v1159_v43 = vrot.slane %v1157_v36, 2  ;;  %v1168_v58 = vrot.slane %v1166_v51, 2  ;;  %v3255_v51 = vld [vmem:[%s3927_s1 + $0x180] sm:$0xff]  }
  0x27   : > { %2940 = vmatmul.mubr.bf16.vlgmr.msra.gmra.mrb[0].mxu0 %v1137_v0  ;;  %2828 = vmatpush3.bf16.msra.mxu1 %v3226_v48  ;;  %v305_v48 = vsel %vm261_vm0, %v300_v34, %v304_v42  ;;  %v1373_v34 = vrot.slane %v3405_v16, 3  ;;  %v1372_v35 = vrot.slane %v2550_v29, 3  ;;  %v655_v42 = vrot.slane %v3424_v25, 1 }
  0x28   : > { %2956 = vmatpush3.bf16.msra.mxu0 %v3228_v54  ;;  %2829 = vmatprep.subr.bf16.mxu1 %v3229_v59  ;;  %v1163_v52 = vor.u32 %v1162_v46, %v1159_v43  ;;  %v3244_v54 = vld [vmem:[%s3927_s1 + $0x160] sm:$0xff]   ;;  %v1172_v7 = vor.u32 %v1171_v63, %v1168_v58  ;;  %v1375_v43 = vrot.slane %v3439_v41, 3  ;;  %v3256_v58 = vld [vmem:[%s3927_s1 + $0x88] sm:$0xff]  }
  0x29   : > { %2957 = vmatprep.subr.bf16.mxu0 %v3230_v3  ;;  %2815 = vmatprep.mubr.bf16.mxu1 %v289_v9  ;;  %v3254_v46 = vld [vmem:[%s3927_s1 + $0x80] sm:$0xff]   ;;  %v3584_v49 = vsel %vm651_vm3, %v655_v42, %v657_v44 }
  0x2a   : > { %2943 = vmatprep.mubr.bf16.mxu0 %v1146_v23  ;;  %v1164_v61 = vsel %vm1111_vm1, %v1154_v32, %v1163_v52  ;;  %v1376_v63 = vsel %vm1371_vm2, %v1373_v34, %v1375_v43 }
  0x2b   : > { %2830 = vmatpush3.bf16.msra.mxu1 %v3229_v59  ;;  %v3524_v59 = vld [vmem:[%s3386_s10 + $0x38] sm:$0xf] }
  0x2c   : > { %2958 = vmatpush3.bf16.msra.mxu0 %v3230_v3  ;;  %2831 = vmatprep.subr.bf16.mxu1 %v3234_v18  ;;  %v3529_v0 = vcombine.low %v3524_v59, %v203_v60  ;;  %v1090_v3 = vld [vmem:[%s3386_s10 + $0x40] sm:$0x7]  ;;  %v3602_v60 = vsel %vm651_vm3, %v661_v50, %v663_v53 }
  0x2d   : > { %2959 = vmatprep.subr.bf16.mxu0 %v3236_v22  ;;  %v3540_v5 = vcombine.low %v3533_v2, %v1090_v3 }
  0x2e   : > { %2816 = vmatmul.mubr.bf16.gmra.mrb[4].mxu1 %v297_v31  ;;  %v318_v9 = vshll.u32 %v3529_v0, 16  ;;  %v322_v17 = vshrl.u32 %v3529_v0, 16 }
  0x2f   : > { %2944 = vmatmul.mubr.bf16.gmra.mrb[4].mxu0 %v1155_v40  ;;  %2832 = vmatpush3.bf16.msra.mxu1 %v3234_v18  ;;  %v1175_v11 = vshrl.u32 %v3540_v5, 16  ;;  %v1178_v12 = vshll.u32 %v3540_v5, 16  ;;  %v1173_v18 = vsel %vm1111_vm1, %v1163_v52, %v1172_v7  ;;  %v1374_v40 = vsel %vm1371_vm2, %v1372_v35, %v1373_v34  ;;  %v3265_v35 = vld [vmem:[%s3927_s1 + $0x1a8] sm:$0xff]  }
  0x30   : > { %2960 = vmatpush3.bf16.msra.mxu0 %v3236_v22  ;;  %2833 = vmatprep.subr.bf16.mxu1 %v3237_v27  ;;  %v320_v20 = vrot.slane %v318_v9, 1  ;;  %v1381_v9 = vrot.slane %v3495_v30, 3 }
  0x31   : > { %2961 = vmatprep.subr.bf16.mxu0 %v3238_v33  ;;  %2819 = vmatprep.mubr.bf16.mxu1 %v305_v48  ;;  %v1177_v22 = vrot.slane %v1175_v11, 2  ;;  %v1180_v23 = vrot.slane %v1178_v12, 3  ;;  %v659_v48 = vrot.slane %v3464_v62, 1  ;;  %v3258_v11 = vld [vmem:[%s3927_s1 + $0x90] sm:$0xff]  }
  0x32   : > { %2947 = vmatprep.mubr.bf16.mxu0 %v1164_v61  ;;  %v324_v32 = vor.u32 %v322_v17, %v320_v20  ;;  %v908_v61 = vrot.slane %v3421_v24, 2  ;;  %v3257_v24 = vld [vmem:[%s3927_s1 + $0x188] sm:$0xff]   ;;  %v1382_v29 = vsel %vm1371_vm2, %v1379_v1, %v1381_v9 }
  0x33   : > { %2834 = vmatpush3.bf16.msra.mxu1 %v3237_v27  ;;  %v321_v27 = vsel %vm261_vm0, %v316_v8, %v320_v20  ;;  %v1181_v31 = vor.u32 %v1180_v23, %v1177_v22  ;;  %v3591_v52 = vsel %vm651_vm3, %v657_v44, %v659_v48  ;;  %v911_v8 = vrot.slane %v3439_v41, 2  ;;  %v3260_v22 = vld [vmem:[%s3927_s1 + $0x98] sm:$0xff]  }
  0x34   : > { %2962 = vmatpush3.bf16.msra.mxu0 %v3238_v33  ;;  %2835 = vmatprep.subr.bf16.mxu1 %v3242_v47  ;;  %v3250_v33 = vld [vmem:[%s3927_s1 + $0x170] sm:$0xff]   ;;  %v915_v41 = vrot.slane %v3475_v6, 2  ;;  %v919_v6 = vrot.slane %v3511_v45, 2  ;;  %v3278_v44 = vld [vmem:[%s3386_s10 + $0x1c] sm:$0xff]  }
  0x35   : > { %2963 = vmatprep.subr.bf16.mxu0 %v3244_v54  ;;  %v1182_v36 = vsel %vm1111_vm1, %v1172_v7, %v1181_v31 }
  0x36   : > { %2820 = vmatmul.mubr.bf16.gmra.mrb[8].mxu1 %v313_v55  ;;  %v665_v55 = vrot.slane %v3529_v0, 1  ;;  %v3299_v0 = vld [vmem:[%s3927_s1 + $0x200] sm:$0xff]  }
  0x37   : > { %2836 = vmatpush3.bf16.msra.mxu1 %v3242_v47  ;;  %2948 = vmatmul.mubr.bf16.gmra.mrb[8].mxu0 %v1173_v18  ;;  %v3579_v47 = vsel %vm651_vm3, %v653_v38, %v655_v42  ;;  %v3274_v42 = vld [vmem:[%s3386_s10 + $0x14] sm:$0xff]  }
  0x38   : > { %2837 = vmatprep.subr.bf16.mxu1 %v3245_v4  ;;  %2964 = vmatpush3.bf16.msra.mxu0 %v3244_v54  ;;  %v3595_v54 = vsel %vm651_vm3, %v659_v48, %v661_v50  ;;  %v3610_v3 = vsel %vm651_vm3, %v663_v53, %v665_v55  ;;  %v3279_v48 = vld [vmem:[%s3927_s1 + $0xd0] sm:$0xff]   ;;  %v1791_v50 = vld [vmem:[%s3386_s10 + $0xc] sm:$0xf] }
  0x39   : > { %2965 = vmatprep.subr.bf16.mxu0 %v3246_v10  ;;  %2823 = vmatprep.mubr.bf16.mxu1 %v321_v27  ;;  %v3284_v53 = vld [vmem:[%s3386_s10 + $0x2c] sm:$0xff]  }
  0x3a   : > { %2951 = vmatprep.mubr.bf16.mxu0 %v1182_v36 }
  0x3b   : > { %2838 = vmatpush3.bf16.msra.mxu1 %v3245_v4  ;;  %v909_v4 = vrot.slane %v3405_v16, 2  ;;  %v913_v16 = vrot.slane %v3456_v57, 2 }
  0x3c   : > { %2839 = vmatprep.subr.bf16.mxu1 %v3249_v21  ;;  %2966 = vmatpush3.bf16.msra.mxu0 %v3246_v10 }
  0x3d   : > { %2967 = vmatprep.subr.bf16.mxu0 %v3250_v33  ;;  %v3622_v10 = vsel %vm907_vm4, %v908_v61, %v909_v4  ;;  %v3629_v12 = vsel %vm907_vm4, %v909_v4, %v911_v8  ;;  %v3634_v17 = vsel %vm907_vm4, %v911_v8, %v913_v16  ;;  %v3641_v20 = vsel %vm907_vm4, %v913_v16, %v915_v41  ;;  %v3287_v4 = vld [vmem:[%s3927_s1 + $0x1e0] sm:$0xff]   ;;  %v3286_v8 = vld [vmem:[%s3386_s10 + $0x34] sm:$0xff]  }
  0x3e   : > { %2824 = vmatmul.mubr.bf16.gmra.mrb[12].mxu1 %v324_v32  ;;  %v1383_v32 = vrot.slane %v3511_v45, 3  ;;  %v3290_v16 = vld [vmem:[%s3386_s10 + $0x3c] sm:$0xff]   ;;  %v3291_v45 = vld [vmem:[%s3927_s1 + $0xf0] sm:$0xff]  }
  0x3f   : > { %2840 = vmatpush3.bf16.msra.mxu1 %v3249_v21  ;;  %2843 = vmatprep.mubr.bf16.mxu1 %v3399_v14  ;;  %v1377_v14 = vrot.slane %v3456_v57, 3  ;;  %v3259_v57 = vld [vmem:[%s3927_s1 + $0x190] sm:$0xff]   ;;  %v917_v21 = vrot.slane %v3495_v30, 2  ;;  %v3261_v30 = vld [vmem:[%s3927_s1 + $0x198] sm:$0xff]  }
  0x40   : > { %2952 = vmatmul.mubr.bf16.gmra.mrb[12].mxu0 %v1181_v31  ;;  %2841 = vmatprep.subr.bf16.mxu1 %v3251_v19  ;;  %v1384_v34 = vsel %vm1371_vm2, %v1381_v9, %v1383_v32 }
  0x41   : > { %2968 = vmatpush3.bf16.msra.mxu0 %v3250_v33  ;;  %2971 = vmatprep.mubr.bf16.mxu0 %v1374_v40  ;;  %v1378_v7 = vsel %vm1371_vm2, %v1375_v43, %v1377_v14  ;;  %v3649_v26 = vsel %vm907_vm4, %v915_v41, %v917_v21  ;;  %v3655_v27 = vsel %vm907_vm4, %v917_v21, %v919_v6  ;;  %v1385_v33 = vrot.slane %v3540_v5, 3  ;;  %v3267_v5 = vld [vmem:[%s3927_s1 + $0xb0] sm:$0xff]   ;;  %v3275_v40 = vld [vmem:[%s3927_s1 + $0x1c0] sm:$0xff]   ;;  %v3276_v43 = vld [vmem:[%s3927_s1 + $0xc8] sm:$0xff]  }
  0x42   : > { %2969 = vmatprep.subr.bf16.mxu0 %v3252_v39 }
  0x43   : > { %2842 = vmatpush3.bf16.msra.mxu1 %v3251_v19  ;;  %v1386_v36 = vsel %vm1371_vm2, %v1383_v32, %v1385_v33  ;;  %v3268_v19 = vld [vmem:[%s3927_s1 + $0x1b0] sm:$0xff]  }
  0x44   : > { %2859 = vmatprep.subr.bf16.mxu1 %v3254_v46 }
  0x45   : > { %2970 = vmatpush3.bf16.msra.mxu0 %v3252_v39  ;;  %v3273_v39 = vld [vmem:[%s3927_s1 + $0xc0] sm:$0xff]  }
  0x46   : > { %2844 = vmatmul.mubr.bf16.vlgmr.msra.gmra.mrb[0].mxu1 %v3402_v15  ;;  %2987 = vmatprep.subr.bf16.mxu0 %v3255_v51  ;;  %v3263_v15 = vld [vmem:[%s3927_s1 + $0x1a0] sm:$0xff]  }
  0x47   : > { %2860 = vmatpush3.bf16.msra.mxu1 %v3254_v46  ;;  %2847 = vmatprep.mubr.bf16.mxu1 %v3424_v25  ;;  %v630_v25 = vld [vmem:[%s3386_s10] sm:$0xe]  ;;  %v3277_v46 = vld [vmem:[%s3927_s1 + $0x1c8] sm:$0xff]  }
  0x48   : > { %2972 = vmatmul.mubr.bf16.vlgmr.msra.gmra.mrb[0].mxu0 %v1376_v63  ;;  %2861 = vmatprep.subr.bf16.mxu1 %v3256_v58  ;;  %v2468_v18 = vcombine.low %v630_v25, %v3396_v13  ;;  %v1380_v13 = vsel %vm1371_vm2, %v1377_v14, %v1379_v1  ;;  %v3281_v14 = vld [vmem:[%s3927_s1 + $0x1d0] sm:$0xff]   ;;  %v849_v63 = vld [vmem:[%s3386_s10 + $0x40] sm:$0x3] }
  0x49   : > { %2988 = vmatpush3.bf16.msra.mxu0 %v3255_v51  ;;  %2975 = vmatprep.mubr.bf16.mxu0 %v1378_v7  ;;  %v3724_v51 = vld [vmem:[%s3386_s10 + $0x10] sm:$0xf]  ;;  %v3285_v1 = vld [vmem:[%s3927_s1 + $0xe0] sm:$0xff]  }
  0x4a   : > { %2989 = vmatprep.subr.bf16.mxu0 %v3257_v24  ;;  %v652_v23 = vrot.slane %v2468_v18, 1  ;;  %v2607_v61 = vcombine.low %v1791_v50, %v3724_v51  ;;  %v3293_v18 = vld [vmem:[%s3927_s1 + $0x1f0] sm:$0xff]  }
  0x4b   : > { %2862 = vmatpush3.bf16.msra.mxu1 %v3256_v58  ;;  %v3283_v58 = vld [vmem:[%s3927_s1 + $0x1d8] sm:$0xff]  }
  0x4c   : > { %2863 = vmatprep.subr.bf16.mxu1 %v3258_v11  ;;  %v654_v31 = vsel %vm651_vm3, %v652_v23, %v653_v38  ;;  %v3272_v38 = vld [vmem:[%s3386_s10 + $0xc] sm:$0xff]   ;;  %v1865_v41 = vshrl.u32 %v2607_v61, 16  ;;  %v3294_v23 = vld [vmem:[%s3927_s1 + $0xf8] sm:$0xff]  }
  0x4d   : > { %2990 = vmatpush3.bf16.msra.mxu0 %v3257_v24  ;;  %v3745_v24 = vld [vmem:[%s3386_s10 + $0x14] sm:$0xff]  }
  0x4e   : > { %2848 = vmatmul.mubr.bf16.gmra.mrb[4].mxu1 %v3453_v56  ;;  %2991 = vmatprep.subr.bf16.mxu0 %v3259_v57  ;;  %v3262_v56 = vld [vmem:[%s3927_s1 + $0xa0] sm:$0xff]  }
  0x4f   : > { %2864 = vmatpush3.bf16.msra.mxu1 %v3258_v11  ;;  %2851 = vmatprep.mubr.bf16.mxu1 %v3464_v62  ;;  %v3264_v62 = vld [vmem:[%s3927_s1 + $0xa8] sm:$0xff]  }
  0x50   : > { %2976 = vmatmul.mubr.bf16.gmra.mrb[4].mxu0 %v1380_v13  ;;  %2865 = vmatprep.subr.bf16.mxu1 %v3260_v22  ;;  %v3289_v11 = vld [vmem:[%s3927_s1 + $0x1e8] sm:$0xff]  }
  0x51   : > { %2992 = vmatpush3.bf16.msra.mxu0 %v3259_v57  ;;  %2979 = vmatprep.mubr.bf16.mxu0 %v1382_v29  ;;  %v1872_v57 = vshll.u32 %v3745_v24, 16  ;;  %v3295_v29 = vld [vmem:[%s3927_s1 + $0x1f8] sm:$0xff]  }
  0x52   : > { %2993 = vmatprep.subr.bf16.mxu0 %v3261_v30 }
  0x53   : > { %2866 = vmatpush3.bf16.msra.mxu1 %v3260_v22  ;;  %v3776_v22 = vld [vmem:[%s3386_s10 + $0x24] sm:$0xff]  }
  0x54   : > { %2867 = vmatprep.subr.bf16.mxu1 %v3262_v56  ;;  %v1888_v32 = vshll.u32 %v3776_v22, 16 }
  0x55   : > { %2994 = vmatpush3.bf16.msra.mxu0 %v3261_v30  ;;  %v1876_v30 = vshrl.u32 %v3745_v24, 16 }
  0x56   : > { %2852 = vmatmul.mubr.bf16.gmra.mrb[8].mxu1 %v3491_v28  ;;  %2995 = vmatprep.subr.bf16.mxu0 %v3263_v15  ;;  %v2443_v28 = vcombine.low %v3524_v59, %v3524_v59  ;;  %v3270_v59 = vld [vmem:[%s3927_s1 + $0x1b8] sm:$0xff]  }
  0x57   : > { %2868 = vmatpush3.bf16.msra.mxu1 %v3262_v56  ;;  %2855 = vmatprep.mubr.bf16.mxu1 %v3504_v37  ;;  %v3269_v37 = vld [vmem:[%s3927_s1 + $0xb8] sm:$0xff]  }
  0x58   : > { %2980 = vmatmul.mubr.bf16.gmra.mrb[8].mxu0 %v1384_v34  ;;  %2869 = vmatprep.subr.bf16.mxu1 %v3264_v62  ;;  %v1890_v34 = vrot.slane %v1888_v32, 1 }
  0x59   : > { %2996 = vmatpush3.bf16.msra.mxu0 %v3263_v15  ;;  %2983 = vmatprep.mubr.bf16.mxu0 %v1386_v36 }
  0x5a   : > { %2997 = vmatprep.subr.bf16.mxu0 %v3265_v35 }
  0x5b   : > { %2870 = vmatpush3.bf16.msra.mxu1 %v3264_v62 }
  0x5c   : > { %2871 = vmatprep.subr.bf16.mxu1 %v3267_v5 }
  0x5d   : > { %2998 = vmatpush3.bf16.msra.mxu0 %v3265_v35  ;;  %v3800_v35 = vld [vmem:[%s3386_s10 + $0x34] sm:$0xff]  }
  0x5e   : > { %2856 = vmatmul.mubr.bf16.gmra.mrb[16].mxu1 %v2443_v28  ;;  %2999 = vmatprep.subr.bf16.mxu0 %v3268_v19  ;;  %v1892_v28 = vshrl.u32 %v3776_v22, 16 }
  0x5f   : > { %2872 = vmatpush3.bf16.msra.mxu1 %v3267_v5  ;;  %2875 = vmatprep.mubr.bf16.mxu1 %v654_v31 }
  0x60   : > { %2984 = vmatmul.mubr.bf16.gmra.mrb[16].mxu0 %v1385_v33  ;;  %2873 = vmatprep.subr.bf16.mxu1 %v3269_v37 }
  0x61   : > { %3000 = vmatpush3.bf16.msra.mxu0 %v3268_v19  ;;  %3003 = vmatprep.mubr.bf16.mxu0 %v3272_v38  ;;  %v1904_v38 = vshll.u32 %v3800_v35, 16 }
  0x62   : > { %3001 = vmatprep.subr.bf16.mxu0 %v3270_v59 }
  0x63   : > { %2874 = vmatpush3.bf16.msra.mxu1 %v3269_v37 }
  0x64   : > { %2891 = vmatprep.subr.bf16.mxu1 %v3273_v39 }
  0x65   : > { %3002 = vmatpush3.bf16.msra.mxu0 %v3270_v59 }
  0x66   : > { %2876 = vmatmul.mubr.bf16.vlgmr.msra.gmra.mrb[0].mxu1 %v3579_v47  ;;  %3019 = vmatprep.subr.bf16.mxu0 %v3275_v40  ;;  %v3280_v47 = vld [vmem:[%s3386_s10 + $0x24] sm:$0xff]  }
  0x67   : > { %2892 = vmatpush3.bf16.msra.mxu1 %v3273_v39  ;;  %2879 = vmatprep.mubr.bf16.mxu1 %v3584_v49  ;;  %v3282_v49 = vld [vmem:[%s3927_s1 + $0xd8] sm:$0xff]   ;;  %v3303_v39 = vld [vmem:[%s3927_s1 + $0x210] sm:$0xff]  }
  0x68   : > { %3004 = vmatmul.mubr.bf16.vlgmr.msra.gmra.mrb[0].mxu0 %v3274_v42  ;;  %2893 = vmatprep.subr.bf16.mxu1 %v3276_v43 }
  0x69   : > { %3020 = vmatpush3.bf16.msra.mxu0 %v3275_v40  ;;  %3007 = vmatprep.mubr.bf16.mxu0 %v3278_v44  ;;  %v3817_v40 = vld [vmem:[%s3386_s10 + $0x3c] sm:$0xff]   ;;  %v3820_v44 = vld [vmem:[%s3386_s10 + $0x44] sm:$0x1f]  }
  0x6a   : > { %3021 = vmatprep.subr.bf16.mxu0 %v3277_v46  ;;  %v1916_v50 = vshrl.u32 %v3817_v40, 16 }
  0x6b   : > { %2894 = vmatpush3.bf16.msra.mxu1 %v3276_v43  ;;  %v1906_v43 = vrot.slane %v1904_v38, 1 }
  0x6c   : > { %2895 = vmatprep.subr.bf16.mxu1 %v3279_v48 }
  0x6d   : > { %3022 = vmatpush3.bf16.msra.mxu0 %v3277_v46  ;;  %v1912_v46 = vshll.u32 %v3817_v40, 16 }
  0x6e   : > { %2880 = vmatmul.mubr.bf16.gmra.mrb[4].mxu1 %v3591_v52  ;;  %3023 = vmatprep.subr.bf16.mxu0 %v3281_v14  ;;  %v2500_v52 = vcombine.low %v3533_v2, %v849_v63  ;;  %v3288_v2 = vld [vmem:[%s3927_s1 + $0xe8] sm:$0xff]  }
  0x6f   : > { %2896 = vmatpush3.bf16.msra.mxu1 %v3279_v48  ;;  %2883 = vmatprep.mubr.bf16.mxu1 %v3595_v54  ;;  %v1867_v54 = vshll.u32 %v2607_v61, 16 }
  0x70   : > { %3008 = vmatmul.mubr.bf16.gmra.mrb[4].mxu0 %v3280_v47  ;;  %2897 = vmatprep.subr.bf16.mxu1 %v3282_v49  ;;  %v3747_v7 = vrot.slane %v2500_v52, 2  ;;  %v1908_v47 = vshrl.u32 %v3800_v35, 16 }
  0x71   : > { %3024 = vmatpush3.bf16.msra.mxu0 %v3281_v14  ;;  %3011 = vmatprep.mubr.bf16.mxu0 %v3284_v53  ;;  %v1869_v25 = vrot.slane %v1867_v54, 1  ;;  %v1914_v53 = vrot.slane %v1912_v46, 1 }
  0x72   : > { %3025 = vmatprep.subr.bf16.mxu0 %v3283_v58  ;;  %v3757_v9 = vsel %vm907_vm4, %v919_v6, %v3747_v7  ;;  %v1874_v6 = vrot.slane %v1872_v57, 1 }
  0x73   : > { %2898 = vmatpush3.bf16.msra.mxu1 %v3282_v49  ;;  %v1870_v21 = vor.u32 %v1869_v25, %v1865_v41  ;;  %v1920_v49 = vshll.u32 %v3820_v44, 16  ;;  %v1918_v61 = vor.u32 %v1916_v50, %v1914_v53  ;;  %v3312_v41 = vld [vmem:[%s3927_s1 + $0x238] sm:$0xff]  }
  0x74   : > { %2899 = vmatprep.subr.bf16.mxu1 %v3285_v1  ;;  %v1878_v33 = vor.u32 %v1876_v30, %v1874_v6 }
  0x75   : > { %3026 = vmatpush3.bf16.msra.mxu0 %v3283_v58  ;;  %v1875_v31 = vsel %vm261_vm0, %v1870_v21, %v1874_v6  ;;  %v3307_v58 = vld [vmem:[%s3927_s1 + $0x220] sm:$0xff]   ;;  %v1922_v63 = vrot.slane %v1920_v49, 1  ;;  %v2120_v21 = vrot.slane %v3776_v22, 1 }
  0x76   : > { %2884 = vmatmul.mubr.bf16.gmra.mrb[8].mxu1 %v3602_v60  ;;  %3027 = vmatprep.subr.bf16.mxu0 %v3287_v4  ;;  %v3770_v60 = vld [vmem:[%s3386_s10 + $0x1c] sm:$0xff]  }
  0x77   : > { %2900 = vmatpush3.bf16.msra.mxu1 %v3285_v1  ;;  %2887 = vmatprep.mubr.bf16.mxu1 %v3610_v3  ;;  %v3292_v3 = vld [vmem:[%s3386_s10 + $0x44] ss:$0 sps:$4 sm:$0xff]   ;;  %v1880_v13 = vshll.u32 %v3770_v60, 16  ;;  %v1884_v56 = vshrl.u32 %v3770_v60, 16  ;;  %v2094_v1 = vld [vmem:[%s3386_s10 + $0xc] sm:$0xe] }
  0x78   : > { %3012 = vmatmul.mubr.bf16.gmra.mrb[8].mxu0 %v3286_v8  ;;  %2901 = vmatprep.subr.bf16.mxu1 %v3288_v2  ;;  %v2639_v54 = vcombine.low %v2094_v1, %v3724_v51  ;;  %v1924_v8 = vshrl.u32 %v3820_v44, 16  ;;  %v2116_v51 = vrot.slane %v3745_v24, 1  ;;  %v2128_v24 = vrot.slane %v3820_v44, 1 }
  0x79   : > { %3028 = vmatpush3.bf16.msra.mxu0 %v3287_v4  ;;  %3015 = vmatprep.mubr.bf16.mxu0 %v3290_v16  ;;  %v1882_v15 = vrot.slane %v1880_v13, 1  ;;  %v1923_v4 = vsel %vm261_vm0, %v1918_v61, %v1922_v63 }
  0x7a   : > { %3029 = vmatprep.subr.bf16.mxu0 %v3289_v11 }
  0x7b   : > { %2902 = vmatpush3.bf16.msra.mxu1 %v3288_v2  ;;  %v1886_v62 = vor.u32 %v1884_v56, %v1882_v15  ;;  %v1883_v5 = vsel %vm261_vm0, %v1878_v33, %v1882_v15  ;;  %v3311_v2 = vld [vmem:[%s3927_s1 + $0x230] sm:$0xff]  }
  0x7c   : > { %2903 = vmatprep.subr.bf16.mxu1 %v3291_v45 }
  0x7d   : > { %3030 = vmatpush3.bf16.msra.mxu0 %v3289_v11  ;;  %v1891_v19 = vsel %vm261_vm0, %v1886_v62, %v1890_v34  ;;  %v2115_v11 = vrot.slane %v2639_v54, 1 }
  0x7e   : > { %2888 = vmatmul.mubr.bf16.gmra.mrb[20].mxu1 %v665_v55  ;;  %3031 = vmatprep.subr.bf16.mxu0 %v3293_v18  ;;  %v3797_v55 = vld [vmem:[%s3386_s10 + $0x2c] sm:$0xff]  }
  0x7f   : > { %2904 = vmatpush3.bf16.msra.mxu1 %v3291_v45  ;;  %2907 = vmatprep.mubr.bf16.mxu1 %v3622_v10  ;;  %v3300_v10 = vld [vmem:[%s3927_s1 + $0x208] sm:$0xff]   ;;  %v1896_v36 = vshll.u32 %v3797_v55, 16  ;;  %v1900_v37 = vshrl.u32 %v3797_v55, 16  ;;  %v2122_v16 = vrot.slane %v3797_v55, 1  ;;  %v2117_v57 = vsel %vm651_vm3, %v2115_v11, %v2116_v51 }
  0x80   : > { %3016 = vmatmul.mubr.bf16.gmra.mrb[20].mxu0 %v3292_v3  ;;  %2905 = vmatprep.subr.bf16.mxu1 %v3294_v23  ;;  %v2126_v45 = vrot.slane %v3817_v40, 1 }
  0x81   : > { %3032 = vmatpush3.bf16.msra.mxu0 %v3293_v18  ;;  %3035 = vmatprep.mubr.bf16.mxu0 %v1875_v31  ;;  %v1898_v59 = vrot.slane %v1896_v36, 1  ;;  %v2118_v18 = vrot.slane %v3770_v60, 1  ;;  %v2123_v13 = vsel %vm651_vm3, %v2120_v21, %v2122_v16 }
  0x82   : > { %3033 = vmatprep.subr.bf16.mxu0 %v3295_v29  ;;  %v2129_v6 = vsel %vm651_vm3, %v2126_v45, %v2128_v24 }
  0x83   : > { %2906 = vmatpush3.bf16.msra.mxu1 %v3294_v23  ;;  %v1902_v42 = vor.u32 %v1900_v37, %v1898_v59  ;;  %v2119_v3 = vsel %vm651_vm3, %v2116_v51, %v2118_v18  ;;  %v2121_v23 = vsel %vm651_vm3, %v2118_v18, %v2120_v21 }
  0x84   : > { %3083 = vmatprep.subr.bf16.mxu1 %v3299_v0 }
  0x85   : > { %3034 = vmatpush3.bf16.msra.mxu0 %v3295_v29  ;;  %v1907_v14 = vsel %vm261_vm0, %v1902_v42, %v1906_v43 }
  0x86   : > { %2908 = vmatmul.mubr.bf16.vlgmr.msra.gmra.mrb[0].mxu1 %v3629_v12  ;;  %3051 = vmatprep.subr.bf16.mxu0 %v3299_v0  ;;  %v1894_v12 = vor.u32 %v1892_v28, %v1890_v34 }
  0x87   : > { %3091 = vmatpush3.bf16.msra.mxu1 %v3299_v0  ;;  %2911 = vmatprep.mubr.bf16.mxu1 %v3634_v17  ;;  %v3304_v17 = vld [vmem:[%s3927_s1 + $0x218] sm:$0xff]  }
  0x88   : > { %3036 = vmatmul.mubr.bf16.vlgmr.msra.gmra.mrb[0].mxu0 %v1883_v5  ;;  %3084 = vmatprep.subr.bf16.mxu1 %v3300_v10  ;;  %v1899_v48 = vsel %vm261_vm0, %v1894_v12, %v1898_v59 }
  0x89   : > { %3052 = vmatpush3.bf16.msra.mxu0 %v3299_v0  ;;  %3039 = vmatprep.mubr.bf16.mxu0 %v1891_v19 }
  0x8a   : > { %3053 = vmatprep.subr.bf16.mxu0 %v3300_v10 }
  0x8b   : > { %3092 = vmatpush3.bf16.msra.mxu1 %v3300_v10 }
  0x8c   : > { %3085 = vmatprep.subr.bf16.mxu1 %v3303_v39 }
  0x8d   : > { %3054 = vmatpush3.bf16.msra.mxu0 %v3300_v10 }
  0x8e   : > { %2912 = vmatmul.mubr.bf16.gmra.mrb[4].mxu1 %v3641_v20  ;;  %3055 = vmatprep.subr.bf16.mxu0 %v3303_v39  ;;  %v1910_v20 = vor.u32 %v1908_v47, %v1906_v43 }
  0x8f   : > { %3093 = vmatpush3.bf16.msra.mxu1 %v3303_v39  ;;  %2915 = vmatprep.mubr.bf16.mxu1 %v3649_v26  ;;  %v3308_v26 = vld [vmem:[%s3927_s1 + $0x228] sm:$0xff]  }
  0x90   : > { %3040 = vmatmul.mubr.bf16.gmra.mrb[4].mxu0 %v1899_v48  ;;  %3086 = vmatprep.subr.bf16.mxu1 %v3304_v17  ;;  %v1915_v52 = vsel %vm261_vm0, %v1910_v20, %v1914_v53 }
  0x91   : > { %3056 = vmatpush3.bf16.msra.mxu0 %v3303_v39  ;;  %3043 = vmatprep.mubr.bf16.mxu0 %v1907_v14 }
  0x92   : > { %3057 = vmatprep.subr.bf16.mxu0 %v3304_v17 }
  0x93   : > { %3094 = vmatpush3.bf16.msra.mxu1 %v3304_v17 }
  0x94   : > { %3087 = vmatprep.subr.bf16.mxu1 %v3307_v58 }
  0x95   : > { %3058 = vmatpush3.bf16.msra.mxu0 %v3304_v17 }
  0x96   : > { %2916 = vmatmul.mubr.bf16.gmra.mrb[8].mxu1 %v3655_v27  ;;  %3059 = vmatprep.subr.bf16.mxu0 %v3307_v58  ;;  %v2124_v27 = vrot.slane %v3800_v35, 1 }
  0x97   : > { %3095 = vmatpush3.bf16.msra.mxu1 %v3307_v58  ;;  %2919 = vmatprep.mubr.bf16.mxu1 %v3757_v9  ;;  %v1926_v9 = vor.u32 %v1924_v8, %v1922_v63 }
  0x98   : > { %3044 = vmatmul.mubr.bf16.gmra.mrb[8].mxu0 %v1915_v52  ;;  %3088 = vmatprep.subr.bf16.mxu1 %v3308_v26  ;;  %v2125_v25 = vsel %vm651_vm3, %v2122_v16, %v2124_v27 }
  0x99   : > { %3060 = vmatpush3.bf16.msra.mxu0 %v3307_v58  ;;  %3047 = vmatprep.mubr.bf16.mxu0 %v1923_v4 }
  0x9a   : > { %3061 = vmatprep.subr.bf16.mxu0 %v3308_v26 }
  0x9b   : > { %3096 = vmatpush3.bf16.msra.mxu1 %v3308_v26 }
  0x9c   : > { %3089 = vmatprep.subr.bf16.mxu1 %v3311_v2 }
  0x9d   : > { %3062 = vmatpush3.bf16.msra.mxu0 %v3308_v26 }
  0x9e   : > { %2920 = vmatmul.mubr.bf16.gmra.mrb[24].mxu1 %v3747_v7  ;;  %3063 = vmatprep.subr.bf16.mxu0 %v3311_v2  ;;  %v2127_v7 = vsel %vm651_vm3, %v2124_v27, %v2126_v45 }
  0x9f   : > { %3097 = vmatpush3.bf16.msra.mxu1 %v3311_v2  ;;  %3075 = vmatprep.mubr.bf16.mxu1 %v2125_v25 }
  0xa0   : > { %3048 = vmatmul.mubr.bf16.gmra.mrb[24].mxu0 %v1926_v9  ;;  %3090 = vmatprep.subr.bf16.mxu1 %v3312_v41 }
  0xa1   : > { %3064 = vmatpush3.bf16.msra.mxu0 %v3311_v2  ;;  %3067 = vmatprep.mubr.bf16.mxu0 %v2117_v57 }
  0xa2   : > { %3065 = vmatprep.subr.bf16.mxu0 %v3312_v41 }
  0xa3   : > { %3098 = vmatpush3.bf16.msra.mxu1 %v3312_v41 }
  0xa5   : > { %3066 = vmatpush3.bf16.msra.mxu0 %v3312_v41 }
  0xa6   : > { %3076 = vmatmul.mubr.bf16.vlgmr.msra.gmra.mrb[28].mxu1 %v2127_v7 }
  0xa7   : > { %3079 = vmatprep.mubr.bf16.mxu1 %v2129_v6 }
  0xa8   : > { %3068 = vmatmul.mubr.bf16.vlgmr.msra.gmra.mrb[0].mxu0 %v2119_v3 }
  0xa9   : > { %3071 = vmatprep.mubr.bf16.mxu0 %v2121_v23 }
  0xae   : > { %3080 = vmatmul.mubr.bf16.gmra.mrb[32].mxu1 %v2128_v24 }
  0xb0   : > { %3072 = vmatmul.mubr.bf16.gmra.mrb[4].mxu0 %v2123_v13 }
 0x111   : > { %v2825_v60 = vpop.f32.mrb[12].mxu1 }
 0x112   : > { %v463_v22 = vpop.f32.mrb[13].mxu1 }
 0x113   : > { %v2953_v30 = vpop.f32.mrb[12].mxu0  ;;  %v2826_v29 = vpop.f32.mrb[14].mxu1 }
 0x114   : > { %v1321_v31 = vpop.f32.mrb[13].mxu0  ;;  %v466_v56 = vpop.f32.mrb[15].mxu1 }
 0x115   : > { %v2954_v32 = vpop.f32.mrb[14].mxu0 }
 0x116   : > { %v1324_v15 = vpop.f32.mrb[15].mxu0 }
 0x131   : > { %v2857_v0 = vpop.f32.mrb[16].mxu1 }
 0x132   : > { %v625_v55 = vadd.f32 %v2857_v0, %v2825_v60  ;;  %v616_v33 = vpop.f32.mrb[17].mxu1  ;;  %v3881_v0 = vld [vmem:[%s3928_s2] ss:$0 sm:$0xff] }
 0x133   : > { %v2985_v62 = vpop.f32.mrb[16].mxu0  ;;  %v617_v34 = vadd.f32 %v616_v33, %v463_v22  ;;  %v2858_v35 = vpop.f32.mrb[18].mxu1 }
 0x134   : > { %v1525_v10 = vpop.f32.mrb[17].mxu0  ;;  %v619_v36 = vpop.f32.mrb[19].mxu1 }
 0x135   : > { %v2986_v5 = vpop.f32.mrb[18].mxu0  ;;  %v620_v28 = vadd.f32 %v619_v36, %v466_v56 }
 0x136   : > { %v1528_v19 = vpop.f32.mrb[19].mxu0 }
 0x151   : > { %v2889_v37 = vpop.f32.mrb[20].mxu1 }
 0x152   : > { %v833_v38 = vadd.f32 %v2889_v37, %v625_v55  ;;  %v805_v59 = vpop.f32.mrb[21].mxu1 }
 0x153   : > { %v3017_v39 = vpop.f32.mrb[20].mxu0  ;;  %v831_v40 = vadd.f32 %v805_v59, %v617_v34  ;;  %v2890_v12 = vpop.f32.mrb[22].mxu1 }
 0x154   : > { %v1762_v42 = vpop.f32.mrb[21].mxu0  ;;  %v808_v43 = vpop.f32.mrb[23].mxu1 }
 0x155   : > { %v3018_v44 = vpop.f32.mrb[22].mxu0  ;;  %v832_v17 = vadd.f32 %v808_v43, %v620_v28 }
 0x156   : > { %v1765_v46 = vpop.f32.mrb[23].mxu0 }
 0x159   : > { %v2909_v48 = vpop.f32.mrb[0].mxu1 }
 0x15a   : > { %v1013_v47 = vpop.f32.mrb[1].mxu1 }
 0x15b   : > { %v2910_v14 = vpop.f32.mrb[2].mxu1 }
 0x15c   : > { %v3867_v50 = vpop.f32.mrb[3].mxu1 }
 0x161   : > { %v3869_v49 = vpop.f32.mrb[4].mxu1 }
 0x162   : > { %v3871_v53 = vpop.f32.mrb[5].mxu1 }
 0x163   : > { %v3873_v58 = vpop.f32.mrb[6].mxu1 }
 0x164   : > { %v3875_v20 = vpop.f32.mrb[7].mxu1 }
 0x169   : > { %v2917_v61 = vpop.f32.mrb[8].mxu1 }
 0x16a   : > { %v1045_v63 = vpop.f32.mrb[9].mxu1 }
 0x16b   : > { %v3045_v1 = vpop.f32.mrb[8].mxu0  ;;  %v2918_v26 = vpop.f32.mrb[10].mxu1 }
 0x16c   : > { %v3107_v52 = vadd.f32 %v3045_v1, %v2917_v61  ;;  %v2049_v4 = vpop.f32.mrb[9].mxu0  ;;  %v1048_v54 = vpop.f32.mrb[11].mxu1 }
 0x16d   : > { %v3109_v8 = vadd.f32 %v2049_v4, %v1045_v63  ;;  %v3046_v2 = vpop.f32.mrb[10].mxu0 }
 0x16e   : > { %v3111_v16 = vadd.f32 %v3046_v2, %v2918_v26  ;;  %v2052_v27 = vpop.f32.mrb[11].mxu0 }
 0x16f   : > { %v3113_v11 = vadd.f32 %v2052_v27, %v1048_v54 }
 0x171   : > { %v2921_v51 = vpop.f32.mrb[24].mxu1 }
 0x172   : > { %v1089_v9 = vadd.f32 %v2921_v51, %v833_v38  ;;  %v1061_v41 = vpop.f32.mrb[25].mxu1 }
 0x173   : > { %v3049_v25 = vpop.f32.mrb[24].mxu0  ;;  %v1087_v57 = vadd.f32 %v1061_v41, %v831_v40  ;;  %v2922_v45 = vpop.f32.mrb[26].mxu1 }
 0x174   : > { %v1349_v24 = vadd.f32 %v2953_v30, %v1089_v9  ;;  %v2065_v18 = vpop.f32.mrb[25].mxu0  ;;  %v1064_v21 = vpop.f32.mrb[27].mxu1 }
 0x175   : > { %v1347_v7 = vadd.f32 %v1321_v31, %v1087_v57  ;;  %v3050_v6 = vpop.f32.mrb[26].mxu0  ;;  %v1088_v3 = vadd.f32 %v1064_v21, %v832_v17 }
 0x176   : > { %v1553_v23 = vadd.f32 %v2985_v62, %v1349_v24  ;;  %v2068_v13 = vpop.f32.mrb[27].mxu0 }
 0x177   : > { %v1551_v60 = vadd.f32 %v1525_v10, %v1347_v7  ;;  %v1348_v22 = vadd.f32 %v1324_v15, %v1088_v3 }
 0x178   : > { %v1790_v29 = vadd.f32 %v3017_v39, %v1553_v23 }
 0x179   : > { %v1788_v56 = vadd.f32 %v1762_v42, %v1551_v60  ;;  %v1552_v32 = vadd.f32 %v1528_v19, %v1348_v22  ;;  %v3077_v55 = vpop.f32.mrb[28].mxu1 }
 0x17a   : > { %v2093_v30 = vadd.f32 %v3049_v25, %v1790_v29  ;;  %v3108_v33 = vadd.f32 %v3107_v52, %v3077_v55  ;;  %v2252_v34 = vpop.f32.mrb[29].mxu1 }
 0x17b   : > { %v2091_v31 = vadd.f32 %v2065_v18, %v1788_v56  ;;  %v1789_v35 = vadd.f32 %v1765_v46, %v1552_v32  ;;  %v3069_v36 = vpop.f32.mrb[0].mxu0  ;;  %v3110_v62 = vadd.f32 %v3109_v8, %v2252_v34  ;;  %v3078_v5 = vpop.f32.mrb[30].mxu1 }
 0x17c   : > { %v3099_v10 = vadd.f32 %v3069_v36, %v2909_v48  ;;  %v2314_v15 = vadd.f32 %v3108_v33, %v3881_v0  ;;  %v2220_v28 = vpop.f32.mrb[1].mxu0  ;;  %v3112_v19 = vadd.f32 %v3111_v16, %v3078_v5  ;;  %v2255_v37 = vpop.f32.mrb[31].mxu1 }
 0x17d   : > { %v2092_v38 = vadd.f32 %v2068_v13, %v1789_v35  ;;  %v3100_v59 = vadd.f32 %v2220_v28, %v1013_v47  ;;  %v2312_v39 = vadd.f32 %v3110_v62, %v3881_v0  ;;  %v3070_v40 = vpop.f32.mrb[2].mxu0  ;;  %v3114_v12 = vadd.f32 %v3113_v11, %v2255_v37 }
 0x17e   : > { %v2306_v42 = vadd.f32 %v3099_v10, %v3881_v0  ;;  %v2329_v43 = vmax.f32 %v2314_v15, 0.0  ;;  %v3101_v44 = vadd.f32 %v3070_v40, %v2910_v14  ;;  %v2315_v17 = vadd.f32 %v3112_v19, %v3881_v0  ;;  %v2223_v46 = vpop.f32.mrb[3].mxu0 }
 0x17f   : > { %v2304_v48 = vadd.f32 %v3100_v59, %v3881_v0  ;;  %v2327_v61 = vmax.f32 %v2312_v39, 0.0  ;;  %v3102_v63 = vadd.f32 %v2223_v46, %v3867_v50  ;;  %v2313_v47 = vadd.f32 %v3114_v12, %v3881_v0 }
 0x180   : > { %v2321_v1 = vmax.f32 %v2306_v42, 0.0  ;;  %2344 = vst [vmem:[%s3887_s20 + $0x50] sm:$0xff] %v2329_v43  ;;  %v2307_v26 = vadd.f32 %v3101_v44, %v3881_v0  ;;  %v2330_v52 = vmax.f32 %v2315_v17, 0.0 }
 0x181   : > { %v2319_v14 = vmax.f32 %v2304_v48, 0.0  ;;  %2342 = vst [vmem:[%s3887_s20 + $0x40] sm:$0xff] %v2327_v61  ;;  %v2305_v4 = vadd.f32 %v3102_v63, %v3881_v0  ;;  %v2328_v54 = vmax.f32 %v2313_v47, 0.0  ;;  %v3081_v8 = vpop.f32.mrb[32].mxu1 }
 0x182   : > { %2336 = vst [vmem:[%s3887_s20 + $0x10] sm:$0xff] %v2321_v1  ;;  %v2322_v2 = vmax.f32 %v2307_v26, 0.0  ;;  %2345 = vst [vmem:[%s3887_s20 + $0x58] sm:$0xff] %v2330_v52  ;;  %v2296_v50 = vadd.f32 %v3081_v8, %v2093_v30  ;;  %v2268_v16 = vpop.f32.mrb[33].mxu1 }
 0x183   : > { %2334 = vst [vmem:[%s3887_s20] sm:$0xff] %v2319_v14  ;;  %v2320_v27 = vmax.f32 %v2305_v4, 0.0  ;;  %2343 = vst [vmem:[%s3887_s20 + $0x48] sm:$0xff] %v2328_v54  ;;  %v3073_v11 = vpop.f32.mrb[4].mxu0  ;;  %v2294_v51 = vadd.f32 %v2268_v16, %v2091_v31  ;;  %v3082_v9 = vpop.f32.mrb[34].mxu1 }
 0x184   : > { %2337 = vst [vmem:[%s3887_s20 + $0x18] sm:$0xff] %v2322_v2  ;;  %v3103_v41 = vadd.f32 %v3073_v11, %v3869_v49  ;;  %v2318_v25 = vadd.f32 %v3881_v0, %v2296_v50  ;;  %v2236_v57 = vpop.f32.mrb[5].mxu0  ;;  %v2271_v45 = vpop.f32.mrb[35].mxu1 }
 0x185   : > { %2335 = vst [vmem:[%s3887_s20 + $0x8] sm:$0xff] %v2320_v27  ;;  %v3104_v24 = vadd.f32 %v2236_v57, %v3871_v53  ;;  %v2316_v18 = vadd.f32 %v3881_v0, %v2294_v51  ;;  %v3074_v21 = vpop.f32.mrb[6].mxu0  ;;  %v2295_v7 = vadd.f32 %v2271_v45, %v2092_v38 }
 0x186   : > { %v2310_v6 = vadd.f32 %v3103_v41, %v3881_v0  ;;  %v2333_v3 = vmax.f32 %v2318_v25, 0.0  ;;  %v3105_v49 = vadd.f32 %v3074_v21, %v3873_v58  ;;  %v2239_v23 = vpop.f32.mrb[7].mxu0 }
 0x187   : > { %v2308_v13 = vadd.f32 %v3104_v24, %v3881_v0  ;;  %v2331_v60 = vmax.f32 %v2316_v18, 0.0  ;;  %v3106_v53 = vadd.f32 %v2239_v23, %v3875_v20  ;;  %v2317_v22 = vadd.f32 %v3881_v0, %v2295_v7 }
 0x188   : > { %v2325_v29 = vmax.f32 %v2310_v6, 0.0  ;;  %2348 = vst [vmem:[%s3887_s20 + $0x70] sm:$0xff] %v2333_v3  ;;  %v2311_v56 = vadd.f32 %v3105_v49, %v3881_v0 }
 0x189   : > { %v2323_v32 = vmax.f32 %v2308_v13, 0.0  ;;  %2346 = vst [vmem:[%s3887_s20 + $0x60] sm:$0xff] %v2331_v60  ;;  %v2309_v55 = vadd.f32 %v3106_v53, %v3881_v0  ;;  %v2332_v58 = vmax.f32 %v2317_v22, 0.0 }
 0x18a   : > { %2340 = vst [vmem:[%s3887_s20 + $0x30] sm:$0xff] %v2325_v29  ;;  %v2326_v30 = vmax.f32 %v2311_v56, 0.0 }
 0x18b   : > { %2338 = vst [vmem:[%s3887_s20 + $0x20] sm:$0xff] %v2323_v32  ;;  %v2324_v33 = vmax.f32 %v2309_v55, 0.0  ;;  %2347 = vst [vmem:[%s3887_s20 + $0x68] sm:$0xff] %v2332_v58 }
 0x18c   : > { %2341 = vst [vmem:[%s3887_s20 + $0x38] sm:$0xff] %v2326_v30 }
 0x18d   : > { %2339 = vst [vmem:[%s3887_s20 + $0x28] sm:$0xff] %v2324_v33 }
 0x18e PF: > { %s13_s12 = sadd.s32 1, %s3320_s12  }
 0x18f   : > { %p10_p4 = scmp.ge.s32.totalorder %s13_s12, 4  }
 0x191   :  { %12 = sbr.rel (!%p10_p4) target bundleno = 1 (0x1), region = 70 }

// kernel: run.5
= control target key start
LH: loop header
LB: loop body
LE: loop exit
PB: predicated region body
PF: predicated region fallthrough
CT: control target
= control target key end

     0   :  { %s7475_s12 = smov 0   ;;  %s9101_s0 = inlined_call_operand.vmem [shape: bf16[2,488,128], index: 0, kind: input, shape index: {}]   ;;  %s9102_s1 = inlined_call_operand.vmem [shape: bf16[9,128,128], index: 1, kind: input, shape index: {}]   ;;  %s9103_s2 = inlined_call_operand.vmem [shape: f32[1,128], index: 2, kind: input, shape index: {}]   ;;  %s9104_s3 = inlined_call_operand.vmem [shape: f32[2,440,128], index: 3, kind: output, shape index: {}]  }
   0x1 LB: > { %s5453_s13 = sadd.s32 4294967295, %s7453_s12   ;;  %p5457_p0 = scmp.ge.s32.totalorder %s7453_s12, 1  ;;  %s7453_s12 = sphi %s7475_s12, %s13_s12  }
   0x2   : > { %p137_p1 = scmp.lt.s32.totalorder %s7453_s12, 3 }
   0x4   : > { %p138_p2 = pnand %p5457_p0, %p137_p1 }
   0x6   : > { %141 = sbr.rel (%p138_p2) target bundleno = 770 (0x302), region = 32 }
   0xd   : > { %v7194_v0 = vld [vmem:[%s9102_s1 + $0x40] sm:$0xff]   ;;  %p161_p3 = scmp.lt.s32.totalorder %s5453_s13, 1  ;;  %v7196_v2 = vld [vmem:[%s9102_s1 + $0x48] sm:$0xff]   ;;  %v7198_v4 = vld [vmem:[%s9102_s1 + $0x50] sm:$0xff]   ;;  %vm401_vm0 = vsmask.f32 7424 }
   0xe   : > { %v7195_v1 = vld [vmem:[%s9102_s1 + $0x100] sm:$0xff]   ;;  %6104 = vmatprep.subr.bf16.mxu1 %v7194_v0  ;;  %v7197_v3 = vld [vmem:[%s9102_s1 + $0x108] sm:$0xff]   ;;  %v7199_v5 = vld [vmem:[%s9102_s1 + $0x110] sm:$0xff]   ;;  %vm2431_vm1 = vsmask.f32 4352  ;;  %vm3715_vm2 = vcmask 1045504  }
   0xf   : > { %6392 = vmatprep.subr.bf16.mxu0 %v7195_v1  ;;  %6105 = vmatpush3.bf16.msra.mxu1 %v7194_v0  ;;  %s9219_s13 = smov (!%p161_p3, %s5453_s13), 1  ;;  %v7200_v6 = vld [vmem:[%s9102_s1 + $0x58] sm:$0xff]   ;;  %v7202_v8 = vld [vmem:[%s9102_s1 + $0x60] sm:$0xff]   ;;  %v7204_v10 = vld [vmem:[%s9102_s1 + $0x68] sm:$0xff]   ;;  %vm1311_vm3 = vcmask 1046528   ;;  %vm1967_vm4 = vcmask 1044480  }
  0x10   : > { %6393 = vmatpush3.bf16.msra.mxu0 %v7195_v1  ;;  %6106 = vmatprep.subr.bf16.mxu1 %v7196_v2  ;;  %v7201_v7 = vld [vmem:[%s9102_s1 + $0x118] sm:$0xff]   ;;  %s7184_s30 = smul.u32 244, %s9219_s13  ;;  %v7203_v9 = vld [vmem:[%s9102_s1 + $0x120] sm:$0xff]   ;;  %v7205_v11 = vld [vmem:[%s9102_s1 + $0x128] sm:$0xff]   ;;  %vm4179_vm5 = vsmask.f32 5376 }
  0x11   : > { %6394 = vmatprep.subr.bf16.mxu0 %v7197_v3  ;;  %v7206_v17 = vld [vmem:[%s9102_s1 + $0x70] sm:$0xff]   ;;  %v7208_v32 = vld [vmem:[%s9102_s1 + $0x78] sm:$0xff]   ;;  %v7215_v54 = vld [vmem:[%s9102_s1] sm:$0xff]  }
  0x12   : > { %s7519_s10 = scalar_lea.vmem %s9101_s0, %s7184_s30  ;;  %v7207_v21 = vld [vmem:[%s9102_s1 + $0x130] sm:$0xff]   ;;  %v7209_v37 = vld [vmem:[%s9102_s1 + $0x138] sm:$0xff]  }
  0x13   : > { %6107 = vmatpush3.bf16.msra.mxu1 %v7196_v2  ;;  %v172_v12 = vld [vmem:[%s7519_s10] sm:$0xf]  ;;  %v173_v13 = vld [vmem:[%s7519_s10 + $0x4] sm:$0xf]  ;;  %v7211_v15 = vld [vmem:[%s7519_s10 + $0x8] sm:$0xff]  }
  0x14   : > { %6395 = vmatpush3.bf16.msra.mxu0 %v7197_v3  ;;  %6108 = vmatprep.subr.bf16.mxu1 %v7198_v4  ;;  %v7529_v14 = vcombine.low %v172_v12, %v173_v13  ;;  %v7214_v16 = vld [vmem:[%s7519_s10 + $0x10] sm:$0xff]   ;;  %v1754_v18 = vld [vmem:[%s7519_s10 + $0x8] sm:$0x8]  ;;  %v7538_v19 = vld [vmem:[%s7519_s10 + $0xc] sm:$0xf]  ;;  %v410_v24 = vshll.u32 %v7211_v15, 16 }
  0x15   : > { %6396 = vmatprep.subr.bf16.mxu0 %v7199_v5  ;;  %v7541_v20 = vld [vmem:[%s7519_s10 + $0x10] sm:$0xf]  ;;  %v7549_v25 = vld [vmem:[%s7519_s10 + $0x14] sm:$0xf]  ;;  %v7552_v26 = vcombine.low %v1754_v18, %v7538_v19  ;;  %v414_v35 = vshrl.u32 %v7211_v15, 16  ;;  %v418_v36 = vshll.u32 %v7214_v16, 16 }
  0x16   : > { %v403_v22 = vshrl.u32 %v7529_v14, 16  ;;  %v405_v23 = vshll.u32 %v7529_v14, 16  ;;  %v7556_v27 = vcombine.low %v7541_v20, %v7549_v25  ;;  %v412_v29 = vrot.slane %v410_v24, 1  ;;  %v7569_v41 = vld [vmem:[%s7519_s10 + $0x18] sm:$0xf]  ;;  %v7219_v52 = vld [vmem:[%s7519_s10 + $0x20] sm:$0xff]  }
  0x17   : > { %6109 = vmatpush3.bf16.msra.mxu1 %v7198_v4  ;;  %9142 = vst [vmem:[#allocation2_spill] sm:$0xff] %v7552_v26  ;;  %v2433_v30 = vshrl.u32 %v7552_v26, 16  ;;  %v2436_v31 = vshll.u32 %v7552_v26, 16  ;;  %v7572_v42 = vld [vmem:[%s7519_s10 + $0x1c] sm:$0xf]  ;;  %v420_v45 = vrot.slane %v418_v36, 1 }
  0x18   : > { %6397 = vmatpush3.bf16.msra.mxu0 %v7199_v5  ;;  %6110 = vmatprep.subr.bf16.mxu1 %v7200_v6  ;;  %9143 = vst [vmem:[#allocation3_spill] sm:$0xff] %v7556_v27  ;;  %v407_v28 = vrot.slane %v405_v23, 1  ;;  %v2441_v33 = vshrl.u32 %v7556_v27, 16  ;;  %v2444_v34 = vshll.u32 %v7556_v27, 16  ;;  %v7217_v46 = vld [vmem:[%s7519_s10 + $0x18] sm:$0xff]   ;;  %v7578_v49 = vcombine.low %v7569_v41, %v7572_v42  ;;  %v7225_v23 = vld [vmem:[%s9102_s1 + $0x148] sm:$0xff]  }
  0x19   : > { %6398 = vmatprep.subr.bf16.mxu0 %v7201_v7  ;;  %v2435_v39 = vrot.slane %v2433_v30, 3  ;;  %v2438_v40 = vrot.slane %v2436_v31, 4  ;;  %v422_v50 = vshrl.u32 %v7214_v16, 16  ;;  %v7581_v51 = vld [vmem:[%s7519_s10 + $0x20] sm:$0xf]  ;;  %v426_v55 = vshll.u32 %v7217_v46, 16 }
  0x1a   : > { %v408_v38 = vor.u32 %v407_v28, %v403_v22  ;;  %v2443_v43 = vrot.slane %v2441_v33, 3  ;;  %v2446_v44 = vrot.slane %v2444_v34, 4  ;;  %9144 = vst [vmem:[#allocation4_spill] sm:$0xff] %v7578_v49  ;;  %v7588_v56 = vld [vmem:[%s7519_s10 + $0x24] sm:$0xf]  ;;  %v430_v57 = vshrl.u32 %v7217_v46, 16 }
  0x1b   : > { %6111 = vmatpush3.bf16.msra.mxu1 %v7200_v6  ;;  %v2439_v48 = vor.u32 %v2438_v40, %v2435_v39  ;;  %v416_v58 = vor.u32 %v414_v35, %v412_v29  ;;  %v2450_v59 = vshrl.u32 %v7578_v49, 16  ;;  %v2453_v60 = vshll.u32 %v7578_v49, 16  ;;  %v7597_v62 = vld [vmem:[%s7519_s10 + $0x28] sm:$0xf]  ;;  %v7601_v3 = vld [vmem:[%s7519_s10 + $0x2c] sm:$0xf] }
  0x1c   : > { %6399 = vmatpush3.bf16.msra.mxu0 %v7201_v7  ;;  %6112 = vmatprep.subr.bf16.mxu1 %v7202_v8  ;;  %v413_v47 = vsel %vm401_vm0, %v408_v38, %v412_v29  ;;  %v2447_v53 = vor.u32 %v2446_v44, %v2443_v43  ;;  %v7594_v61 = vcombine.low %v7581_v51, %v7588_v56  ;;  %v428_v1 = vrot.slane %v426_v55, 1  ;;  %v7222_v16 = vld [vmem:[%s9102_s1 + $0x8] sm:$0xff]   ;;  %v7625_v31 = vld [vmem:[%s7519_s10 + $0x30] sm:$0xf]  ;;  %v7648_v55 = vld [vmem:[%s7519_s10 + $0x38] sm:$0xff]  }
  0x1d   : > { %6400 = vmatprep.subr.bf16.mxu0 %v7203_v9  ;;  %6120 = vmatprep.mubr.bf16.mxu1 %v413_v47  ;;  %v424_v0 = vor.u32 %v422_v50, %v420_v45  ;;  %v434_v2 = vshll.u32 %v7219_v52, 16  ;;  %v2452_v4 = vrot.slane %v2450_v59, 3  ;;  %v2455_v5 = vrot.slane %v2453_v60, 4  ;;  %v7226_v33 = vld [vmem:[%s7519_s10 + $0x30] sm:$0xff]   ;;  %v7642_v50 = vld [vmem:[%s7519_s10 + $0x3c] sm:$0xf] }
  0x1e   : > { %9145 = vst [vmem:[#allocation5_spill] sm:$0xff] %v7594_v61  ;;  %v2448_v63 = vsel %vm2431_vm1, %v2439_v48, %v2447_v53  ;;  %v2459_v6 = vshrl.u32 %v7594_v61, 16  ;;  %v2462_v7 = vshll.u32 %v7594_v61, 16  ;;  %v438_v22 = vshrl.u32 %v7219_v52, 16  ;;  %v7639_v48 = vld [vmem:[%s7519_s10 + $0x38] sm:$0xf] }
  0x1f   : > { %6113 = vmatpush3.bf16.msra.mxu1 %v7202_v8  ;;  %6408 = vmatprep.mubr.bf16.mxu0 %v2448_v63  ;;  %v436_v8 = vrot.slane %v434_v2, 1  ;;  %v2456_v12 = vor.u32 %v2455_v5, %v2452_v4  ;;  %v429_v28 = vsel %vm401_vm0, %v424_v0, %v428_v1  ;;  %v432_v34 = vor.u32 %v430_v57, %v428_v1  ;;  %v7657_v63 = vld [vmem:[%s7519_s10 + $0x40] sm:$0xf]  ;;  %v7973_v61 = vld [vmem:[%s7519_s10 + $0xac] sm:$0xf] }
  0x20   : > { %6401 = vmatpush3.bf16.msra.mxu0 %v7203_v9  ;;  %6114 = vmatprep.subr.bf16.mxu1 %v7204_v10  ;;  %v7607_v9 = vcombine.low %v7597_v62, %v7601_v3  ;;  %v2461_v13 = vrot.slane %v2459_v6, 3  ;;  %v2464_v15 = vrot.slane %v2462_v7, 4  ;;  %v450_v47 = vshll.u32 %v7226_v33, 16  ;;  %v7660_v0 = vld [vmem:[%s7519_s10 + $0x40] sm:$0xff]   ;;  %v7976_v49 = vld [vmem:[%s7519_s10 + $0xb0] sm:$0xf] }
  0x21   : > { %6402 = vmatprep.subr.bf16.mxu0 %v7205_v11  ;;  %v2457_v24 = vsel %vm2431_vm1, %v2447_v53, %v2456_v12  ;;  %v440_v39 = vor.u32 %v438_v22, %v436_v8  ;;  %v437_v57 = vsel %vm401_vm0, %v432_v34, %v436_v8  ;;  %v7654_v59 = vcombine.low %v7639_v48, %v7642_v50  ;;  %v7665_v6 = vld [vmem:[%s7519_s10 + $0x44] sm:$0xf]  ;;  %v7979_v27 = vld [vmem:[%s7519_s10 + $0xb4] sm:$0xf] }
  0x22   : > { %9146 = vst [vmem:[#allocation6_spill] sm:$0xff] %v7607_v9  ;;  %v2468_v18 = vshrl.u32 %v7607_v9, 16  ;;  %v2465_v29 = vor.u32 %v2464_v15, %v2461_v13  ;;  %v454_v60 = vshrl.u32 %v7226_v33, 16  ;;  %v452_v4 = vrot.slane %v450_v47, 1 }
  0x23   : > { %6115 = vmatpush3.bf16.msra.mxu1 %v7204_v10  ;;  %v7221_v10 = vld [vmem:[%s9102_s1 + $0x140] sm:$0xff]   ;;  %9148 = vst [vmem:[#allocation8_spill] sm:$0xff] %v7654_v59  ;;  %v458_v5 = vshll.u32 %v7648_v55, 16  ;;  %v2486_v8 = vshrl.u32 %v7654_v59, 16  ;;  %v470_v47 = vshrl.u32 %v7660_v0, 16 }
  0x24   : > { %6403 = vmatpush3.bf16.msra.mxu0 %v7205_v11  ;;  %6116 = vmatprep.subr.bf16.mxu1 %v7206_v17  ;;  %v421_v11 = vsel %vm401_vm0, %v416_v58, %v420_v45  ;;  %v2470_v35 = vrot.slane %v2468_v18, 3  ;;  %v2466_v38 = vsel %vm2431_vm1, %v2456_v12, %v2465_v29  ;;  %v7674_v12 = vld [vmem:[%s7519_s10 + $0x48] sm:$0xf]  ;;  %v456_v15 = vor.u32 %v454_v60, %v452_v4  ;;  %v7679_v18 = vld [vmem:[%s7519_s10 + $0x4c] sm:$0xf] }
  0x25   : > { %6404 = vmatprep.subr.bf16.mxu0 %v7207_v21 }
  0x27   : > { %6117 = vmatpush3.bf16.msra.mxu1 %v7206_v17  ;;  %v7223_v17 = vld [vmem:[%s7519_s10 + $0x28] sm:$0xff]  }
  0x28   : > { %6405 = vmatpush3.bf16.msra.mxu0 %v7207_v21  ;;  %6118 = vmatprep.subr.bf16.mxu1 %v7208_v32  ;;  %v2471_v21 = vshll.u32 %v7607_v9, 16  ;;  %v442_v30 = vshll.u32 %v7223_v17, 16  ;;  %v446_v43 = vshrl.u32 %v7223_v17, 16  ;;  %v466_v17 = vshll.u32 %v7660_v0, 16 }
  0x29   : > { %6406 = vmatprep.subr.bf16.mxu0 %v7209_v37 }
  0x2a   : > { %v2473_v36 = vrot.slane %v2471_v21, 4  ;;  %v444_v40 = vrot.slane %v442_v30, 1  ;;  %v2488_v21 = vrot.slane %v2486_v8, 3 }
  0x2b   : > { %6119 = vmatpush3.bf16.msra.mxu1 %v7208_v32  ;;  %v7628_v32 = vld [vmem:[%s7519_s10 + $0x34] sm:$0xf] }
  0x2c   : > { %6407 = vmatpush3.bf16.msra.mxu0 %v7209_v37  ;;  %6176 = vmatprep.subr.bf16.mxu1 %v7215_v54  ;;  %v7633_v37 = vcombine.low %v7625_v31, %v7628_v32  ;;  %v2474_v44 = vor.u32 %v2473_v36, %v2470_v35  ;;  %v445_v58 = vsel %vm401_vm0, %v440_v39, %v444_v40  ;;  %v7234_v36 = vld [vmem:[%s9102_s1 + $0x158] sm:$0xff]   ;;  %v462_v39 = vshrl.u32 %v7648_v55, 16 }
  0x2d   : > { %6464 = vmatprep.subr.bf16.mxu0 %v7221_v10  ;;  %v448_v7 = vor.u32 %v446_v43, %v444_v40  ;;  %v468_v40 = vrot.slane %v466_v17, 1 }
  0x2e   : > { %6121 = vmatmul.mubr.bf16.vlgmr.msra.gmra.mrb[0].mxu1 %v421_v11  ;;  %9147 = vst [vmem:[#allocation7_spill] sm:$0xff] %v7633_v37  ;;  %v2477_v45 = vshrl.u32 %v7633_v37, 16  ;;  %v2480_v46 = vshll.u32 %v7633_v37, 16  ;;  %v2475_v1 = vsel %vm2431_vm1, %v2465_v29, %v2474_v44  ;;  %v7671_v11 = vcombine.low %v7657_v63, %v7665_v6  ;;  %v7233_v29 = vld [vmem:[%s9102_s1 + $0x10] sm:$0xff]  }
  0x2f   : > { %6409 = vmatmul.mubr.bf16.vlgmr.msra.gmra.mrb[0].mxu0 %v2457_v24  ;;  %6177 = vmatpush3.bf16.msra.mxu1 %v7215_v54  ;;  %v7228_v54 = vld [vmem:[%s9102_s1 + $0x150] sm:$0xff]   ;;  %v453_v30 = vsel %vm401_vm0, %v448_v7, %v452_v4  ;;  %v7721_v7 = vld [vmem:[%s7519_s10 + $0x5c] sm:$0xf] }
  0x30   : > { %6124 = vmatprep.mubr.bf16.mxu1 %v429_v28  ;;  %6412 = vmatprep.mubr.bf16.mxu0 %v2466_v38  ;;  %v2479_v52 = vrot.slane %v2477_v45, 3  ;;  %v2482_v53 = vrot.slane %v2480_v46, 4  ;;  %9149 = vst [vmem:[#allocation9_spill] sm:$0xff] %v7671_v11  ;;  %v2498_v24 = vshll.u32 %v7671_v11, 16  ;;  %v7685_v28 = vcombine.low %v7674_v12, %v7679_v18  ;;  %v7695_v38 = vld [vmem:[%s7519_s10 + $0x48] sm:$0xff]   ;;  %v7237_v4 = vld [vmem:[%s7519_s10 + $0x50] sm:$0xff]  }
  0x31   : > { %6465 = vmatpush3.bf16.msra.mxu0 %v7221_v10  ;;  %6178 = vmatprep.subr.bf16.mxu1 %v7222_v16  ;;  %v2489_v10 = vshll.u32 %v7654_v59, 16  ;;  %v478_v0 = vshrl.u32 %v7695_v38, 16 }
  0x32   : > { %6466 = vmatprep.subr.bf16.mxu0 %v7225_v23  ;;  %v2483_v2 = vor.u32 %v2482_v53, %v2479_v52  ;;  %9150 = vst [vmem:[#allocation10_spill] sm:$0xff] %v7685_v28  ;;  %v2500_v35 = vrot.slane %v2498_v24, 4  ;;  %v2504_v43 = vshrl.u32 %v7685_v28, 16  ;;  %v474_v52 = vshll.u32 %v7695_v38, 16  ;;  %v7704_v53 = vld [vmem:[%s7519_s10 + $0x50] sm:$0xf] }
  0x33   : > { %6179 = vmatpush3.bf16.msra.mxu1 %v7222_v16  ;;  %v460_v16 = vrot.slane %v458_v5, 1  ;;  %v2491_v22 = vrot.slane %v2489_v10, 4  ;;  %v7718_v5 = vld [vmem:[%s7519_s10 + $0x58] sm:$0xf] }
  0x34   : > { %v2484_v13 = vsel %vm2431_vm1, %v2474_v44, %v2483_v2  ;;  %v2507_v44 = vshll.u32 %v7685_v28, 16  ;;  %6180 = vmatprep.subr.bf16.mxu1 %v7233_v29  ;;  %v7727_v10 = vcombine.low %v7718_v5, %v7721_v7  ;;  %v476_v17 = vrot.slane %v474_v52, 1 }
  0x35   : > { %6467 = vmatpush3.bf16.msra.mxu0 %v7225_v23  ;;  %v2495_v23 = vshrl.u32 %v7671_v11, 16  ;;  %v2492_v33 = vor.u32 %v2491_v22, %v2488_v21  ;;  %v461_v45 = vsel %vm401_vm0, %v456_v15, %v460_v16  ;;  %v472_v15 = vor.u32 %v470_v47, %v468_v40  ;;  %v7239_v21 = vld [vmem:[%s9102_s1 + $0x160] sm:$0xff]   ;;  %v7820_v11 = vld [vmem:[%s7519_s10 + $0x78] sm:$0xff]  }
  0x36   : > { %6125 = vmatmul.mubr.bf16.gmra.mrb[4].mxu1 %v437_v57  ;;  %6468 = vmatprep.subr.bf16.mxu0 %v7228_v54  ;;  %v2506_v57 = vrot.slane %v2504_v43, 3  ;;  %9152 = vst [vmem:[#allocation12_spill] sm:$0xff] %v7727_v10 }
  0x37   : > { %6413 = vmatmul.mubr.bf16.gmra.mrb[4].mxu0 %v2475_v1  ;;  %6128 = vmatprep.mubr.bf16.mxu1 %v445_v58  ;;  %v2497_v34 = vrot.slane %v2495_v23, 3  ;;  %v2493_v55 = vsel %vm2431_vm1, %v2483_v2, %v2492_v33  ;;  %v2509_v58 = vrot.slane %v2507_v44, 4  ;;  %v7244_v44 = vld [vmem:[%s9102_s1 + $0x18] sm:$0xff]   ;;  %v477_v47 = vsel %vm401_vm0, %v472_v15, %v476_v17 }
  0x38   : > { %6416 = vmatprep.mubr.bf16.mxu0 %v2484_v13  ;;  %6181 = vmatpush3.bf16.msra.mxu1 %v7233_v29  ;;  %v464_v13 = vor.u32 %v462_v39, %v460_v16  ;;  %v2522_v29 = vshrl.u32 %v7727_v10, 16  ;;  %v482_v16 = vshll.u32 %v7237_v4, 16  ;;  %v486_v39 = vshrl.u32 %v7237_v4, 16 }
  0x39   : > { %6469 = vmatpush3.bf16.msra.mxu0 %v7228_v54  ;;  %v2501_v46 = vor.u32 %v2500_v35, %v2497_v34  ;;  %v7707_v54 = vld [vmem:[%s7519_s10 + $0x54] sm:$0xf]  ;;  %v2510_v22 = vor.u32 %v2509_v58, %v2506_v57  ;;  %v2525_v34 = vshll.u32 %v7727_v10, 16  ;;  %v7741_v35 = vld [vmem:[%s7519_s10 + $0x64] sm:$0xf]  ;;  %6182 = vmatprep.subr.bf16.mxu1 %v7244_v44 }
  0x3a   : > { %6470 = vmatprep.subr.bf16.mxu0 %v7234_v36  ;;  %v7712_v60 = vcombine.low %v7704_v53, %v7707_v54  ;;  %v2524_v38 = vrot.slane %v2522_v29, 3  ;;  %v7757_v57 = vld [vmem:[%s7519_s10 + $0x68] sm:$0xf]  ;;  %v7760_v58 = vld [vmem:[%s7519_s10 + $0x6c] sm:$0xf]  ;;  %v484_v15 = vrot.slane %v482_v16, 1  ;;  %v480_v29 = vor.u32 %v478_v0, %v476_v17 }
  0x3b   : > { %v2502_v1 = vsel %vm2431_vm1, %v2492_v33, %v2501_v46  ;;  %v7737_v33 = vld [vmem:[%s7519_s10 + $0x60] sm:$0xf]  ;;  %v2527_v4 = vrot.slane %v2525_v34, 4 }
  0x3c   : > { %9151 = vst [vmem:[#allocation11_spill] sm:$0xff] %v7712_v60  ;;  %v2513_v2 = vshrl.u32 %v7712_v60, 16  ;;  %v2516_v8 = vshll.u32 %v7712_v60, 16  ;;  %v7745_v43 = vcombine.low %v7737_v33, %v7741_v35  ;;  %6183 = vmatpush3.bf16.msra.mxu1 %v7244_v44  ;;  %v488_v44 = vor.u32 %v486_v39, %v484_v15  ;;  %v7793_v39 = vld [vmem:[%s7519_s10 + $0x78] sm:$0xf]  ;;  %v7815_v60 = vld [vmem:[%s7519_s10 + $0x70] sm:$0xff]  }
  0x3d   : > { %6471 = vmatpush3.bf16.msra.mxu0 %v7234_v36  ;;  %v2528_v16 = vor.u32 %v2527_v4, %v2524_v38 }
  0x3e   : > { %6129 = vmatmul.mubr.bf16.gmra.mrb[8].mxu1 %v453_v30  ;;  %v2515_v23 = vrot.slane %v2513_v2, 3  ;;  %v2518_v24 = vrot.slane %v2516_v8, 4  ;;  %v7734_v30 = vld [vmem:[%s7519_s10 + $0x58] sm:$0xff]   ;;  %6472 = vmatprep.subr.bf16.mxu0 %v7239_v21  ;;  %9153 = vst [vmem:[#allocation13_spill] sm:$0xff] %v7745_v43  ;;  %v2531_v2 = vshrl.u32 %v7745_v43, 16  ;;  %v2534_v8 = vshll.u32 %v7745_v43, 16 }
  0x3f   : > { %6417 = vmatmul.mubr.bf16.gmra.mrb[8].mxu0 %v2493_v55  ;;  %6132 = vmatprep.mubr.bf16.mxu1 %v461_v45  ;;  %v469_v45 = vsel %vm401_vm0, %v464_v13, %v468_v40  ;;  %v490_v52 = vshll.u32 %v7734_v30, 16  ;;  %v7754_v55 = vld [vmem:[%s7519_s10 + $0x60] sm:$0xff]   ;;  %v7245_v40 = vld [vmem:[%s9102_s1 + $0x168] sm:$0xff]   ;;  %v494_v10 = vshrl.u32 %v7734_v30, 16  ;;  %v7796_v30 = vld [vmem:[%s7519_s10 + $0x7c] sm:$0xf] }
  0x40   : > { %6420 = vmatprep.mubr.bf16.mxu0 %v2502_v1  ;;  %v2519_v36 = vor.u32 %v2518_v24, %v2515_v23  ;;  %v2511_v1 = vsel %vm2431_vm1, %v2501_v46, %v2510_v22  ;;  %v7774_v23 = vld [vmem:[%s7519_s10 + $0x68] sm:$0xff]   ;;  %v2533_v46 = vrot.slane %v2531_v2, 3  ;;  %v2536_v24 = vrot.slane %v2534_v8, 4  ;;  %v7783_v2 = vld [vmem:[%s7519_s10 + $0x74] sm:$0xf] }
  0x41   : > { %6473 = vmatpush3.bf16.msra.mxu0 %v7239_v21  ;;  %v7771_v21 = vcombine.low %v7757_v57, %v7760_v58  ;;  %v492_v43 = vrot.slane %v490_v52, 1  ;;  %v498_v0 = vshll.u32 %v7754_v55, 16  ;;  %v502_v17 = vshrl.u32 %v7754_v55, 16  ;;  %v7250_v55 = vld [vmem:[%s9102_s1 + $0x170] sm:$0xff]  }
  0x42   : > { %v2520_v13 = vsel %vm2431_vm1, %v2510_v22, %v2519_v36  ;;  %6474 = vmatprep.subr.bf16.mxu0 %v7245_v40  ;;  %v506_v38 = vshll.u32 %v7774_v23, 16  ;;  %v485_v52 = vsel %vm401_vm0, %v480_v29, %v484_v15  ;;  %v510_v59 = vshrl.u32 %v7774_v23, 16 }
  0x43   : > { %9154 = vst [vmem:[#allocation14_spill] sm:$0xff] %v7771_v21  ;;  %v2540_v34 = vshrl.u32 %v7771_v21, 16  ;;  %v2543_v22 = vshll.u32 %v7771_v21, 16 }
  0x44   : > { %v508_v28 = vrot.slane %v506_v38, 1  ;;  %v522_v38 = vshll.u32 %v7820_v11, 16 }
  0x45   : > { %6475 = vmatpush3.bf16.msra.mxu0 %v7245_v40  ;;  %v2542_v8 = vrot.slane %v2540_v34, 3  ;;  %v2545_v4 = vrot.slane %v2543_v22, 4  ;;  %v7808_v34 = vcombine.low %v7793_v39, %v7796_v30  ;;  %v7251_v22 = vld [vmem:[%s9102_s1 + $0x178] sm:$0xff]  }
  0x46   : > { %6133 = vmatmul.mubr.bf16.gmra.mrb[12].mxu1 %v469_v45  ;;  %v7780_v45 = vld [vmem:[%s7519_s10 + $0x70] sm:$0xf]  ;;  %6476 = vmatprep.subr.bf16.mxu0 %v7250_v55 }
  0x47   : > { %6421 = vmatmul.mubr.bf16.gmra.mrb[12].mxu0 %v2511_v1  ;;  %6136 = vmatprep.mubr.bf16.mxu1 %v477_v47  ;;  %v2537_v1 = vor.u32 %v2536_v24, %v2533_v46  ;;  %v7789_v47 = vcombine.low %v7780_v45, %v7783_v2  ;;  %v2529_v46 = vsel %vm2431_vm1, %v2519_v36, %v2528_v16  ;;  %v2558_v36 = vshrl.u32 %v7808_v34, 16 }
  0x48   : > { %6424 = vmatprep.mubr.bf16.mxu0 %v2520_v13  ;;  %v493_v24 = vsel %vm401_vm0, %v488_v44, %v492_v43  ;;  %9156 = vst [vmem:[#allocation16_spill] sm:$0xff] %v7808_v34  ;;  %v496_v44 = vor.u32 %v494_v10, %v492_v43  ;;  %v518_v10 = vshrl.u32 %v7815_v60, 16 }
  0x49   : > { %9155 = vst [vmem:[#allocation15_spill] sm:$0xff] %v7789_v47  ;;  %v2549_v40 = vshrl.u32 %v7789_v47, 16  ;;  %v2552_v13 = vshll.u32 %v7789_v47, 16  ;;  %v2538_v21 = vsel %vm2431_vm1, %v2528_v16, %v2537_v1  ;;  %v500_v47 = vrot.slane %v498_v0, 1  ;;  %6477 = vmatpush3.bf16.msra.mxu0 %v7250_v55  ;;  %v7255_v0 = vld [vmem:[%s9102_s1 + $0x20] sm:$0xff]  }
  0x4a   : > { %v2561_v16 = vshll.u32 %v7808_v34, 16  ;;  %6478 = vmatprep.subr.bf16.mxu0 %v7251_v22  ;;  %v514_v55 = vshll.u32 %v7815_v60, 16  ;;  %6184 = vmatprep.subr.bf16.mxu1 %v7255_v0 }
  0x4b   : > { %v2551_v15 = vrot.slane %v2549_v40, 3  ;;  %v2554_v29 = vrot.slane %v2552_v13, 4  ;;  %v2546_v40 = vor.u32 %v2545_v4, %v2542_v8  ;;  %v504_v13 = vor.u32 %v502_v17, %v500_v47  ;;  %6185 = vmatpush3.bf16.msra.mxu1 %v7255_v0  ;;  %v7832_v17 = vld [vmem:[%s9102_s1 + $0x180] sm:$0xff]   ;;  %v7262_v4 = vld [vmem:[%s9102_s1 + $0x28] sm:$0xff]  }
  0x4c   : > { %v501_v43 = vsel %vm401_vm0, %v496_v44, %v500_v47  ;;  %6186 = vmatprep.subr.bf16.mxu1 %v7262_v4  ;;  %v7848_v44 = vld [vmem:[%s7519_s10 + $0x88] sm:$0xff]   ;;  %v526_v0 = vshrl.u32 %v7820_v11, 16 }
  0x4d   : > { %6479 = vmatpush3.bf16.msra.mxu0 %v7251_v22  ;;  %v2547_v8 = vsel %vm2431_vm1, %v2537_v1, %v2546_v40  ;;  %v509_v23 = vsel %vm401_vm0, %v504_v13, %v508_v28  ;;  %v512_v1 = vor.u32 %v510_v59, %v508_v28  ;;  %9158 = vst [vmem:[#allocation18_spill] sm:$0xff] %v7848_v44 }
  0x4e   : > { %6137 = vmatmul.mubr.bf16.gmra.mrb[16].mxu1 %v485_v52  ;;  %v2555_v52 = vor.u32 %v2554_v29, %v2551_v15  ;;  %6536 = vmatprep.subr.bf16.mxu0 %v7832_v17  ;;  %v7843_v15 = vld [vmem:[%s7519_s10 + $0x80] sm:$0xff]   ;;  %v5639_v13 = vcombine.low %v7538_v19, %v7541_v20 }
  0x4f   : > { %6425 = vmatmul.mubr.bf16.gmra.mrb[16].mxu0 %v2529_v46  ;;  %6140 = vmatprep.mubr.bf16.mxu1 %v493_v24  ;;  %v2560_v46 = vrot.slane %v2558_v36, 3  ;;  %v516_v24 = vrot.slane %v514_v55, 1  ;;  %v524_v36 = vrot.slane %v522_v38, 1  ;;  %v534_v55 = vshrl.u32 %v7843_v15, 16  ;;  %v7871_v38 = vld [vmem:[%s7519_s10 + $0xa0] sm:$0xff]  }
  0x50   : > { %6428 = vmatprep.mubr.bf16.mxu0 %v2538_v21  ;;  %v2563_v21 = vrot.slane %v2561_v16, 4  ;;  %v2556_v47 = vsel %vm2431_vm1, %v2546_v40, %v2555_v52  ;;  %6187 = vmatpush3.bf16.msra.mxu1 %v7262_v4  ;;  %v530_v16 = vshll.u32 %v7843_v15, 16  ;;  %9161 = vst [vmem:[#allocation21_spill] sm:$0xff] %v7871_v38 }
  0x51   : > { %v520_v22 = vor.u32 %v518_v10, %v516_v24  ;;  %v517_v40 = vsel %vm401_vm0, %v512_v1, %v516_v24  ;;  %v7272_v10 = vld [vmem:[%s9102_s1 + $0x30] sm:$0xff]   ;;  %v528_v20 = vor.u32 %v526_v0, %v524_v36  ;;  %v542_v24 = vshrl.u32 %v7848_v44, 16  ;;  %v7898_v0 = vld [vmem:[%s9102_s1 + $0x80] sm:$0xff]  }
  0x52   : > { %v7845_v29 = vor.u32 %v2563_v21, %v2560_v46  ;;  %v538_v46 = vshll.u32 %v7848_v44, 16  ;;  %v532_v19 = vrot.slane %v530_v16, 1  ;;  %6188 = vmatprep.subr.bf16.mxu1 %v7272_v10  ;;  %v243_v44 = vld [vmem:[%s7519_s10 + $0xdc] sm:$0x1] }
  0x53   : > { %v525_v28 = vsel %vm401_vm0, %v520_v22, %v524_v36  ;;  %v5641_v22 = vcombine.low %v7572_v42, %v7581_v51  ;;  %v7890_v42 = vld [vmem:[%s7519_s10 + $0xa8] sm:$0xff]   ;;  %v7893_v51 = vld [vmem:[%s7519_s10 + $0x80] sm:$0xf] }
  0x54   : > { %9157 = vst [vmem:[#allocation17_spill] sm:$0xff] %v7845_v29  ;;  %v2565_v59 = vsel %vm2431_vm1, %v2555_v52, %v7845_v29  ;;  %v536_v52 = vor.u32 %v534_v55, %v532_v19  ;;  %v540_v21 = vrot.slane %v538_v46, 1  ;;  %6189 = vmatpush3.bf16.msra.mxu1 %v7272_v10  ;;  %v533_v4 = vsel %vm401_vm0, %v528_v20, %v532_v19  ;;  %v7905_v10 = vld [vmem:[%s7519_s10 + $0xb0] sm:$0xff]   ;;  %v7908_v19 = vld [vmem:[%s7519_s10 + $0x88] sm:$0xf] }
  0x55   : > { %9162 = vst [vmem:[#allocation22_spill] sm:$0xff] %v7890_v42  ;;  %9163 = vst [vmem:[#allocation23_spill] sm:$0xff] %v7905_v10  ;;  %v5643_v29 = vcombine.low %v7601_v3, %v7625_v31  ;;  %v570_v34 = vshll.u32 %v7890_v42, 16  ;;  %v574_v37 = vshrl.u32 %v7890_v42, 16  ;;  %v7956_v3 = vld [vmem:[%s7519_s10 + $0xa0] sm:$0xf] }
  0x56   : > { %6141 = vmatmul.mubr.bf16.gmra.mrb[20].mxu1 %v501_v43  ;;  %v7864_v43 = vld [vmem:[%s7519_s10 + $0x90] sm:$0xff]   ;;  %v541_v1 = vsel %vm401_vm0, %v536_v52, %v540_v21  ;;  %v7915_v52 = vld [vmem:[%s7519_s10 + $0x8c] sm:$0xf]  ;;  %v8053_v42 = vld [vmem:[%s7519_s10 + $0xdc] sm:$0xf] }
  0x57   : > { %6429 = vmatmul.mubr.bf16.gmra.mrb[20].mxu0 %v2547_v8  ;;  %6144 = vmatprep.mubr.bf16.mxu1 %v509_v23  ;;  %9159 = vst [vmem:[#allocation19_spill] sm:$0xff] %v7864_v43  ;;  %v7867_v8 = vld [vmem:[%s7519_s10 + $0x98] sm:$0xff]   ;;  %v546_v23 = vshll.u32 %v7864_v43, 16  ;;  %v550_v36 = vshrl.u32 %v7864_v43, 16  ;;  %v572_v26 = vrot.slane %v570_v34, 1  ;;  %v7295_v34 = vld [vmem:[%s9102_s1 + $0x1a0] sm:$0xff]  }
  0x58   : > { %6432 = vmatprep.mubr.bf16.mxu0 %v2556_v47  ;;  %9160 = vst [vmem:[#allocation20_spill] sm:$0xff] %v7867_v8  ;;  %v5640_v47 = vcombine.low %v7549_v25, %v7569_v41  ;;  %v554_v16 = vshll.u32 %v7867_v8, 16  ;;  %v7267_v25 = vld [vmem:[%s9102_s1 + $0x188] sm:$0xff]   ;;  %v562_v41 = vshll.u32 %v7871_v38, 16 }
  0x5a   : > { %v556_v46 = vrot.slane %v554_v16, 1  ;;  %v566_v16 = vshrl.u32 %v7871_v38, 16  ;;  %v8056_v38 = vld [vmem:[%s7519_s10 + $0xc8] sm:$0xff]  }
  0x5e   : > { %6145 = vmatmul.mubr.bf16.gmra.mrb[24].mxu1 %v517_v40  ;;  %v7282_v40 = vld [vmem:[%s9102_s1 + $0x38] sm:$0xff]  }
  0x5f   : > { %6433 = vmatmul.mubr.bf16.gmra.mrb[24].mxu0 %v2565_v59  ;;  %6148 = vmatprep.mubr.bf16.mxu1 %v525_v28  ;;  %v544_v59 = vor.u32 %v542_v24, %v540_v21  ;;  %v7901_v28 = vld [vmem:[%s7519_s10 + $0x84] sm:$0xf]  ;;  %v7277_v21 = vld [vmem:[%s9102_s1 + $0x190] sm:$0xff]  }
  0x60   : > { %6480 = vmatprep.mubr.bf16.mxu0 %v5639_v13  ;;  %v548_v13 = vrot.slane %v546_v23, 1  ;;  %6190 = vmatprep.subr.bf16.mxu1 %v7282_v40  ;;  %v7912_v20 = vcombine.low %v7893_v51, %v7901_v28  ;;  %v7925_v23 = vcombine.low %v7908_v19, %v7915_v52 }
  0x61   : > { %6191 = vmatpush3.bf16.msra.mxu1 %v7282_v40 }
  0x62   : > { %v552_v55 = vor.u32 %v550_v36, %v548_v13  ;;  %9164 = vst [vmem:[#allocation24_spill] sm:$0xff] %v7912_v20  ;;  %9165 = vst [vmem:[#allocation25_spill] sm:$0xff] %v7925_v23  ;;  %6248 = vmatprep.subr.bf16.mxu1 %v7898_v0  ;;  %v564_v36 = vrot.slane %v562_v41, 1  ;;  %v7286_v41 = vld [vmem:[%s9102_s1 + $0x198] sm:$0xff]   ;;  %v8023_v20 = vld [vmem:[%s7519_s10 + $0xcc] sm:$0xf] }
  0x64   : > { %v557_v40 = vsel %vm401_vm0, %v552_v55, %v556_v46 }
  0x66   : > { %6149 = vmatmul.mubr.bf16.gmra.mrb[28].mxu1 %v533_v4  ;;  %v7928_v4 = vld [vmem:[%s7519_s10 + $0x94] sm:$0xf] }
  0x67   : > { %6481 = vmatmul.mubr.bf16.vlgmr.msra.gmra.mrb[0].mxu0 %v5640_v47  ;;  %6152 = vmatprep.mubr.bf16.mxu1 %v541_v1  ;;  %v558_v47 = vshrl.u32 %v7867_v8, 16  ;;  %v549_v1 = vsel %vm401_vm0, %v544_v59, %v548_v13  ;;  %v7946_v13 = vld [vmem:[%s7519_s10 + $0x98] sm:$0xf]  ;;  %v7966_v59 = vld [vmem:[%s7519_s10 + $0xa8] sm:$0xf] }
  0x68   : > { %6484 = vmatprep.mubr.bf16.mxu0 %v5641_v22  ;;  %6537 = vmatpush3.bf16.msra.mxu0 %v7832_v17  ;;  %v7921_v17 = vld [vmem:[%s7519_s10 + $0x90] sm:$0xf]  ;;  %v5642_v22 = vcombine.low %v7588_v56, %v7597_v62  ;;  %v7949_v56 = vld [vmem:[%s7519_s10 + $0x9c] sm:$0xf]  ;;  %v578_v62 = vshll.u32 %v7905_v10, 16 }
  0x69   : > { %6538 = vmatprep.subr.bf16.mxu0 %v7267_v25  ;;  %v7934_v24 = vcombine.low %v7921_v17, %v7928_v4  ;;  %v7960_v31 = vcombine.low %v7946_v13, %v7949_v56  ;;  %v560_v9 = vor.u32 %v558_v47, %v556_v46  ;;  %v7990_v46 = vcombine.low %v7976_v49, %v7979_v27 }
  0x6a   : > { %v582_v47 = vshrl.u32 %v7905_v10, 16 }
  0x6b   : > { %9166 = vst [vmem:[#allocation26_spill] sm:$0xff] %v7934_v24  ;;  %9167 = vst [vmem:[#allocation27_spill] sm:$0xff] %v7960_v31  ;;  %v7982_v31 = vld [vmem:[%s7519_s10 + $0xb8] sm:$0xff]   ;;  %v8016_v24 = vld [vmem:[%s7519_s10 + $0xc8] sm:$0xf] }
  0x6c   : > { %6539 = vmatpush3.bf16.msra.mxu0 %v7267_v25  ;;  %v7963_v25 = vld [vmem:[%s7519_s10 + $0xa4] sm:$0xf]  ;;  %9169 = vst [vmem:[#allocation29_spill] sm:$0xff] %v7982_v31  ;;  %9171 = vst [vmem:[#allocation31_spill] sm:$0xff] %v7990_v46 }
  0x6d   : > { %6540 = vmatprep.subr.bf16.mxu0 %v7277_v21  ;;  %v7970_v55 = vcombine.low %v7956_v3, %v7963_v25  ;;  %v8010_v46 = vld [vmem:[%s7519_s10 + $0xc4] sm:$0xf] }
  0x6e   : > { %6153 = vmatmul.mubr.bf16.gmra.mrb[32].mxu1 %v549_v1  ;;  %v568_v1 = vor.u32 %v566_v16, %v564_v36  ;;  %v8003_v16 = vld [vmem:[%s7519_s10 + $0xc0] sm:$0xf] }
  0x6f   : > { %9168 = vst [vmem:[#allocation28_spill] sm:$0xff] %v7970_v55  ;;  %6485 = vmatmul.mubr.bf16.gmra.mrb[4].mxu0 %v5642_v22  ;;  %6156 = vmatprep.mubr.bf16.mxu1 %v557_v40  ;;  %v7986_v22 = vcombine.low %v7966_v59, %v7973_v61  ;;  %v5644_v55 = vcombine.low %v7628_v32, %v7639_v48  ;;  %v8033_v32 = vld [vmem:[%s7519_s10 + $0xd0] sm:$0xf] }
  0x70   : > { %6488 = vmatprep.mubr.bf16.mxu0 %v5643_v29  ;;  %6541 = vmatpush3.bf16.msra.mxu0 %v7277_v21  ;;  %v7997_v29 = vld [vmem:[%s7519_s10 + $0xb8] sm:$0xf]  ;;  %v8000_v21 = vld [vmem:[%s7519_s10 + $0xbc] sm:$0xf]  ;;  %v8020_v23 = vcombine.low %v8003_v16, %v8010_v46  ;;  %v573_v10 = vsel %vm401_vm0, %v568_v1, %v572_v26  ;;  %v8037_v48 = vcombine.low %v8016_v24, %v8023_v20  ;;  %v7301_v1 = vld [vmem:[%s9102_s1 + $0x1a8] sm:$0xff]  }
  0x71   : > { %9170 = vst [vmem:[#allocation30_spill] sm:$0xff] %v7986_v22  ;;  %6542 = vmatprep.subr.bf16.mxu0 %v7286_v41  ;;  %v8007_v40 = vcombine.low %v7997_v29, %v8000_v21  ;;  %v565_v22 = vsel %vm401_vm0, %v560_v9, %v564_v36  ;;  %v586_v9 = vshll.u32 %v7982_v31, 16  ;;  %v8030_v36 = vld [vmem:[%s7519_s10 + $0xc0] sm:$0xff]  }
  0x72   : > { %9173 = vst [vmem:[#allocation33_spill] sm:$0xff] %v8020_v23  ;;  %9174 = vst [vmem:[#allocation34_spill] sm:$0xff] %v8037_v48  ;;  %v8040_v23 = vld [vmem:[%s7519_s10 + $0xd4] sm:$0xf]  ;;  %v576_v48 = vor.u32 %v574_v37, %v572_v26 }
  0x73   : > { %9172 = vst [vmem:[#allocation32_spill] sm:$0xff] %v8007_v40  ;;  %v5645_v40 = vcombine.low %v7642_v50, %v7657_v63  ;;  %v8047_v50 = vcombine.low %v8033_v32, %v8040_v23  ;;  %v580_v63 = vrot.slane %v578_v62, 1  ;;  %v590_v62 = vshrl.u32 %v7982_v31, 16  ;;  %v7311_v26 = vld [vmem:[%s9102_s1 + $0x1b0] sm:$0xff]  }
  0x74   : > { %6543 = vmatpush3.bf16.msra.mxu0 %v7286_v41  ;;  %v8050_v41 = vld [vmem:[%s7519_s10 + $0xd8] sm:$0xf] }
  0x75   : > { %6544 = vmatprep.subr.bf16.mxu0 %v7295_v34  ;;  %9175 = vst [vmem:[#allocation35_spill] sm:$0xff] %v8047_v50  ;;  %v8060_v8 = vcombine.low %v8050_v41, %v8053_v42  ;;  %v584_v43 = vor.u32 %v582_v47, %v580_v63  ;;  %v588_v50 = vrot.slane %v586_v9, 1  ;;  %v581_v37 = vsel %vm401_vm0, %v576_v48, %v580_v63 }
  0x76   : > { %6157 = vmatmul.mubr.bf16.gmra.mrb[36].mxu1 %v565_v22  ;;  %v594_v22 = vshll.u32 %v8030_v36, 16  ;;  %v602_v47 = vshll.u32 %v8056_v38, 16  ;;  %v5647_v9 = vcombine.low %v7679_v18, %v7704_v53  ;;  %v8091_v18 = vld [vmem:[%s9102_s1 + $0x1c0] sm:$0xff]  }
  0x77   : > { %6489 = vmatmul.mubr.bf16.gmra.mrb[8].mxu0 %v5644_v55  ;;  %6160 = vmatprep.mubr.bf16.mxu1 %v573_v10  ;;  %9176 = vst [vmem:[#allocation36_spill] sm:$0xff] %v8060_v8  ;;  %v5646_v10 = vcombine.low %v7665_v6, %v7674_v12  ;;  %v598_v55 = vshrl.u32 %v8030_v36, 16  ;;  %v8079_v8 = vld [vmem:[%s7519_s10 + $0xd0] sm:$0xff]   ;;  %v7321_v6 = vld [vmem:[%s9102_s1 + $0x1b8] sm:$0xff]   ;;  %v592_v12 = vor.u32 %v590_v62, %v588_v50  ;;  %v606_v62 = vshrl.u32 %v8056_v38, 16 }
  0x78   : > { %6492 = vmatprep.mubr.bf16.mxu0 %v5645_v40  ;;  %6545 = vmatpush3.bf16.msra.mxu0 %v7295_v34  ;;  %v8073_v40 = vld [vmem:[%s7519_s10 + $0xd8] sm:$0xf]  ;;  %v589_v34 = vsel %vm401_vm0, %v584_v43, %v588_v50  ;;  %v596_v31 = vrot.slane %v594_v22, 1  ;;  %v604_v43 = vrot.slane %v602_v47, 1  ;;  %v610_v53 = vshll.u32 %v8079_v8, 16 }
  0x79   : > { %6546 = vmatprep.subr.bf16.mxu0 %v7301_v1  ;;  %v8086_v63 = vcombine.low %v8073_v40, %v243_v44  ;;  %v5648_v50 = vcombine.low %v7707_v54, %v7718_v5  ;;  %v5649_v44 = vcombine.low %v7721_v7, %v7737_v33  ;;  %v5650_v7 = vcombine.low %v7741_v35, %v7757_v57 }
  0x7a   : > { %v600_v48 = vor.u32 %v598_v55, %v596_v31  ;;  %v5651_v47 = vcombine.low %v7760_v58, %v7780_v45  ;;  %v5653_v35 = vcombine.low %v7796_v30, %v7893_v51  ;;  %v5654_v57 = vcombine.low %v7901_v28, %v7908_v19  ;;  %v7296_v45 = vld [vmem:[%s9102_s1 + $0x88] sm:$0xff]   ;;  %v8143_v28 = vld [vmem:[%s7519_s10 + $0x18] sm:$0xff]   ;;  %v8147_v19 = vld [vmem:[%s7519_s10 + $0x20] sm:$0xff]  }
  0x7b   : > { %v5655_v58 = vcombine.low %v7915_v52, %v7921_v17  ;;  %v5656_v30 = vcombine.low %v7928_v4, %v7946_v13  ;;  %v5657_v51 = vcombine.low %v7949_v56, %v7956_v3  ;;  %v7324_v52 = vld [vmem:[%s9102_s1 + $0xa0] sm:$0xff]   ;;  %v5658_v17 = vcombine.low %v7963_v25, %v7966_v59  ;;  %v7329_v13 = vld [vmem:[%s9102_s1 + $0xa8] sm:$0xff]   ;;  %v8165_v3 = vld [vmem:[%s7519_s10 + $0x30] sm:$0xff]  }
  0x7c   : > { %6547 = vmatpush3.bf16.msra.mxu0 %v7301_v1  ;;  %v597_v1 = vsel %vm401_vm0, %v592_v12, %v596_v31  ;;  %v605_v22 = vsel %vm401_vm0, %v600_v48, %v604_v43  ;;  %v608_v31 = vor.u32 %v606_v62, %v604_v43  ;;  %v5659_v4 = vcombine.low %v7973_v61, %v7976_v49  ;;  %v8161_v56 = vld [vmem:[%s7519_s10 + $0x28] sm:$0xff]   ;;  %v7335_v49 = vld [vmem:[%s9102_s1 + $0xb0] sm:$0xff]   ;;  %v7341_v59 = vld [vmem:[%s9102_s1 + $0xb8] sm:$0xff]  }
  0x7d   : > { %6548 = vmatprep.subr.bf16.mxu0 %v7311_v26  ;;  %v5660_v61 = vcombine.low %v7979_v27, %v7997_v29  ;;  %v5661_v25 = vcombine.low %v8000_v21, %v8003_v16  ;;  %v8179_v12 = vld [vmem:[%s7519_s10 + $0x38] sm:$0xff]   ;;  %v8183_v48 = vld [vmem:[%s7519_s10 + $0x40] sm:$0xff]   ;;  %v5662_v29 = vcombine.low %v8010_v46, %v8016_v24  ;;  %v5663_v21 = vcombine.low %v8023_v20, %v8033_v32  ;;  %v8197_v16 = vld [vmem:[%s7519_s10 + $0x48] sm:$0xff]  }
  0x7e   : > { %6161 = vmatmul.mubr.bf16.gmra.mrb[40].mxu1 %v581_v37  ;;  %v618_v37 = vshll.u32 %v8086_v63, 16  ;;  %v8189_v27 = vld [vmem:[%s9102_s1 + $0xc0] sm:$0xff]   ;;  %v8201_v43 = vld [vmem:[%s7519_s10 + $0x50] sm:$0xff]   ;;  %v5664_v20 = vcombine.low %v8040_v23, %v8050_v41  ;;  %v8216_v62 = vld [vmem:[%s7519_s10 + $0x58] sm:$0xff]  }
  0x7f   : > { %6493 = vmatmul.mubr.bf16.gmra.mrb[12].mxu0 %v5646_v10  ;;  %6164 = vmatprep.mubr.bf16.mxu1 %v589_v34  ;;  %v612_v10 = vrot.slane %v610_v53, 1  ;;  %v622_v34 = vshrl.u32 %v8086_v63, 16  ;;  %v1808_v24 = vld [vmem:[%s7519_s10 + $0xe0] sm:$0xf]  ;;  %v3502_v46 = vld [vmem:[%s7519_s10 + $0x14] sm:$0xc] }
  0x80   : > { %6496 = vmatprep.mubr.bf16.mxu0 %v5647_v9  ;;  %6549 = vmatpush3.bf16.msra.mxu0 %v7311_v26  ;;  %v614_v26 = vshrl.u32 %v8079_v8, 16  ;;  %v620_v5 = vrot.slane %v618_v37, 1  ;;  %v3503_v53 = vld [vmem:[%s7519_s10 + $0x18] sm:$0xf]  ;;  %v5665_v32 = vcombine.low %v8053_v42, %v1808_v24  ;;  %v8297_v24 = vld [vmem:[%s7519_s10 + $0x64] sm:$0xff]  }
  0x81   : > { %6550 = vmatprep.subr.bf16.mxu0 %v7321_v6  ;;  %v613_v55 = vsel %vm401_vm0, %v608_v31, %v612_v10  ;;  %v8234_v31 = vld [vmem:[%s7519_s10 + $0x68] sm:$0xff]  }
  0x82   : > { %v616_v54 = vor.u32 %v614_v26, %v612_v10  ;;  %v624_v9 = vor.u32 %v622_v34, %v620_v5  ;;  %v8227_v26 = vld [vmem:[%s7519_s10 + $0x24] sm:$0xff]   ;;  %v8231_v10 = vld [vmem:[%s7519_s10 + $0x2c] sm:$0xff]  }
  0x83   : > { %v7332_v34 = vld [vmem:[%s9102_s1 + $0x1c8] sm:$0xff]  }
  0x84   : > { %6551 = vmatpush3.bf16.msra.mxu0 %v7321_v6  ;;  %v621_v33 = vsel %vm401_vm0, %v616_v54, %v620_v5  ;;  %v5652_v6 = vcombine.low %v7783_v2, %v7793_v39  ;;  %v8124_v2 = vld [vmem:[%s7519_s10 + $0x8] sm:$0xff]   ;;  %v7306_v39 = vld [vmem:[%s9102_s1 + $0x90] sm:$0xff]   ;;  %v3719_v54 = vrot.slane %v8227_v26, 2  ;;  %v3721_v5 = vrot.slane %v8231_v10, 2 }
  0x85   : > { %6608 = vmatprep.subr.bf16.mxu0 %v8091_v18 }
  0x86   : > { %6165 = vmatmul.mubr.bf16.gmra.mrb[44].mxu1 %v597_v1  ;;  %v8210_v1 = vcombine.low %v3502_v46, %v3503_v53  ;;  %v8301_v53 = vld [vmem:[%s7519_s10 + $0x6c] sm:$0xff]  }
  0x87   : > { %6497 = vmatmul.mubr.bf16.gmra.mrb[16].mxu0 %v5648_v50  ;;  %6168 = vmatprep.mubr.bf16.mxu1 %v605_v22  ;;  %v8213_v50 = vld [vmem:[%s7519_s10 + $0x1c] sm:$0xff]  }
  0x88   : > { %6500 = vmatprep.mubr.bf16.mxu0 %v5649_v44  ;;  %v8220_v22 = vld [vmem:[%s7519_s10 + $0x60] sm:$0xff]   ;;  %v3716_v42 = vrot.slane %v8210_v1, 2  ;;  %v3717_v23 = vrot.slane %v8213_v50, 2 }
  0x89   : > { %v2410_v44 = vld [vmem:[%s7519_s10 + $0xe4] sm:$0xf] }
  0x8a   : > { %v5666_v41 = vcombine.low %v2410_v44, %v2410_v44  ;;  %v3718_v37 = vsel %vm3715_vm2, %v3716_v42, %v3717_v23  ;;  %v9182_v44 = vld [vmem:[#allocation23_spill] sm:$0xff]  ;;  %v3735_v42 = vrot.slane %v8297_v24, 2 }
  0x8e   : > { %6169 = vmatmul.mubr.bf16.gmra.mrb[48].mxu1 %v613_v55  ;;  %v3720_v55 = vsel %vm3715_vm2, %v3717_v23, %v3719_v54  ;;  %v3737_v23 = vrot.slane %v8301_v53, 2 }
  0x8f   : > { %6501 = vmatmul.mubr.bf16.gmra.mrb[20].mxu0 %v5650_v7  ;;  %6172 = vmatprep.mubr.bf16.mxu1 %v621_v33  ;;  %v8242_v7 = vld [vmem:[%s7519_s10 + $0x34] sm:$0xff]   ;;  %v3722_v33 = vsel %vm3715_vm2, %v3719_v54, %v3721_v5 }
  0x90   : > { %6504 = vmatprep.mubr.bf16.mxu0 %v5651_v47  ;;  %v8246_v47 = vld [vmem:[%s7519_s10 + $0x3c] sm:$0xff]   ;;  %v8317_v54 = vld [vmem:[%s7519_s10 + $0x74] sm:$0xff]  }
  0x96   : > { %6173 = vmatmul.mubr.bf16.gmra.mrb[52].mxu1 %v624_v9  ;;  %v3725_v9 = vrot.slane %v8246_v47, 2 }
  0x97   : > { %6505 = vmatmul.mubr.bf16.gmra.mrb[24].mxu0 %v5652_v6  ;;  %6192 = vmatprep.mubr.bf16.mxu1 %v7529_v14  ;;  %v8129_v14 = vld [vmem:[%s7519_s10 + $0x10] sm:$0xff]  }
  0x98   : > { %6508 = vmatprep.mubr.bf16.mxu0 %v5653_v35  ;;  %v7338_v6 = vld [vmem:[%s9102_s1 + $0x1d0] sm:$0xff]  }
  0x9e   : > { %6193 = vmatmul.mubr.bf16.vlgmr.msra.gmra.mrb[0].mxu1 %v8124_v2 }
  0x9f   : > { %6509 = vmatmul.mubr.bf16.gmra.mrb[28].mxu0 %v5654_v57  ;;  %6249 = vmatpush3.bf16.msra.mxu1 %v7898_v0  ;;  %v7316_v0 = vld [vmem:[%s9102_s1 + $0x98] sm:$0xff]   ;;  %v8261_v57 = vld [vmem:[%s7519_s10 + $0x44] sm:$0xff]  }
  0xa0   : > { %6196 = vmatprep.mubr.bf16.mxu1 %v8129_v14  ;;  %6512 = vmatprep.mubr.bf16.mxu0 %v5655_v58  ;;  %v9177_v58 = vld [vmem:[#allocation18_spill] sm:$0xff] }
  0xa1   : > { %6250 = vmatprep.subr.bf16.mxu1 %v7296_v45 }
  0xa3   : > { %6251 = vmatpush3.bf16.msra.mxu1 %v7296_v45  ;;  %v9178_v45 = vld [vmem:[#allocation19_spill] sm:$0xff] }
  0xa4   : > { %6252 = vmatprep.subr.bf16.mxu1 %v7306_v39 }
  0xa6   : > { %6197 = vmatmul.mubr.bf16.gmra.mrb[4].mxu1 %v8143_v28 }
  0xa7   : > { %6513 = vmatmul.mubr.bf16.gmra.mrb[32].mxu0 %v5656_v30  ;;  %6200 = vmatprep.mubr.bf16.mxu1 %v8147_v19 }
  0xa8   : > { %6516 = vmatprep.mubr.bf16.mxu0 %v5657_v51  ;;  %6253 = vmatpush3.bf16.msra.mxu1 %v7306_v39  ;;  %v3727_v39 = vrot.slane %v8261_v57, 2  ;;  %v7352_v51 = vld [vmem:[%s9102_s1 + $0x1e0] sm:$0xff]  }
  0xa9   : > { %6254 = vmatprep.subr.bf16.mxu1 %v7316_v0 }
  0xac   : > { %6255 = vmatpush3.bf16.msra.mxu1 %v7316_v0  ;;  %v3728_v0 = vsel %vm3715_vm2, %v3725_v9, %v3727_v39 }
  0xad   : > { %6256 = vmatprep.subr.bf16.mxu1 %v7324_v52 }
  0xae   : > { %6201 = vmatmul.mubr.bf16.gmra.mrb[8].mxu1 %v8161_v56 }
  0xaf   : > { %6517 = vmatmul.mubr.bf16.gmra.mrb[36].mxu0 %v5658_v17  ;;  %6204 = vmatprep.mubr.bf16.mxu1 %v8165_v3 }
  0xb0   : > { %6520 = vmatprep.mubr.bf16.mxu0 %v5659_v4  ;;  %6257 = vmatpush3.bf16.msra.mxu1 %v7324_v52  ;;  %v8279_v52 = vld [vmem:[%s7519_s10 + $0x54] sm:$0xff]   ;;  %v8283_v4 = vld [vmem:[%s7519_s10 + $0x5c] sm:$0xff]  }
  0xb1   : > { %6258 = vmatprep.subr.bf16.mxu1 %v7329_v13 }
  0xb4   : > { %6259 = vmatpush3.bf16.msra.mxu1 %v7329_v13  ;;  %v7356_v13 = vld [vmem:[%s9102_s1 + $0x1e8] sm:$0xff]  }
  0xb5   : > { %6260 = vmatprep.subr.bf16.mxu1 %v7335_v49 }
  0xb6   : > { %6205 = vmatmul.mubr.bf16.gmra.mrb[12].mxu1 %v8179_v12 }
  0xb7   : > { %6521 = vmatmul.mubr.bf16.gmra.mrb[40].mxu0 %v5660_v61  ;;  %6208 = vmatprep.mubr.bf16.mxu1 %v8183_v48  ;;  %v9180_v61 = vld [vmem:[#allocation21_spill] sm:$0xff] }
  0xb8   : > { %6524 = vmatprep.mubr.bf16.mxu0 %v5661_v25  ;;  %6261 = vmatpush3.bf16.msra.mxu1 %v7335_v49  ;;  %v9179_v49 = vld [vmem:[#allocation20_spill] sm:$0xff]  ;;  %v3731_v25 = vrot.slane %v8279_v52, 2 }
  0xb9   : > { %6262 = vmatprep.subr.bf16.mxu1 %v7341_v59 }
  0xbc   : > { %6263 = vmatpush3.bf16.msra.mxu1 %v7341_v59  ;;  %v3733_v59 = vrot.slane %v8283_v4, 2 }
  0xbd   : > { %6320 = vmatprep.subr.bf16.mxu1 %v8189_v27 }
  0xbe   : > { %6209 = vmatmul.mubr.bf16.gmra.mrb[16].mxu1 %v8197_v16  ;;  %v3734_v46 = vsel %vm3715_vm2, %v3731_v25, %v3733_v59 }
  0xbf   : > { %6525 = vmatmul.mubr.bf16.gmra.mrb[44].mxu0 %v5662_v29  ;;  %6212 = vmatprep.mubr.bf16.mxu1 %v8201_v43  ;;  %v7362_v29 = vld [vmem:[%s9102_s1 + $0x1f0] sm:$0xff]  }
  0xc0   : > { %6528 = vmatprep.mubr.bf16.mxu0 %v5663_v21 }
  0xc6   : > { %6213 = vmatmul.mubr.bf16.gmra.mrb[20].mxu1 %v8216_v62 }
  0xc7   : > { %6529 = vmatmul.mubr.bf16.gmra.mrb[48].mxu0 %v5664_v20  ;;  %6216 = vmatprep.mubr.bf16.mxu1 %v8220_v22  ;;  %v7368_v20 = vld [vmem:[%s9102_s1 + $0x1f8] sm:$0xff]  }
  0xc8   : > { %6532 = vmatprep.mubr.bf16.mxu0 %v5665_v32  ;;  %v9181_v32 = vld [vmem:[#allocation22_spill] sm:$0xff] }
  0xce   : > { %6217 = vmatmul.mubr.bf16.gmra.mrb[24].mxu1 %v8234_v31 }
  0xcf   : > { %6533 = vmatmul.mubr.bf16.gmra.mrb[52].mxu0 %v5666_v41  ;;  %6220 = vmatprep.mubr.bf16.mxu1 %v7815_v60  ;;  %v3723_v60 = vrot.slane %v8242_v7, 2  ;;  %v8313_v41 = vld [vmem:[%s9102_s1 + $0x200] sm:$0xff]  }
  0xd0   : > { %6552 = vmatprep.mubr.bf16.mxu0 %v3718_v37  ;;  %v3736_v37 = vsel %vm3715_vm2, %v3733_v59, %v3735_v42 }
  0xd1   : > { %v3724_v35 = vsel %vm3715_vm2, %v3721_v5, %v3723_v60  ;;  %v3738_v5 = vsel %vm3715_vm2, %v3735_v42, %v3737_v23  ;;  %v1321_v42 = vrot.slane %v8161_v56, 1  ;;  %v8387_v56 = vld [vmem:[%s7519_s10 + $0xbc] sm:$0xff]  }
  0xd6   : > { %6221 = vmatmul.mubr.bf16.gmra.mrb[28].mxu1 %v7820_v11  ;;  %v3726_v11 = vsel %vm3715_vm2, %v3723_v60, %v3725_v9  ;;  %v1290_v9 = vld [vmem:[%s7519_s10] sm:$0xe] }
  0xd7   : > { %6553 = vmatmul.mubr.bf16.vlgmr.msra.gmra.mrb[0].mxu0 %v3720_v55  ;;  %6224 = vmatprep.mubr.bf16.mxu1 %v7843_v15  ;;  %v8265_v15 = vld [vmem:[%s7519_s10 + $0x4c] sm:$0xff]   ;;  %v8321_v55 = vld [vmem:[%s7519_s10 + $0x7c] sm:$0xff]  }
  0xd8   : > { %6556 = vmatprep.mubr.bf16.mxu0 %v3722_v33  ;;  %6609 = vmatpush3.bf16.msra.mxu0 %v8091_v18  ;;  %v7345_v18 = vld [vmem:[%s9102_s1 + $0x1d8] sm:$0xff]   ;;  %v3729_v30 = vrot.slane %v8265_v15, 2  ;;  %v3741_v60 = vrot.slane %v8321_v55, 2 }
  0xd9   : > { %6610 = vmatprep.subr.bf16.mxu0 %v7332_v34  ;;  %v9183_v33 = vld [vmem:[#allocation29_spill] sm:$0xff] }
  0xda   : > { %v3730_v17 = vsel %vm3715_vm2, %v3727_v39, %v3729_v30  ;;  %v3732_v21 = vsel %vm3715_vm2, %v3729_v30, %v3731_v25  ;;  %v1313_v30 = vrot.slane %v8124_v2, 1  ;;  %v1315_v2 = vrot.slane %v8129_v14, 1  ;;  %v7353_v14 = vld [vmem:[%s9102_s1 + $0xc8] sm:$0xff]  }
  0xdc   : > { %6611 = vmatpush3.bf16.msra.mxu0 %v7332_v34  ;;  %v3739_v34 = vrot.slane %v8317_v54, 2  ;;  %v1316_v59 = vsel %vm1311_vm3, %v1313_v30, %v1315_v2 }
  0xdd   : > { %6612 = vmatprep.subr.bf16.mxu0 %v7338_v6 }
  0xde   : > { %6225 = vmatmul.mubr.bf16.gmra.mrb[32].mxu1 %v9177_v58  ;;  %v3742_v58 = vsel %vm3715_vm2, %v3739_v34, %v3741_v60 }
  0xdf   : > { %6557 = vmatmul.mubr.bf16.gmra.mrb[4].mxu0 %v3724_v35  ;;  %6228 = vmatprep.mubr.bf16.mxu1 %v9178_v45  ;;  %v8331_v35 = vld [vmem:[%s7519_s10 + $0x84] sm:$0xff]   ;;  %v8336_v45 = vld [vmem:[%s7519_s10 + $0x8c] sm:$0xff]  }
  0xe0   : > { %6560 = vmatprep.mubr.bf16.mxu0 %v3726_v11  ;;  %6613 = vmatpush3.bf16.msra.mxu0 %v7338_v6  ;;  %v3740_v6 = vsel %vm3715_vm2, %v3737_v23, %v3739_v34  ;;  %v7396_v11 = vld [vmem:[%s7519_s10 + $0x4] sm:$0xf]  ;;  %v7359_v23 = vld [vmem:[%s9102_s1 + $0xd0] sm:$0xff]  }
  0xe1   : > { %6614 = vmatprep.subr.bf16.mxu0 %v7345_v18 }
  0xe4   : > { %6615 = vmatpush3.bf16.msra.mxu0 %v7345_v18  ;;  %v5537_v18 = vcombine.low %v1290_v9, %v7396_v11  ;;  %v1323_v9 = vrot.slane %v8165_v3, 1  ;;  %v1325_v11 = vrot.slane %v8179_v12, 1  ;;  %v8403_v3 = vld [vmem:[%s7519_s10 + $0xc4] sm:$0xff]   ;;  %v8407_v12 = vld [vmem:[%s7519_s10 + $0xcc] sm:$0xff]  }
  0xe5   : > { %6616 = vmatprep.subr.bf16.mxu0 %v7352_v51 }
  0xe6   : > { %6229 = vmatmul.mubr.bf16.gmra.mrb[36].mxu1 %v9179_v49  ;;  %v1312_v39 = vrot.slane %v5537_v18, 1  ;;  %v8352_v49 = vld [vmem:[%s7519_s10 + $0x9c] sm:$0xff]   ;;  %v3757_v18 = vrot.slane %v8387_v56, 2 }
  0xe7   : > { %6561 = vmatmul.mubr.bf16.gmra.mrb[8].mxu0 %v3728_v0  ;;  %6232 = vmatprep.mubr.bf16.mxu1 %v9180_v61  ;;  %v5512_v0 = vcombine.low %v8073_v40, %v8073_v40  ;;  %v1317_v61 = vrot.slane %v8143_v28, 1  ;;  %v3749_v25 = vrot.slane %v8352_v49, 2  ;;  %v1319_v28 = vrot.slane %v8147_v19, 1 }
  0xe8   : > { %6564 = vmatprep.mubr.bf16.mxu0 %v3730_v17  ;;  %6617 = vmatpush3.bf16.msra.mxu0 %v7352_v51  ;;  %v3745_v51 = vrot.slane %v8336_v45, 2 }
  0xe9   : > { %6618 = vmatprep.subr.bf16.mxu0 %v7356_v13  ;;  %v1322_v19 = vsel %vm1311_vm3, %v1319_v28, %v1321_v42 }
  0xec   : > { %6619 = vmatpush3.bf16.msra.mxu0 %v7356_v13  ;;  %v8348_v13 = vld [vmem:[%s7519_s10 + $0x94] sm:$0xff]  }
  0xed   : > { %6620 = vmatprep.subr.bf16.mxu0 %v7362_v29  ;;  %v3747_v40 = vrot.slane %v8348_v13, 2 }
  0xee   : > { %6233 = vmatmul.mubr.bf16.gmra.mrb[40].mxu1 %v9181_v32  ;;  %v8369_v32 = vld [vmem:[%s7519_s10 + $0xac] sm:$0xff]  }
  0xef   : > { %6565 = vmatmul.mubr.bf16.gmra.mrb[12].mxu0 %v3732_v21  ;;  %6236 = vmatprep.mubr.bf16.mxu1 %v9182_v44  ;;  %v8361_v21 = vld [vmem:[%s7519_s10 + $0xa4] sm:$0xff]  }
  0xf0   : > { %6568 = vmatprep.mubr.bf16.mxu0 %v3734_v46  ;;  %6621 = vmatpush3.bf16.msra.mxu0 %v7362_v29  ;;  %v3748_v29 = vsel %vm3715_vm2, %v3745_v51, %v3747_v40  ;;  %v1318_v46 = vsel %vm1311_vm3, %v1315_v2, %v1317_v61  ;;  %v3751_v44 = vrot.slane %v8361_v21, 2  ;;  %v3761_v2 = vrot.slane %v8407_v12, 2 }
  0xf1   : > { %6622 = vmatprep.subr.bf16.mxu0 %v7368_v20 }
  0xf4   : > { %6623 = vmatpush3.bf16.msra.mxu0 %v7368_v20  ;;  %v3750_v20 = vsel %vm3715_vm2, %v3747_v40, %v3749_v25  ;;  %v7373_v40 = vld [vmem:[%s9102_s1 + $0xf0] sm:$0xff]  }
  0xf5   : > { %6680 = vmatprep.subr.bf16.mxu0 %v8313_v41 }
  0xf6   : > { %6237 = vmatmul.mubr.bf16.gmra.mrb[44].mxu1 %v9183_v33  ;;  %v8383_v33 = vld [vmem:[%s7519_s10 + $0xb4] sm:$0xff]  }
  0xf7   : > { %6569 = vmatmul.mubr.bf16.gmra.mrb[16].mxu0 %v3736_v37  ;;  %6240 = vmatprep.mubr.bf16.mxu1 %v8030_v36  ;;  %v3743_v36 = vrot.slane %v8331_v35, 2  ;;  %v3753_v37 = vrot.slane %v8369_v32, 2 }
  0xf8   : > { %6572 = vmatprep.mubr.bf16.mxu0 %v3738_v5  ;;  %v1320_v5 = vsel %vm1311_vm3, %v1317_v61, %v1319_v28  ;;  %v1333_v28 = vrot.slane %v8216_v62, 1 }
  0xf9   : > { %v3744_v17 = vsel %vm3715_vm2, %v3741_v60, %v3743_v36  ;;  %v3754_v34 = vsel %vm3715_vm2, %v3751_v44, %v3753_v37  ;;  %v7365_v60 = vld [vmem:[%s9102_s1 + $0xd8] sm:$0xff]  }
  0xfe   : > { %6241 = vmatmul.mubr.bf16.gmra.mrb[48].mxu1 %v8056_v38  ;;  %v1314_v38 = vsel %vm1311_vm3, %v1312_v39, %v1313_v30  ;;  %v1326_v30 = vsel %vm1311_vm3, %v1323_v9, %v1325_v11 }
  0xff   : > { %6573 = vmatmul.mubr.bf16.gmra.mrb[20].mxu0 %v3740_v6  ;;  %6244 = vmatprep.mubr.bf16.mxu1 %v8079_v8  ;;  %v3746_v8 = vsel %vm3715_vm2, %v3743_v36, %v3745_v51  ;;  %v3755_v6 = vrot.slane %v8383_v33, 2  ;;  %v1324_v36 = vsel %vm1311_vm3, %v1321_v42, %v1323_v9  ;;  %v8437_v42 = vld [vmem:[%s7519_s10 + $0xec] sm:$0xf] }
 0x100   : > { %6576 = vmatprep.mubr.bf16.mxu0 %v3742_v58  ;;  %v7369_v58 = vld [vmem:[%s9102_s1 + $0xe0] sm:$0xff]  }
 0x101   : > { %v3756_v39 = vsel %vm3715_vm2, %v3753_v37, %v3755_v6  ;;  %v3758_v51 = vsel %vm3715_vm2, %v3755_v6, %v3757_v18  ;;  %v9184_v6 = vld [vmem:[#allocation24_spill] sm:$0xff] }
 0x106   : > { %6245 = vmatmul.mubr.bf16.gmra.mrb[56].mxu1 %v5512_v0  ;;  %v7371_v0 = vld [vmem:[%s9102_s1 + $0xe8] sm:$0xff]  }
 0x107   : > { %6577 = vmatmul.mubr.bf16.gmra.mrb[24].mxu0 %v3744_v17  ;;  %6264 = vmatprep.mubr.bf16.mxu1 %v1314_v38  ;;  %v1327_v17 = vrot.slane %v8183_v48, 1  ;;  %v3759_v38 = vrot.slane %v8403_v3, 2  ;;  %v8423_v48 = vld [vmem:[%s7519_s10 + $0xd4] sm:$0xff]  }
 0x108   : > { %6580 = vmatprep.mubr.bf16.mxu0 %v3746_v8  ;;  %v1329_v8 = vrot.slane %v8197_v16, 1 }
 0x109   : > { %v1328_v61 = vsel %vm1311_vm3, %v1325_v11, %v1327_v17  ;;  %v3762_v16 = vsel %vm3715_vm2, %v3759_v38, %v3761_v2  ;;  %v9140_v11 = vrot.slane %v9184_v6, 3 }
 0x10e   : > { %6265 = vmatmul.mubr.bf16.vlgmr.msra.gmra.mrb[0].mxu1 %v1316_v59  ;;  %v1330_v59 = vsel %vm1311_vm3, %v1327_v17, %v1329_v8  ;;  %v4192_v17 = vshll.u32 %v8213_v50, 16 }
 0x10f   : > { %6581 = vmatmul.mubr.bf16.gmra.mrb[28].mxu0 %v3748_v29  ;;  %6321 = vmatpush3.bf16.msra.mxu1 %v8189_v27  ;;  %v3752_v27 = vsel %vm3715_vm2, %v3749_v25, %v3751_v44  ;;  %v3760_v25 = vsel %vm3715_vm2, %v3757_v18, %v3759_v38  ;;  %v8427_v29 = vld [vmem:[%s7519_s10 + $0xdc] sm:$0xff]   ;;  %v1337_v18 = vrot.slane %v8234_v31, 1 }
 0x110   : > { %6268 = vmatprep.mubr.bf16.mxu1 %v1318_v46  ;;  %6584 = vmatprep.mubr.bf16.mxu0 %v3750_v20  ;;  %v7375_v46 = vld [vmem:[%s9102_s1 + $0xf8] sm:$0xff]   ;;  %v1331_v20 = vrot.slane %v8201_v43, 1  ;;  %v3765_v44 = vrot.slane %v8427_v29, 2 }
 0x111   : > { %6322 = vmatprep.subr.bf16.mxu1 %v7353_v14 }
 0x112   : > { %v1332_v37 = vsel %vm1311_vm3, %v1329_v8, %v1331_v20  ;;  %v1334_v43 = vsel %vm1311_vm3, %v1331_v20, %v1333_v28  ;;  %v9186_v20 = vld [vmem:[#allocation26_spill] sm:$0xff] }
 0x113   : > { %6323 = vmatpush3.bf16.msra.mxu1 %v7353_v14  ;;  %v3763_v14 = vrot.slane %v8423_v48, 2 }
 0x114   : > { %6324 = vmatprep.subr.bf16.mxu1 %v7359_v23 }
 0x116   : > { %6269 = vmatmul.mubr.bf16.gmra.mrb[4].mxu1 %v1320_v5  ;;  %v8442_v5 = vld [vmem:[%s7519_s10 + $0xe4] sm:$0xff]  }
 0x117   : > { %6585 = vmatmul.mubr.bf16.gmra.mrb[32].mxu0 %v3752_v27  ;;  %6272 = vmatprep.mubr.bf16.mxu1 %v1322_v19  ;;  %v3764_v27 = vsel %vm3715_vm2, %v3761_v2, %v3763_v14  ;;  %v3766_v19 = vsel %vm3715_vm2, %v3763_v14, %v3765_v44  ;;  %v3767_v9 = vrot.slane %v8442_v5, 2  ;;  %v2001_v14 = vrot.slane %v9186_v20, 3 }
 0x118   : > { %6588 = vmatprep.mubr.bf16.mxu0 %v3754_v34  ;;  %6325 = vmatpush3.bf16.msra.mxu1 %v7359_v23  ;;  %v3557_v23 = vld [vmem:[%s7519_s10 + $0xf0] sm:$0x3]  ;;  %v8451_v34 = vld [vmem:[%s9102_s1 + $0x100] sm:$0xff]  }
 0x119   : > { %6326 = vmatprep.subr.bf16.mxu1 %v7365_v60  ;;  %v5718_v62 = vcombine.low %v8437_v42, %v3557_v23  ;;  %v3768_v38 = vsel %vm3715_vm2, %v3765_v44, %v3767_v9  ;;  %v4198_v44 = vshrl.u32 %v8227_v26, 16  ;;  %v4201_v23 = vshll.u32 %v8227_v26, 16 }
 0x11b   : > { %v4200_v26 = vrot.slane %v4198_v44, 2 }
 0x11c   : > { %6327 = vmatpush3.bf16.msra.mxu1 %v7365_v60  ;;  %v1335_v60 = vrot.slane %v8220_v22, 1 }
 0x11d   : > { %6328 = vmatprep.subr.bf16.mxu1 %v7369_v58 }
 0x11e   : > { %6273 = vmatmul.mubr.bf16.gmra.mrb[8].mxu1 %v1324_v36  ;;  %v4184_v36 = vshll.u32 %v8210_v1, 16  ;;  %v1336_v31 = vsel %vm1311_vm3, %v1333_v28, %v1335_v60 }
 0x11f   : > { %6589 = vmatmul.mubr.bf16.gmra.mrb[36].mxu0 %v3756_v39  ;;  %6276 = vmatprep.mubr.bf16.mxu1 %v1326_v30  ;;  %v9185_v39 = vld [vmem:[#allocation25_spill] sm:$0xff] }
 0x120   : > { %6592 = vmatprep.mubr.bf16.mxu0 %v3758_v51  ;;  %6329 = vmatpush3.bf16.msra.mxu1 %v7369_v58  ;;  %v4181_v58 = vshrl.u32 %v8210_v1, 16  ;;  %v1999_v30 = vrot.slane %v9185_v39, 3  ;;  %v3769_v51 = vrot.slane %v5718_v62, 2  ;;  %v1338_v1 = vsel %vm1311_vm3, %v1335_v60, %v1337_v18 }
 0x121   : > { %6330 = vmatprep.subr.bf16.mxu1 %v7371_v0  ;;  %v4186_v2 = vrot.slane %v4184_v36, 3  ;;  %v4210_v62 = vshll.u32 %v8231_v10, 16 }
 0x122   : > { %v8466_v22 = vsel %vm1967_vm4, %v9140_v11, %v1999_v30  ;;  %v4183_v8 = vrot.slane %v4181_v58, 2  ;;  %v8481_v60 = vsel %vm1967_vm4, %v1999_v30, %v2001_v14 }
 0x124   : > { %6331 = vmatpush3.bf16.msra.mxu1 %v7371_v0  ;;  %v4189_v0 = vshrl.u32 %v8213_v50, 16  ;;  %v7398_v50 = vld [vmem:[%s7519_s10 + $0x70] sm:$0xff]   ;;  %v4187_v28 = vor.u32 %v4186_v2, %v4183_v8  ;;  %v4219_v8 = vshll.u32 %v8242_v7, 16 }
 0x125   : > { %6332 = vmatprep.subr.bf16.mxu1 %v7373_v40  ;;  %v9188_v2 = vld [vmem:[#allocation28_spill] sm:$0xff] }
 0x126   : > { %6277 = vmatmul.mubr.bf16.gmra.mrb[12].mxu1 %v1328_v61  ;;  %v4191_v61 = vrot.slane %v4189_v0, 2  ;;  %v4203_v0 = vrot.slane %v4201_v23, 3 }
 0x127   : > { %6593 = vmatmul.mubr.bf16.gmra.mrb[40].mxu0 %v3760_v25  ;;  %6280 = vmatprep.mubr.bf16.mxu1 %v1330_v59  ;;  %v4194_v25 = vrot.slane %v4192_v17, 3  ;;  %v1339_v59 = vrot.slane %v7398_v50, 1  ;;  %v9189_v50 = vld [vmem:[#allocation30_spill] sm:$0xff] }
 0x128   : > { %6596 = vmatprep.mubr.bf16.mxu0 %v3762_v16  ;;  %6333 = vmatpush3.bf16.msra.mxu1 %v7373_v40  ;;  %v3770_v40 = vsel %vm3715_vm2, %v3767_v9, %v3769_v51  ;;  %v7399_v16 = vld [vmem:[%s7519_s10 + $0x78] sm:$0xff]  }
 0x129   : > { %6334 = vmatprep.subr.bf16.mxu1 %v7375_v46  ;;  %v1340_v58 = vsel %vm1311_vm3, %v1337_v18, %v1339_v59  ;;  %v2005_v18 = vrot.slane %v9188_v2, 3 }
 0x12c   : > { %6335 = vmatpush3.bf16.msra.mxu1 %v7375_v46  ;;  %v1341_v46 = vrot.slane %v7399_v16, 1 }
 0x12d   : > { %6752 = vmatprep.subr.bf16.mxu1 %v8451_v34 }
 0x12e   : > { %6281 = vmatmul.mubr.bf16.gmra.mrb[16].mxu1 %v1332_v37  ;;  %v9187_v37 = vld [vmem:[#allocation27_spill] sm:$0xff]  ;;  %v1342_v36 = vsel %vm1311_vm3, %v1339_v59, %v1341_v46  ;;  %v2007_v59 = vrot.slane %v9189_v50, 3 }
 0x12f   : > { %6597 = vmatmul.mubr.bf16.gmra.mrb[44].mxu0 %v3764_v27  ;;  %6284 = vmatprep.mubr.bf16.mxu1 %v1334_v43  ;;  %v2003_v27 = vrot.slane %v9187_v37, 3  ;;  %v4195_v43 = vor.u32 %v4194_v25, %v4191_v61  ;;  %v7401_v61 = vld [vmem:[%s7519_s10 + $0x88] sm:$0xff]  }
 0x130   : > { %6600 = vmatprep.mubr.bf16.mxu0 %v3766_v19  ;;  %v4207_v19 = vshrl.u32 %v8231_v10, 16  ;;  %v7400_v10 = vld [vmem:[%s7519_s10 + $0x80] sm:$0xff]   ;;  %v1345_v25 = vrot.slane %v7401_v61, 1  ;;  %v8501_v44 = vsel %vm1967_vm4, %v2005_v18, %v2007_v59  ;;  %v4243_v61 = vshrl.u32 %v8265_v15, 16 }
 0x131   : > { %v8484_v9 = vsel %vm1967_vm4, %v2001_v14, %v2003_v27  ;;  %v4196_v17 = vsel %vm4179_vm5, %v4187_v28, %v4195_v43  ;;  %v1343_v30 = vrot.slane %v7400_v10, 1  ;;  %v4225_v14 = vshrl.u32 %v8246_v47, 16 }
 0x132   : > { %v8498_v28 = vsel %vm1967_vm4, %v2003_v27, %v2005_v18  ;;  %v7402_v27 = vld [vmem:[%s7519_s10 + $0x90] sm:$0xff]  }
 0x136   : > { %6285 = vmatmul.mubr.bf16.gmra.mrb[20].mxu1 %v1336_v31  ;;  %v4209_v31 = vrot.slane %v4207_v19, 2  ;;  %v4221_v19 = vrot.slane %v4219_v8, 3  ;;  %v9191_v8 = vld [vmem:[#allocation32_spill] sm:$0xff] }
 0x137   : > { %6601 = vmatmul.mubr.bf16.gmra.mrb[48].mxu0 %v3768_v38  ;;  %6288 = vmatprep.mubr.bf16.mxu1 %v1338_v1  ;;  %v4212_v38 = vrot.slane %v4210_v62, 3  ;;  %v4216_v1 = vshrl.u32 %v8242_v7, 16  ;;  %v1344_v7 = vsel %vm1311_vm3, %v1341_v46, %v1343_v30  ;;  %v1347_v46 = vrot.slane %v7402_v27, 1 }
 0x138   : > { %6604 = vmatprep.mubr.bf16.mxu0 %v3770_v40  ;;  %v4204_v40 = vor.u32 %v4203_v0, %v4200_v26  ;;  %v4227_v26 = vrot.slane %v4225_v14, 2  ;;  %v2011_v18 = vrot.slane %v9191_v8, 3  ;;  %v4246_v14 = vshll.u32 %v8265_v15, 16 }
 0x139   : > { %v4213_v16 = vor.u32 %v4212_v38, %v4209_v31  ;;  %v4218_v23 = vrot.slane %v4216_v1, 2  ;;  %v9190_v31 = vld [vmem:[#allocation31_spill] sm:$0xff]  ;;  %v4237_v1 = vshll.u32 %v8261_v57, 16  ;;  %v4255_v27 = vshll.u32 %v8279_v52, 16 }
 0x13a   : > { %v4205_v62 = vsel %vm4179_vm5, %v4195_v43, %v4204_v40  ;;  %v2009_v38 = vrot.slane %v9190_v31, 3  ;;  %v7403_v43 = vld [vmem:[%s7519_s10 + $0x98] sm:$0xff]  }
 0x13b   : > { %v1349_v10 = vrot.slane %v7403_v43, 1 }
 0x13e   : > { %6289 = vmatmul.mubr.bf16.gmra.mrb[24].mxu1 %v1340_v58  ;;  %v1346_v58 = vsel %vm1311_vm3, %v1343_v30, %v1345_v25  ;;  %v4234_v30 = vshrl.u32 %v8261_v57, 16  ;;  %v1348_v57 = vsel %vm1311_vm3, %v1345_v25, %v1347_v46  ;;  %v7404_v25 = vld [vmem:[%s7519_s10 + $0xa0] sm:$0xff]  }
 0x13f   : > { %6605 = vmatmul.mubr.bf16.gmra.mrb[56].mxu0 %v3769_v51  ;;  %6292 = vmatprep.mubr.bf16.mxu1 %v1342_v36  ;;  %v4228_v51 = vshll.u32 %v8246_v47, 16  ;;  %v4214_v36 = vsel %vm4179_vm5, %v4204_v40, %v4213_v16  ;;  %v7372_v47 = vld [vmem:[%s9102_s1 + $0x208] sm:$0xff]  }
 0x140   : > { %6624 = vmatprep.mubr.bf16.mxu0 %v4196_v17  ;;  %v4222_v17 = vor.u32 %v4221_v19, %v4218_v23  ;;  %v1350_v19 = vsel %vm1311_vm3, %v1347_v46, %v1349_v10 }
 0x141   : > { %v4230_v0 = vrot.slane %v4228_v51, 3  ;;  %v7374_v51 = vld [vmem:[%s9102_s1 + $0x210] sm:$0xff]  }
 0x142   : > { %v4223_v23 = vsel %vm4179_vm5, %v4213_v16, %v4222_v17  ;;  %v1351_v16 = vrot.slane %v7404_v25, 1 }
 0x143   : > { %v4231_v40 = vor.u32 %v4230_v0, %v4227_v26  ;;  %v4248_v26 = vrot.slane %v4246_v14, 3  ;;  %v4252_v0 = vshrl.u32 %v8279_v52, 16  ;;  %v4261_v14 = vshrl.u32 %v8283_v4, 16 }
 0x145   : > { %v4232_v15 = vsel %vm4179_vm5, %v4222_v17, %v4231_v40 }
 0x146   : > { %6293 = vmatmul.mubr.bf16.gmra.mrb[28].mxu1 %v1344_v7  ;;  %v8526_v7 = vsel %vm1967_vm4, %v2009_v38, %v2011_v18 }
 0x147   : > { %6625 = vmatmul.mubr.bf16.vlgmr.msra.gmra.mrb[0].mxu0 %v4205_v62  ;;  %6296 = vmatprep.mubr.bf16.mxu1 %v1346_v58  ;;  %v4236_v62 = vrot.slane %v4234_v30, 2  ;;  %v4239_v58 = vrot.slane %v4237_v1, 3  ;;  %v9193_v30 = vld [vmem:[#allocation34_spill] sm:$0xff] }
 0x148   : > { %6628 = vmatprep.mubr.bf16.mxu0 %v4214_v36  ;;  %6681 = vmatpush3.bf16.msra.mxu0 %v8313_v41  ;;  %v8523_v41 = vsel %vm1967_vm4, %v2007_v59, %v2009_v38  ;;  %v4245_v36 = vrot.slane %v4243_v61, 2  ;;  %v7376_v59 = vld [vmem:[%s9102_s1 + $0x218] sm:$0xff]   ;;  %v7405_v38 = vld [vmem:[%s7519_s10 + $0xa8] sm:$0xff]   ;;  %v2015_v1 = vrot.slane %v9193_v30, 3 }
 0x149   : > { %6682 = vmatprep.subr.bf16.mxu0 %v7372_v47  ;;  %v4240_v17 = vor.u32 %v4239_v58, %v4236_v62  ;;  %v1353_v43 = vrot.slane %v7405_v38, 1  ;;  %v4254_v62 = vrot.slane %v4252_v0, 2  ;;  %v4257_v58 = vrot.slane %v4255_v27, 3 }
 0x14a   : > { %v4249_v61 = vor.u32 %v4248_v26, %v4245_v36  ;;  %v4263_v26 = vrot.slane %v4261_v14, 2  ;;  %v4279_v38 = vshrl.u32 %v8301_v53, 16  ;;  %v4282_v14 = vshll.u32 %v8301_v53, 16 }
 0x14b   : > { %v4258_v27 = vor.u32 %v4257_v58, %v4254_v62  ;;  %v9194_v58 = vld [vmem:[#allocation35_spill] sm:$0xff] }
 0x14c   : > { %6683 = vmatpush3.bf16.msra.mxu0 %v7372_v47  ;;  %v9192_v47 = vld [vmem:[#allocation33_spill] sm:$0xff]  ;;  %v4250_v36 = vsel %vm4179_vm5, %v4240_v17, %v4249_v61 }
 0x14d   : > { %6684 = vmatprep.subr.bf16.mxu0 %v7374_v51  ;;  %v2013_v46 = vrot.slane %v9192_v47, 3  ;;  %v4259_v62 = vsel %vm4179_vm5, %v4249_v61, %v4258_v27 }
 0x14e   : > { %6297 = vmatmul.mubr.bf16.gmra.mrb[32].mxu1 %v1348_v57  ;;  %v4264_v57 = vshll.u32 %v8283_v4, 16  ;;  %v1354_v4 = vsel %vm1311_vm3, %v1351_v16, %v1353_v43 }
 0x14f   : > { %6629 = vmatmul.mubr.bf16.gmra.mrb[4].mxu0 %v4223_v23  ;;  %6300 = vmatprep.mubr.bf16.mxu1 %v1350_v19  ;;  %v7377_v23 = vld [vmem:[%s9102_s1 + $0x220] sm:$0xff]   ;;  %v8547_v52 = vsel %vm1967_vm4, %v2011_v18, %v2013_v46  ;;  %v8550_v19 = vsel %vm1967_vm4, %v2013_v46, %v2015_v1  ;;  %v7378_v18 = vld [vmem:[%s9102_s1 + $0x228] sm:$0xff]  }
 0x150   : > { %6632 = vmatprep.mubr.bf16.mxu0 %v4232_v15  ;;  %6685 = vmatpush3.bf16.msra.mxu0 %v7374_v51  ;;  %v1352_v51 = vsel %vm1311_vm3, %v1349_v10, %v1351_v16  ;;  %v4241_v15 = vsel %vm4179_vm5, %v4231_v40, %v4240_v17  ;;  %v4266_v25 = vrot.slane %v4264_v57, 3  ;;  %v7406_v10 = vld [vmem:[%s7519_s10 + $0xb0] sm:$0xff]   ;;  %v7407_v40 = vld [vmem:[%s7519_s10 + $0xb8] sm:$0xff]   ;;  %v4273_v16 = vshll.u32 %v8297_v24, 16 }
 0x151   : > { %6686 = vmatprep.subr.bf16.mxu0 %v7376_v59  ;;  %v1355_v0 = vrot.slane %v7406_v10, 1  ;;  %v1357_v46 = vrot.slane %v7407_v40, 1  ;;  %v7379_v57 = vld [vmem:[%s9102_s1 + $0x230] sm:$0xff]   ;;  %v4284_v10 = vrot.slane %v4282_v14, 3  ;;  %v4288_v14 = vshrl.u32 %v8317_v54, 16 }
 0x152   : > { %v4267_v17 = vor.u32 %v4266_v25, %v4263_v26  ;;  %v4281_v25 = vrot.slane %v4279_v38, 2 }
 0x154   : > { %6687 = vmatpush3.bf16.msra.mxu0 %v7376_v59  ;;  %v4270_v59 = vshrl.u32 %v8297_v24, 16  ;;  %v4268_v53 = vsel %vm4179_vm5, %v4258_v27, %v4267_v17  ;;  %v7408_v27 = vld [vmem:[%s7519_s10 + $0xc0] sm:$0xff]   ;;  %v4285_v11 = vor.u32 %v4284_v10, %v4281_v25  ;;  %v4309_v10 = vshll.u32 %v8331_v35, 16 }
 0x155   : > { %6688 = vmatprep.subr.bf16.mxu0 %v7377_v23  ;;  %v1359_v40 = vrot.slane %v7408_v27, 1 }
 0x156   : > { %6301 = vmatmul.mubr.bf16.gmra.mrb[36].mxu1 %v1352_v51  ;;  %v1356_v51 = vsel %vm1311_vm3, %v1353_v43, %v1355_v0  ;;  %v4272_v24 = vrot.slane %v4270_v59, 2  ;;  %v7380_v43 = vld [vmem:[%s9102_s1 + $0x238] sm:$0xff]  }
 0x157   : > { %6633 = vmatmul.mubr.bf16.gmra.mrb[8].mxu0 %v4241_v15  ;;  %6304 = vmatprep.mubr.bf16.mxu1 %v1354_v4  ;;  %v2017_v15 = vrot.slane %v9194_v58, 3  ;;  %v1358_v4 = vsel %vm1311_vm3, %v1355_v0, %v1357_v46  ;;  %v2576_v0 = vshrl.u32 %v9185_v39, 16 }
 0x158   : > { %6636 = vmatprep.mubr.bf16.mxu0 %v4250_v36  ;;  %6689 = vmatpush3.bf16.msra.mxu0 %v7377_v23  ;;  %v4275_v23 = vrot.slane %v4273_v16, 3  ;;  %v9195_v36 = vld [vmem:[#allocation36_spill] sm:$0xff]  ;;  %v7409_v16 = vld [vmem:[%s7519_s10 + $0xc8] sm:$0xff]  }
 0x159   : > { %6690 = vmatprep.subr.bf16.mxu0 %v7378_v18  ;;  %v9141_v26 = vrot.slane %v9195_v36, 3  ;;  %v8578_v61 = vsel %vm1967_vm4, %v2015_v1, %v2017_v15  ;;  %v1361_v38 = vrot.slane %v7409_v16, 1  ;;  %v4291_v1 = vshll.u32 %v8317_v54, 16 }
 0x15a   : > { %v4276_v59 = vor.u32 %v4275_v23, %v4272_v24  ;;  %v1365_v16 = vrot.slane %v8086_v63, 1 }
 0x15b   : > { %v1362_v23 = vsel %vm1311_vm3, %v1359_v40, %v1361_v38  ;;  %v4293_v27 = vrot.slane %v4291_v1, 3 }
 0x15c   : > { %6691 = vmatpush3.bf16.msra.mxu0 %v7378_v18  ;;  %v8583_v18 = vsel %vm1967_vm4, %v2017_v15, %v9141_v26  ;;  %v4297_v15 = vshrl.u32 %v8321_v55, 16  ;;  %v4300_v26 = vshll.u32 %v8321_v55, 16  ;;  %v4277_v24 = vsel %vm4179_vm5, %v4267_v17, %v4276_v59 }
 0x15d   : > { %6692 = vmatprep.subr.bf16.mxu0 %v7379_v57  ;;  %9196 = vst [vmem:[#allocation18_spill] sm:$0xff] %v8583_v18  ;;  %v4306_v55 = vshrl.u32 %v8331_v35, 16  ;;  %v2567_v17 = vshrl.u32 %v9184_v6, 16 }
 0x15e   : > { %6305 = vmatmul.mubr.bf16.gmra.mrb[40].mxu1 %v1356_v51  ;;  %v2579_v51 = vshll.u32 %v9185_v39, 16  ;;  %v4286_v39 = vsel %vm4179_vm5, %v4276_v59, %v4285_v11  ;;  %v4302_v25 = vrot.slane %v4300_v26, 3  ;;  %v4315_v59 = vshrl.u32 %v8336_v45, 16 }
 0x15f   : > { %6637 = vmatmul.mubr.bf16.gmra.mrb[12].mxu0 %v4259_v62  ;;  %6308 = vmatprep.mubr.bf16.mxu1 %v1358_v4  ;;  %v2578_v62 = vrot.slane %v2576_v0, 3  ;;  %v1360_v4 = vsel %vm1311_vm3, %v1357_v46, %v1359_v40  ;;  %v7410_v46 = vld [vmem:[%s7519_s10 + $0xd0] sm:$0xff]   ;;  %v2570_v40 = vshll.u32 %v9184_v6, 16  ;;  %v4318_v26 = vshll.u32 %v8336_v45, 16 }
 0x160   : > { %6640 = vmatprep.mubr.bf16.mxu0 %v4268_v53  ;;  %6693 = vmatpush3.bf16.msra.mxu0 %v7379_v57  ;;  %v4290_v53 = vrot.slane %v4288_v14, 2  ;;  %v2581_v54 = vrot.slane %v2579_v51, 4  ;;  %v4299_v57 = vrot.slane %v4297_v15, 2  ;;  %v1363_v0 = vrot.slane %v7410_v46, 1 }
 0x161   : > { %6694 = vmatprep.subr.bf16.mxu0 %v7380_v43  ;;  %v2569_v35 = vrot.slane %v2567_v17, 3  ;;  %v2572_v51 = vrot.slane %v2570_v40, 4  ;;  %v4317_v18 = vrot.slane %v4315_v59, 2  ;;  %v2588_v17 = vshll.u32 %v9186_v20, 16  ;;  %v9199_v40 = vld [vmem:[#allocation3_spill] sm:$0xff] }
 0x162   : > { %v4303_v1 = vor.u32 %v4302_v25, %v4299_v57  ;;  %v2582_v15 = vor.u32 %v2581_v54, %v2578_v62  ;;  %v1366_v45 = vsel %vm1311_vm3, %v1363_v0, %v1365_v16  ;;  %v4320_v57 = vrot.slane %v4318_v26, 3 }
 0x163   : > { %v2594_v26 = vshrl.u32 %v9187_v37, 16 }
 0x164   : > { %6695 = vmatpush3.bf16.msra.mxu0 %v7380_v43  ;;  %v4294_v43 = vor.u32 %v4293_v27, %v4290_v53  ;;  %v8610_v53 = vor.u32 %v2572_v51, %v2569_v35  ;;  %v4321_v59 = vor.u32 %v4320_v57, %v4317_v18  ;;  %v2597_v35 = vshll.u32 %v9187_v37, 16 }
 0x165   : > { %v4333_v51 = vshrl.u32 %v8352_v49, 16 }
 0x166   : > { %6309 = vmatmul.mubr.bf16.gmra.mrb[44].mxu1 %v1360_v4  ;;  %v4295_v27 = vsel %vm4179_vm5, %v4285_v11, %v4294_v43  ;;  %v4304_v25 = vsel %vm4179_vm5, %v4294_v43, %v4303_v1  ;;  %v8619_v62 = vsel %vm2431_vm1, %v8610_v53, %v2582_v15  ;;  %v4327_v11 = vshll.u32 %v8348_v13, 16 }
 0x167   : > { %6641 = vmatmul.mubr.bf16.gmra.mrb[16].mxu0 %v4277_v24  ;;  %6312 = vmatprep.mubr.bf16.mxu1 %v1362_v23  ;;  %v4308_v24 = vrot.slane %v4306_v55, 2  ;;  %v4311_v23 = vrot.slane %v4309_v10, 3  ;;  %9197 = vst [vmem:[#allocation19_spill] sm:$0xff] %v8619_v62  ;;  %v9198_v55 = vld [vmem:[#allocation2_spill] sm:$0xff]  ;;  %v4324_v10 = vshrl.u32 %v8348_v13, 16  ;;  %v1969_v43 = vrot.slane %v9199_v40, 3 }
 0x168   : > { %6644 = vmatprep.mubr.bf16.mxu0 %v4286_v39  ;;  %v1364_v39 = vsel %vm1311_vm3, %v1361_v38, %v1363_v0  ;;  %v1968_v38 = vrot.slane %v9198_v55, 3  ;;  %v2585_v0 = vshrl.u32 %v9186_v20, 16  ;;  %v2599_v13 = vrot.slane %v2597_v35, 4  ;;  %v9201_v35 = vld [vmem:[#allocation5_spill] sm:$0xff] }
 0x169   : > { %v8605_v14 = vpop.f32.mrb[52].mxu1  ;;  %v4312_v54 = vor.u32 %v4311_v23, %v4308_v24  ;;  %v4336_v24 = vshll.u32 %v8352_v49, 16  ;;  %v4335_v40 = vrot.slane %v4333_v51, 2  ;;  %v4342_v49 = vshrl.u32 %v8361_v21, 16 }
 0x16a   : > { %v8607_v4 = vpop.f32.mrb[53].mxu1  ;;  %v2587_v23 = vrot.slane %v2585_v0, 3  ;;  %v4345_v0 = vshll.u32 %v8361_v21, 16  ;;  %v2615_v21 = vshll.u32 %v9189_v50, 16  ;;  %v1973_v51 = vrot.slane %v9201_v35, 3 }
 0x16b   : > { %v6175_v46 = vpop.f32.mrb[54].mxu1  ;;  %v4313_v20 = vsel %vm4179_vm5, %v4303_v1, %v4312_v54  ;;  %v4322_v57 = vsel %vm4179_vm5, %v4312_v54, %v4321_v59  ;;  %v4338_v37 = vrot.slane %v4336_v24, 3  ;;  %v9200_v1 = vld [vmem:[#allocation4_spill] sm:$0xff]  ;;  %v2603_v54 = vshrl.u32 %v9188_v2, 16 }
 0x16c   : > { %v8612_v63 = vpop.f32.mrb[55].mxu1  ;;  %v2590_v46 = vrot.slane %v2588_v17, 4  ;;  %v2606_v17 = vshll.u32 %v9188_v2, 16 }
 0x16d   : > { %v4339_v24 = vor.u32 %v4338_v37, %v4335_v40  ;;  %v9202_v37 = vld [vmem:[#allocation6_spill] sm:$0xff] }
 0x16e   : > { %6313 = vmatmul.mubr.bf16.gmra.mrb[48].mxu1 %v1364_v39  ;;  %v2596_v39 = vrot.slane %v2594_v26, 3  ;;  %v2591_v55 = vor.u32 %v2590_v46, %v2587_v23  ;;  %v2612_v26 = vshrl.u32 %v9189_v50, 16  ;;  %v2605_v23 = vrot.slane %v2603_v54, 3 }
 0x16f   : > { %6645 = vmatmul.mubr.bf16.gmra.mrb[20].mxu0 %v4295_v27  ;;  %6316 = vmatprep.mubr.bf16.mxu1 %v1366_v45  ;;  %v4326_v27 = vrot.slane %v4324_v10, 2  ;;  %v4329_v45 = vrot.slane %v4327_v11, 3  ;;  %v2608_v46 = vrot.slane %v2606_v17, 4 }
 0x170   : > { %6648 = vmatprep.mubr.bf16.mxu0 %v4304_v25  ;;  %v1970_v25 = vsel %vm1967_vm4, %v1968_v38, %v1969_v43  ;;  %v2600_v18 = vor.u32 %v2599_v13, %v2596_v39  ;;  %v8635_v62 = vsel %vm2431_vm1, %v2582_v15, %v2591_v55  ;;  %v1971_v38 = vrot.slane %v9200_v1, 3 }
 0x171   : > { %v4330_v11 = vor.u32 %v4329_v45, %v4326_v27  ;;  %v4351_v15 = vshrl.u32 %v8369_v32, 16  ;;  %v4344_v39 = vrot.slane %v4342_v49, 2  ;;  %v4347_v13 = vrot.slane %v4345_v0, 3 }
 0x172   : > { %v8640_v10 = vsel %vm2431_vm1, %v2591_v55, %v2600_v18  ;;  %v2614_v27 = vrot.slane %v2612_v26, 3  ;;  %v2617_v45 = vrot.slane %v2615_v21, 4  ;;  %v1972_v2 = vsel %vm1967_vm4, %v1969_v43, %v1971_v38 }
 0x173   : > { %v2609_v55 = vor.u32 %v2608_v46, %v2605_v23  ;;  %v1974_v1 = vsel %vm1967_vm4, %v1971_v38, %v1973_v51  ;;  %v4340_v50 = vsel %vm4179_vm5, %v4330_v11, %v4339_v24  ;;  %v1975_v49 = vrot.slane %v9202_v37, 3 }
 0x174   : > { %v4348_v0 = vor.u32 %v4347_v13, %v4344_v39  ;;  %v4360_v43 = vshrl.u32 %v8383_v33, 16  ;;  %v2621_v38 = vshrl.u32 %v9190_v31, 16  ;;  %v2633_v26 = vshll.u32 %v9191_v8, 16 }
 0x175   : > { %v8655_v40 = vsel %vm2431_vm1, %v2600_v18, %v2609_v55  ;;  %v9203_v18 = vld [vmem:[#allocation7_spill] sm:$0xff]  ;;  %v4372_v21 = vshll.u32 %v8387_v56, 16  ;;  %v1976_v39 = vsel %vm1967_vm4, %v1973_v51, %v1975_v49  ;;  %v4381_v37 = vshll.u32 %v8403_v3, 16 }
 0x176   : > { %6317 = vmatmul.mubr.bf16.gmra.mrb[60].mxu1 %v1365_v16  ;;  %v4354_v16 = vshll.u32 %v8369_v32, 16  ;;  %v1977_v17 = vrot.slane %v9203_v18, 3  ;;  %v2623_v35 = vrot.slane %v2621_v38, 3  ;;  %v2635_v46 = vrot.slane %v2633_v26, 4 }
 0x177   : > { %6649 = vmatmul.mubr.bf16.gmra.mrb[24].mxu0 %v4313_v20  ;;  %6336 = vmatprep.mubr.bf16.mxu1 %v1970_v25  ;;  %v4331_v20 = vsel %vm4179_vm5, %v4321_v59, %v4330_v11  ;;  %v4353_v25 = vrot.slane %v4351_v15, 2  ;;  %v4363_v59 = vshll.u32 %v8383_v33, 16  ;;  %v2624_v11 = vshll.u32 %v9190_v31, 16 }
 0x178   : > { %6652 = vmatprep.mubr.bf16.mxu0 %v4322_v57  ;;  %v4356_v32 = vrot.slane %v4354_v16, 3  ;;  %v2618_v57 = vor.u32 %v2617_v45, %v2614_v27  ;;  %v2630_v16 = vshrl.u32 %v9191_v8, 16  ;;  %v4369_v33 = vshrl.u32 %v8387_v56, 16 }
 0x179   : > { %v2626_v31 = vrot.slane %v2624_v11, 4  ;;  %v4362_v13 = vrot.slane %v4360_v43, 2  ;;  %v4365_v27 = vrot.slane %v4363_v59, 3  ;;  %v4349_v8 = vsel %vm4179_vm5, %v4339_v24, %v4348_v0  ;;  %v9205_v59 = vld [vmem:[#allocation9_spill] sm:$0xff] }
 0x17a   : > { %v8659_v54 = vsel %vm2431_vm1, %v2609_v55, %v2618_v57  ;;  %v4357_v15 = vor.u32 %v4356_v32, %v4353_v25  ;;  %v2632_v23 = vrot.slane %v2630_v16, 3  ;;  %v7412_v55 = vld [vmem:[%s9102_s1 + $0x110] sm:$0xff]   ;;  %v4371_v25 = vrot.slane %v4369_v33, 2 }
 0x17b   : > { %v2627_v45 = vor.u32 %v2626_v31, %v2623_v35  ;;  %v4374_v32 = vrot.slane %v4372_v21, 3  ;;  %v4378_v24 = vshrl.u32 %v8403_v3, 16  ;;  %v4366_v43 = vor.u32 %v4365_v27, %v4362_v13 }
 0x17c   : > { %v2636_v56 = vor.u32 %v2635_v46, %v2632_v23  ;;  %v2639_v38 = vshrl.u32 %v9192_v47, 16  ;;  %v4387_v11 = vshrl.u32 %v8407_v12, 16  ;;  %v4390_v18 = vshll.u32 %v8407_v12, 16 }
 0x17d   : > { %v8682_v51 = vsel %vm2431_vm1, %v2618_v57, %v2627_v45  ;;  %v2642_v57 = vshll.u32 %v9192_v47, 16  ;;  %v2648_v3 = vshrl.u32 %v9193_v30, 16  ;;  %v2651_v16 = vshll.u32 %v9193_v30, 16 }
 0x17e   : > { %6337 = vmatmul.mubr.bf16.vlgmr.msra.gmra.mrb[0].mxu1 %v1972_v2  ;;  %v1978_v2 = vsel %vm1967_vm4, %v1975_v49, %v1977_v17  ;;  %v8688_v49 = vsel %vm2431_vm1, %v2627_v45, %v2636_v56  ;;  %v4375_v26 = vor.u32 %v4374_v32, %v4371_v25  ;;  %v2641_v33 = vrot.slane %v2639_v38, 3  ;;  %v9206_v25 = vld [vmem:[#allocation10_spill] sm:$0xff]  ;;  %v4158_v38 = vld [vmem:[%s7519_s10 + $0xf0] sm:$0x7] }
 0x17f   : > { %6653 = vmatmul.mubr.bf16.gmra.mrb[28].mxu0 %v4331_v20  ;;  %6760 = vmatpush3.bf16.msra.mxu1 %v8451_v34  ;;  %v7411_v34 = vld [vmem:[%s9102_s1 + $0x108] sm:$0xff]   ;;  %v4358_v20 = vsel %vm4179_vm5, %v4348_v0, %v4357_v15  ;;  %v1981_v0 = vrot.slane %v9205_v59, 3  ;;  %v2644_v21 = vrot.slane %v2642_v57, 4  ;;  %v4380_v35 = vrot.slane %v4378_v24, 2 }
 0x180   : > { %6340 = vmatprep.mubr.bf16.mxu1 %v1974_v1  ;;  %6656 = vmatprep.mubr.bf16.mxu0 %v4340_v50  ;;  %v9204_v1 = vld [vmem:[#allocation8_spill] sm:$0xff]  ;;  %v4383_v47 = vrot.slane %v4381_v37, 3  ;;  %v2650_v31 = vrot.slane %v2648_v3, 3  ;;  %v2653_v23 = vrot.slane %v2651_v16, 4  ;;  %v4367_v46 = vsel %vm4179_vm5, %v4357_v15, %v4366_v43  ;;  %v7416_v15 = vld [vmem:[%s7519_s10 + $0xe4] sm:$0xf] }
 0x181   : > { %6753 = vmatprep.subr.bf16.mxu1 %v7411_v34  ;;  %v1979_v50 = vrot.slane %v9204_v1, 3  ;;  %v4389_v13 = vrot.slane %v4387_v11, 2  ;;  %v4392_v27 = vrot.slane %v4390_v18, 3  ;;  %v1983_v32 = vrot.slane %v9206_v25, 3  ;;  %v9207_v24 = vld [vmem:[#allocation11_spill] sm:$0xff] }
 0x182   : > { %v2654_v45 = vor.u32 %v2653_v23, %v2650_v31  ;;  %v4384_v1 = vor.u32 %v4383_v47, %v4380_v35  ;;  %v1985_v37 = vrot.slane %v9207_v24, 3  ;;  %v2660_v59 = vshll.u32 %v9194_v58, 16 }
 0x183   : > { %6761 = vmatpush3.bf16.msra.mxu1 %v7411_v34  ;;  %v7413_v34 = vld [vmem:[%s9102_s1 + $0x118] sm:$0xff]   ;;  %v1980_v12 = vsel %vm1967_vm4, %v1977_v17, %v1979_v50  ;;  %v1982_v30 = vsel %vm1967_vm4, %v1979_v50, %v1981_v0  ;;  %v8711_v17 = vld [vmem:[%s7519_s10 + $0xe0] sm:$0xf]  ;;  %v4393_v57 = vor.u32 %v4392_v27, %v4389_v13  ;;  %v4399_v11 = vshll.u32 %v8423_v48, 16 }
 0x184   : > { %6754 = vmatprep.subr.bf16.mxu1 %v7412_v55  ;;  %v2666_v18 = vshrl.u32 %v9195_v36, 16  ;;  %v2669_v3 = vshll.u32 %v9195_v36, 16  ;;  %v4405_v16 = vshrl.u32 %v8427_v29, 16  ;;  %v8733_v23 = vcombine.low %v8437_v42, %v4158_v38  ;;  %v7418_v42 = vld [vmem:[%s9102_s1 + $0x130] sm:$0xff]  }
 0x185   : > { %v4401_v13 = vrot.slane %v4399_v11, 3  ;;  %v4417_v38 = vshll.u32 %v8442_v5, 16 }
 0x186   : > { %6341 = vmatmul.mubr.bf16.gmra.mrb[4].mxu1 %v1976_v39  ;;  %v2645_v39 = vor.u32 %v2644_v21, %v2641_v33  ;;  %v7417_v33 = vld [vmem:[%s9102_s1 + $0x128] sm:$0xff]   ;;  %v2662_v21 = vrot.slane %v2660_v59, 4  ;;  %v2668_v31 = vrot.slane %v2666_v18, 3  ;;  %v4414_v59 = vshrl.u32 %v8442_v5, 16 }
 0x187   : > { %6657 = vmatmul.mubr.bf16.gmra.mrb[32].mxu0 %v4349_v8  ;;  %6344 = vmatprep.mubr.bf16.mxu1 %v1978_v2  ;;  %v4376_v8 = vsel %vm4179_vm5, %v4366_v43, %v4375_v26  ;;  %v7414_v2 = vld [vmem:[%s9102_s1 + $0x120] sm:$0xff]   ;;  %v4396_v43 = vshrl.u32 %v8423_v48, 16  ;;  %v2671_v48 = vrot.slane %v2669_v3, 4  ;;  %v4423_v11 = vshrl.u32 %v8733_v23, 16  ;;  %v7419_v3 = vld [vmem:[%s9102_s1 + $0x138] sm:$0xff]  }
 0x188   : > { %6660 = vmatprep.mubr.bf16.mxu0 %v4358_v20  ;;  %6762 = vmatpush3.bf16.msra.mxu1 %v7412_v55  ;;  %v8708_v55 = vsel %vm2431_vm1, %v2636_v56, %v2645_v39  ;;  %v5614_v20 = vcombine.low %v8711_v17, %v7416_v15  ;;  %v8717_v50 = vsel %vm2431_vm1, %v2645_v39, %v2654_v45  ;;  %v2657_v56 = vshrl.u32 %v9194_v58, 16 }
 0x189   : > { %6755 = vmatprep.subr.bf16.mxu1 %v7413_v34  ;;  %v2672_v27 = vor.u32 %v2671_v48, %v2668_v31  ;;  %v4426_v18 = vshll.u32 %v8733_v23, 16  ;;  %v4425_v31 = vrot.slane %v4423_v11, 2  ;;  %v9213_v11 = vrot.slane %v9184_v6, 3  ;;  %v7424_v6 = vld [vmem:[%s7519_s10 + $0x34] sm:$0xff]  }
 0x18a   : > { %v2659_v58 = vrot.slane %v2657_v56, 3  ;;  %v2675_v35 = vshrl.u32 %v5614_v20, 16  ;;  %v2678_v47 = vshll.u32 %v5614_v20, 16  ;;  %v9208_v20 = vld [vmem:[#allocation12_spill] sm:$0xff] }
 0x18b   : > { %v1987_v25 = vrot.slane %v9208_v20, 3  ;;  %v4428_v48 = vrot.slane %v4426_v18, 3 }
 0x18c   : > { %6763 = vmatpush3.bf16.msra.mxu1 %v7413_v34  ;;  %v4408_v34 = vshll.u32 %v8427_v29, 16  ;;  %v2663_v39 = vor.u32 %v2662_v21, %v2659_v58  ;;  %v1986_v29 = vsel %vm1967_vm4, %v1983_v32, %v1985_v37  ;;  %v4416_v21 = vrot.slane %v4414_v59, 2  ;;  %v7421_v59 = vld [vmem:[%s7519_s10 + $0x1c] sm:$0xff]  }
 0x18d   : > { %6756 = vmatprep.subr.bf16.mxu1 %v7414_v2 }
 0x18e   : > { %6345 = vmatmul.mubr.bf16.gmra.mrb[8].mxu1 %v1980_v12  ;;  %v1984_v12 = vsel %vm1967_vm4, %v1981_v0, %v1983_v32  ;;  %v4410_v15 = vrot.slane %v4408_v34, 3  ;;  %v8743_v0 = vsel %vm2431_vm1, %v2654_v45, %v2663_v39  ;;  %v2677_v32 = vrot.slane %v2675_v35, 3 }
 0x18f   : > { %6661 = vmatmul.mubr.bf16.gmra.mrb[36].mxu0 %v4367_v46  ;;  %6348 = vmatprep.mubr.bf16.mxu1 %v1982_v30  ;;  %v4385_v46 = vsel %vm4179_vm5, %v4375_v26, %v4384_v1  ;;  %v4398_v30 = vrot.slane %v4396_v43, 2  ;;  %v8746_v26 = vsel %vm2431_vm1, %v2663_v39, %v2672_v27  ;;  %v9209_v43 = vld [vmem:[#allocation13_spill] sm:$0xff]  ;;  %v1988_v34 = vsel %vm1967_vm4, %v1985_v37, %v1987_v25  ;;  %v9210_v37 = vld [vmem:[#allocation14_spill] sm:$0xff]  ;;  %v9211_v39 = vld [vmem:[#allocation15_spill] sm:$0xff] }
 0x190   : > { %6664 = vmatprep.mubr.bf16.mxu0 %v4376_v8  ;;  %6764 = vmatpush3.bf16.msra.mxu1 %v7414_v2  ;;  %v4394_v8 = vsel %vm4179_vm5, %v4384_v1, %v4393_v57  ;;  %v4407_v2 = vrot.slane %v4405_v16, 2  ;;  %v2680_v1 = vrot.slane %v2678_v47, 4  ;;  %v1989_v56 = vrot.slane %v9209_v43, 3 }
 0x191   : > { %6757 = vmatprep.subr.bf16.mxu1 %v7417_v33  ;;  %v4402_v24 = vor.u32 %v4401_v13, %v4398_v30  ;;  %v4419_v35 = vrot.slane %v4417_v38, 3  ;;  %v4818_v13 = vld [vmem:[%s7519_s10 + $0x14] sm:$0x8]  ;;  %v4840_v38 = vrot.slane %v7421_v59, 3 }
 0x192   : > { %v4411_v45 = vor.u32 %v4410_v15, %v4407_v2  ;;  %v8757_v16 = vor.u32 %v2680_v1, %v2677_v32  ;;  %v1990_v58 = vsel %vm1967_vm4, %v1987_v25, %v1989_v56  ;;  %v7420_v32 = vld [vmem:[%s7519_s10 + $0x18] sm:$0xf] }
 0x193   : > { %v4403_v5 = vsel %vm4179_vm5, %v4393_v57, %v4402_v24  ;;  %v1993_v57 = vrot.slane %v9211_v39, 3  ;;  %v5768_v1 = vcombine.low %v4818_v13, %v7420_v32 }
 0x194   : > { %6765 = vmatpush3.bf16.msra.mxu1 %v7417_v33  ;;  %v8762_v33 = vsel %vm2431_vm1, %v2672_v27, %v8757_v16  ;;  %v4412_v47 = vsel %vm4179_vm5, %v4402_v24, %v4411_v45  ;;  %v9212_v24 = vld [vmem:[#allocation16_spill] sm:$0xff] }
 0x195   : > { %6758 = vmatprep.subr.bf16.mxu1 %v7418_v42  ;;  %v1995_v43 = vrot.slane %v9212_v24, 3 }
 0x196   : > { %6349 = vmatmul.mubr.bf16.gmra.mrb[12].mxu1 %v1984_v12  ;;  %v1991_v12 = vrot.slane %v9210_v37, 3 }
 0x197   : > { %6665 = vmatmul.mubr.bf16.gmra.mrb[40].mxu0 %v4385_v46  ;;  %6352 = vmatprep.mubr.bf16.mxu1 %v1986_v29  ;;  %v4420_v46 = vor.u32 %v4419_v35, %v4416_v21  ;;  %v4429_v29 = vor.u32 %v4428_v48, %v4425_v31  ;;  %v1998_v18 = vsel %vm1967_vm4, %v1995_v43, %v9213_v11  ;;  %v4846_v31 = vrot.slane %v7424_v6, 3  ;;  %v7425_v48 = vld [vmem:[%s7519_s10 + $0x3c] sm:$0xff]   ;;  %v7435_v6 = vld [vmem:[%s7519_s10 + $0x8c] sm:$0xff]  }
 0x198   : > { %6668 = vmatprep.mubr.bf16.mxu0 %v4394_v8  ;;  %6766 = vmatpush3.bf16.msra.mxu1 %v7418_v42  ;;  %v1992_v27 = vsel %vm1967_vm4, %v1989_v56, %v1991_v12  ;;  %v1994_v42 = vsel %vm1967_vm4, %v1991_v12, %v1993_v57  ;;  %v4839_v56 = vrot.slane %v5768_v1, 3  ;;  %v4848_v37 = vrot.slane %v7425_v48, 3  ;;  %v1809_v1 = vld [vmem:[%s7519_s10 + $0xe4] sm:$0x7]  ;;  %v9216_v48 = vld [vmem:[#allocation17_spill] sm:$0xff] }
 0x199   : > { %6759 = vmatprep.subr.bf16.mxu1 %v7419_v3  ;;  %v4421_v2 = vsel %vm4179_vm5, %v4411_v45, %v4420_v46  ;;  %v4430_v25 = vsel %vm4179_vm5, %v4420_v46, %v4429_v29  ;;  %v1996_v45 = vsel %vm1967_vm4, %v1993_v57, %v1995_v43  ;;  %v5589_v43 = vcombine.low %v8711_v17, %v1809_v1 }
 0x19a   : > { %v4849_v46 = vsel %vm1967_vm4, %v4846_v31, %v4848_v37 }
 0x19b   : > { %v2021_v59 = vrot.slane %v5589_v43, 3 }
 0x19c   : > { %6767 = vmatpush3.bf16.msra.mxu1 %v7419_v3  ;;  %v4841_v3 = vsel %vm1967_vm4, %v4839_v56, %v4840_v38 }
 0x19e   : > { %6353 = vmatmul.mubr.bf16.gmra.mrb[16].mxu1 %v1988_v34  ;;  %v7422_v34 = vld [vmem:[%s7519_s10 + $0x24] sm:$0xff]  }
 0x19f   : > { %6669 = vmatmul.mubr.bf16.gmra.mrb[44].mxu0 %v4403_v5  ;;  %6356 = vmatprep.mubr.bf16.mxu1 %v1990_v58  ;;  %v4842_v5 = vrot.slane %v7422_v34, 3  ;;  %v7423_v58 = vld [vmem:[%s7519_s10 + $0x2c] sm:$0xff]  }
 0x1a0   : > { %6672 = vmatprep.mubr.bf16.mxu0 %v4412_v47  ;;  %v4844_v21 = vrot.slane %v7423_v58, 3 }
 0x1a1   : > { %v4843_v35 = vsel %vm1967_vm4, %v4840_v38, %v4842_v5 }
 0x1a2   : > { %v8769_v30 = vpop.f32.mrb[52].mxu0  ;;  %v4845_v47 = vsel %vm1967_vm4, %v4842_v5, %v4844_v21  ;;  %v4847_v12 = vsel %vm1967_vm4, %v4844_v21, %v4846_v31  ;;  %v9214_v5 = vrot.slane %v9195_v36, 3  ;;  %v4868_v31 = vrot.slane %v7435_v6, 3 }
 0x1a3   : > { %v8773_v8 = vpop.f32.mrb[53].mxu0 }
 0x1a4   : > { %v6535_v15 = vpop.f32.mrb[54].mxu0  ;;  %v2022_v58 = vsel %vm1967_vm4, %v9214_v5, %v2021_v59 }
 0x1a5   : > { %v8777_v20 = vpop.f32.mrb[55].mxu0 }
 0x1a6   : > { %6357 = vmatmul.mubr.bf16.gmra.mrb[20].mxu1 %v1992_v27  ;;  %v7429_v27 = vld [vmem:[%s7519_s10 + $0x5c] sm:$0xff]  }
 0x1a7   : > { %6673 = vmatmul.mubr.bf16.gmra.mrb[48].mxu0 %v4421_v2  ;;  %6360 = vmatprep.mubr.bf16.mxu1 %v1994_v42  ;;  %v4856_v2 = vrot.slane %v7429_v27, 3 }
 0x1a8   : > { %6676 = vmatprep.mubr.bf16.mxu0 %v4430_v25  ;;  %v7431_v25 = vld [vmem:[%s7519_s10 + $0x6c] sm:$0xff]  }
 0x1a9   : > { %v4860_v32 = vrot.slane %v7431_v25, 3 }
 0x1ae   : > { %6361 = vmatmul.mubr.bf16.gmra.mrb[24].mxu1 %v1996_v45  ;;  %v7433_v45 = vld [vmem:[%s7519_s10 + $0x7c] sm:$0xff]  }
 0x1af   : > { %6677 = vmatmul.mubr.bf16.gmra.mrb[60].mxu0 %v4429_v29  ;;  %6364 = vmatprep.mubr.bf16.mxu1 %v1998_v18  ;;  %v4864_v11 = vrot.slane %v7433_v45, 3  ;;  %v4892_v45 = vrot.slane %v8733_v23, 3 }
 0x1b0   : > { %6696 = vmatprep.mubr.bf16.mxu0 %v4841_v3 }
 0x1b6   : > { %6365 = vmatmul.mubr.bf16.gmra.mrb[28].mxu1 %v8466_v22  ;;  %v7426_v22 = vld [vmem:[%s7519_s10 + $0x44] sm:$0xff]  }
 0x1b7   : > { %6697 = vmatmul.mubr.bf16.vlgmr.msra.gmra.mrb[0].mxu0 %v4843_v35  ;;  %6368 = vmatprep.mubr.bf16.mxu1 %v8481_v60  ;;  %v4850_v39 = vrot.slane %v7426_v22, 3  ;;  %v7427_v60 = vld [vmem:[%s7519_s10 + $0x4c] sm:$0xff]   ;;  %v7437_v22 = vld [vmem:[%s7519_s10 + $0x9c] sm:$0xff]  }
 0x1b8   : > { %6700 = vmatprep.mubr.bf16.mxu0 %v4845_v47  ;;  %v4852_v57 = vrot.slane %v7427_v60, 3  ;;  %v9215_v47 = vld [vmem:[#allocation18_spill] sm:$0xff] }
 0x1b9   : > { %v4851_v29 = vsel %vm1967_vm4, %v4848_v37, %v4850_v39 }
 0x1ba   : > { %v4853_v13 = vsel %vm1967_vm4, %v4850_v39, %v4852_v57  ;;  %v4872_v39 = vrot.slane %v7437_v22, 3 }
 0x1be   : > { %6369 = vmatmul.mubr.bf16.gmra.mrb[32].mxu1 %v8484_v9  ;;  %v7428_v9 = vld [vmem:[%s7519_s10 + $0x54] sm:$0xff]  }
 0x1bf   : > { %6701 = vmatmul.mubr.bf16.gmra.mrb[4].mxu0 %v4847_v12  ;;  %6372 = vmatprep.mubr.bf16.mxu1 %v8498_v28  ;;  %v4854_v28 = vrot.slane %v7428_v9, 3  ;;  %v7436_v12 = vld [vmem:[%s7519_s10 + $0x94] sm:$0xff]   ;;  %v7439_v9 = vld [vmem:[%s7519_s10 + $0xac] sm:$0xff]  }
 0x1c0   : > { %6704 = vmatprep.mubr.bf16.mxu0 %v4849_v46  ;;  %v4870_v46 = vrot.slane %v7436_v12, 3 }
 0x1c1   : > { %v4855_v15 = vsel %vm1967_vm4, %v4852_v57, %v4854_v28  ;;  %v4857_v42 = vsel %vm1967_vm4, %v4854_v28, %v4856_v2  ;;  %v4876_v28 = vrot.slane %v7439_v9, 3 }
 0x1c2   : > { %v4871_v60 = vsel %vm1967_vm4, %v4868_v31, %v4870_v46  ;;  %v4873_v57 = vsel %vm1967_vm4, %v4870_v46, %v4872_v39 }
 0x1c6   : > { %6373 = vmatmul.mubr.bf16.gmra.mrb[36].mxu1 %v8501_v44  ;;  %v7430_v44 = vld [vmem:[%s7519_s10 + $0x64] sm:$0xff]  }
 0x1c7   : > { %6705 = vmatmul.mubr.bf16.gmra.mrb[8].mxu0 %v4851_v29  ;;  %6376 = vmatprep.mubr.bf16.mxu1 %v8523_v41  ;;  %v4858_v41 = vrot.slane %v7430_v44, 3  ;;  %v9217_v29 = vld [vmem:[#allocation19_spill] sm:$0xff] }
 0x1c8   : > { %6708 = vmatprep.mubr.bf16.mxu0 %v4853_v13 }
 0x1c9   : > { %v4859_v24 = vsel %vm1967_vm4, %v4856_v2, %v4858_v41  ;;  %v4861_v56 = vsel %vm1967_vm4, %v4858_v41, %v4860_v32 }
 0x1ce   : > { %6377 = vmatmul.mubr.bf16.gmra.mrb[40].mxu1 %v8526_v7  ;;  %v7432_v7 = vld [vmem:[%s7519_s10 + $0x74] sm:$0xff]  }
 0x1cf   : > { %6709 = vmatmul.mubr.bf16.gmra.mrb[12].mxu0 %v4855_v15  ;;  %6380 = vmatprep.mubr.bf16.mxu1 %v8547_v52  ;;  %v4862_v52 = vrot.slane %v7432_v7, 3  ;;  %v7440_v15 = vld [vmem:[%s7519_s10 + $0xb4] sm:$0xff]   ;;  %v7445_v7 = vld [vmem:[%s7519_s10 + $0xdc] sm:$0xff]  }
 0x1d0   : > { %6712 = vmatprep.mubr.bf16.mxu0 %v4857_v42  ;;  %v4878_v42 = vrot.slane %v7440_v15, 3 }
 0x1d1   : > { %v4865_v35 = vsel %vm1967_vm4, %v4862_v52, %v4864_v11 }
 0x1d2   : > { %v4879_v41 = vsel %vm1967_vm4, %v4876_v28, %v4878_v42 }
 0x1d6   : > { %6381 = vmatmul.mubr.bf16.gmra.mrb[44].mxu1 %v8550_v19 }
 0x1d7   : > { %6713 = vmatmul.mubr.bf16.gmra.mrb[16].mxu0 %v4859_v24  ;;  %6384 = vmatprep.mubr.bf16.mxu1 %v8578_v61  ;;  %v4863_v61 = vsel %vm1967_vm4, %v4860_v32, %v4862_v52 }
 0x1d8   : > { %6716 = vmatprep.mubr.bf16.mxu0 %v4861_v56 }
 0x1d9   : > { %v6246_v38 = vpop.f32.mrb[56].mxu1 }
 0x1da   : > { %v8823_v18 = vadd.f32 %v6246_v38, %v8605_v14  ;;  %v1276_v17 = vpop.f32.mrb[57].mxu1  ;;  %v7434_v14 = vld [vmem:[%s7519_s10 + $0x84] sm:$0xff]  }
 0x1db   : > { %v8826_v3 = vadd.f32 %v1276_v17, %v8607_v4  ;;  %v6247_v19 = vpop.f32.mrb[58].mxu1  ;;  %v4866_v4 = vrot.slane %v7434_v14, 3  ;;  %v7446_v38 = vld [vmem:[%s7519_s10 + $0xe4] sm:$0xff]  }
 0x1dc   : > { %v1279_v34 = vpop.f32.mrb[59].mxu1 }
 0x1dd   : > { %v8833_v21 = vadd.f32 %v1279_v34, %v8612_v63  ;;  %v4867_v36 = vsel %vm1967_vm4, %v4864_v11, %v4866_v4  ;;  %v2574_v63 = vsel %vm2431_vm1, %v9216_v48, %v8610_v53  ;;  %v4869_v37 = vsel %vm1967_vm4, %v4866_v4, %v4868_v31  ;;  %v7438_v53 = vld [vmem:[%s7519_s10 + $0xa4] sm:$0xff]  }
 0x1de   : > { %6385 = vmatmul.mubr.bf16.gmra.mrb[48].mxu1 %v9215_v47  ;;  %v4874_v13 = vrot.slane %v7438_v53, 3 }
 0x1df   : > { %6717 = vmatmul.mubr.bf16.gmra.mrb[20].mxu0 %v4863_v61  ;;  %6388 = vmatprep.mubr.bf16.mxu1 %v2022_v58 }
 0x1e0   : > { %6720 = vmatprep.mubr.bf16.mxu0 %v4865_v35  ;;  %v4875_v27 = vsel %vm1967_vm4, %v4872_v39, %v4874_v13  ;;  %v4877_v2 = vsel %vm1967_vm4, %v4874_v13, %v4876_v28 }
 0x1e6   : > { %6389 = vmatmul.mubr.bf16.gmra.mrb[64].mxu1 %v2021_v59 }
 0x1e7   : > { %6721 = vmatmul.mubr.bf16.gmra.mrb[24].mxu0 %v4867_v36  ;;  %6436 = vmatprep.mubr.bf16.mxu1 %v2574_v63 }
 0x1e8   : > { %6724 = vmatprep.mubr.bf16.mxu0 %v4869_v37 }
 0x1ee   : > { %6437 = vmatmul.mubr.bf16.vlgmr.msra.gmra.mrb[28].mxu1 %v9217_v29 }
 0x1ef   : > { %6725 = vmatmul.mubr.bf16.gmra.mrb[28].mxu0 %v4871_v60  ;;  %6440 = vmatprep.mubr.bf16.mxu1 %v8635_v62  ;;  %v7441_v62 = vld [vmem:[%s7519_s10 + $0xbc] sm:$0xff]  }
 0x1f0   : > { %6728 = vmatprep.mubr.bf16.mxu0 %v4873_v57  ;;  %v4880_v44 = vrot.slane %v7441_v62, 3 }
 0x1f2   : > { %v4881_v25 = vsel %vm1967_vm4, %v4878_v42, %v4880_v44 }
 0x1f6   : > { %6441 = vmatmul.mubr.bf16.gmra.mrb[32].mxu1 %v8640_v10  ;;  %v7442_v10 = vld [vmem:[%s7519_s10 + $0xc4] sm:$0xff]  }
 0x1f7   : > { %6729 = vmatmul.mubr.bf16.gmra.mrb[32].mxu0 %v4875_v27  ;;  %6444 = vmatprep.mubr.bf16.mxu1 %v8655_v40  ;;  %v4882_v32 = vrot.slane %v7442_v10, 3  ;;  %v7443_v40 = vld [vmem:[%s7519_s10 + $0xcc] sm:$0xff]   ;;  %v8942_v10 = vld [vmem:[%s9103_s2] ss:$0 sm:$0xff] }
 0x1f8   : > { %6732 = vmatprep.mubr.bf16.mxu0 %v4877_v2  ;;  %v4884_v1 = vrot.slane %v7443_v40, 3 }
 0x1f9   : > { %v4883_v24 = vsel %vm1967_vm4, %v4880_v44, %v4882_v32 }
 0x1fa   : > { %v4885_v43 = vsel %vm1967_vm4, %v4882_v32, %v4884_v1 }
 0x1fe   : > { %6445 = vmatmul.mubr.bf16.gmra.mrb[36].mxu1 %v8659_v54  ;;  %v7444_v54 = vld [vmem:[%s7519_s10 + $0xd4] sm:$0xff]   ;;  %s7185_s10 = smul.u32 440, %s9219_s13 }
 0x1ff   : > { %6733 = vmatmul.mubr.bf16.gmra.mrb[36].mxu0 %v4879_v41  ;;  %6448 = vmatprep.mubr.bf16.mxu1 %v8682_v51  ;;  %v4886_v56 = vrot.slane %v7444_v54, 3  ;;  %v4888_v51 = vrot.slane %v7445_v7, 3 }
 0x200   : > { %6736 = vmatprep.mubr.bf16.mxu0 %v4881_v25  ;;  %s8947_s11 = scalar_lea.vmem %s9104_s3, %s7185_s10 }
 0x201   : > { %v4887_v52 = vsel %vm1967_vm4, %v4884_v1, %v4886_v56  ;;  %v4889_v59 = vsel %vm1967_vm4, %v4886_v56, %v4888_v51 }
 0x206   : > { %6449 = vmatmul.mubr.bf16.gmra.mrb[40].mxu1 %v8688_v49  ;;  %v4890_v49 = vrot.slane %v7446_v38, 3 }
 0x207   : > { %6737 = vmatmul.mubr.bf16.gmra.mrb[40].mxu0 %v4883_v24  ;;  %6452 = vmatprep.mubr.bf16.mxu1 %v8708_v55 }
 0x208   : > { %6740 = vmatprep.mubr.bf16.mxu0 %v4885_v43  ;;  %v4891_v17 = vsel %vm1967_vm4, %v4888_v51, %v4890_v49  ;;  %v4893_v61 = vsel %vm1967_vm4, %v4890_v49, %v4892_v45 }
 0x20e   : > { %6453 = vmatmul.mubr.bf16.gmra.mrb[44].mxu1 %v8717_v50 }
 0x20f   : > { %6741 = vmatmul.mubr.bf16.gmra.mrb[44].mxu0 %v4887_v52  ;;  %6456 = vmatprep.mubr.bf16.mxu1 %v8743_v0 }
 0x210   : > { %6744 = vmatprep.mubr.bf16.mxu0 %v4889_v59 }
 0x212   : > { %v8876_v55 = vpop.f32.mrb[56].mxu0 }
 0x213   : > { %v8878_v11 = vpop.f32.mrb[57].mxu0 }
 0x214   : > { %v6607_v19 = vpop.f32.mrb[58].mxu0 }
 0x215   : > { %v8881_v34 = vpop.f32.mrb[59].mxu0 }
 0x216   : > { %6457 = vmatmul.mubr.bf16.gmra.mrb[48].mxu1 %v8746_v26 }
 0x217   : > { %6745 = vmatmul.mubr.bf16.gmra.mrb[48].mxu0 %v4891_v17  ;;  %6460 = vmatprep.mubr.bf16.mxu1 %v8762_v33 }
 0x218   : > { %6748 = vmatprep.mubr.bf16.mxu0 %v4893_v61 }
 0x21e   : > { %6461 = vmatmul.mubr.bf16.gmra.mrb[68].mxu1 %v8757_v16 }
 0x21f   : > { %6749 = vmatmul.mubr.bf16.gmra.mrb[64].mxu0 %v4892_v45 }
 0x249   : > { %v6318_v50 = vpop.f32.mrb[60].mxu1 }
 0x24a   : > { %v8888_v23 = vadd.f32 %v6318_v50, %v8823_v18  ;;  %v1685_v0 = vpop.f32.mrb[61].mxu1 }
 0x24b   : > { %v8891_v5 = vadd.f32 %v1685_v0, %v8826_v3  ;;  %v6319_v58 = vpop.f32.mrb[62].mxu1 }
 0x24c   : > { %v1688_v35 = vpop.f32.mrb[63].mxu1 }
 0x24d   : > { %v8894_v47 = vadd.f32 %v1688_v35, %v8833_v21 }
 0x251   : > { %v6338_v26 = vpop.f32.mrb[0].mxu1 }
 0x252   : > { %v2133_v14 = vpop.f32.mrb[1].mxu1 }
 0x253   : > { %v6339_v33 = vpop.f32.mrb[2].mxu1 }
 0x254   : > { %v2136_v4 = vpop.f32.mrb[3].mxu1 }
 0x259   : > { %v6342_v6 = vpop.f32.mrb[4].mxu1 }
 0x25a   : > { %v2149_v16 = vpop.f32.mrb[5].mxu1 }
 0x25b   : > { %v6343_v31 = vpop.f32.mrb[6].mxu1 }
 0x25c   : > { %v2152_v36 = vpop.f32.mrb[7].mxu1 }
 0x261   : > { %v6346_v48 = vpop.f32.mrb[8].mxu1 }
 0x262   : > { %v2165_v18 = vpop.f32.mrb[9].mxu1 }
 0x263   : > { %v8896_v63 = vpop.f32.mrb[10].mxu1 }
 0x264   : > { %v8898_v37 = vpop.f32.mrb[11].mxu1 }
 0x269   : > { %v8900_v3 = vpop.f32.mrb[12].mxu1 }
 0x26a   : > { %v8902_v12 = vpop.f32.mrb[13].mxu1 }
 0x26b   : > { %v8904_v21 = vpop.f32.mrb[14].mxu1 }
 0x26c   : > { %v8906_v46 = vpop.f32.mrb[15].mxu1 }
 0x271   : > { %v8908_v22 = vpop.f32.mrb[16].mxu1 }
 0x272   : > { %v8910_v39 = vpop.f32.mrb[17].mxu1 }
 0x273   : > { %v8912_v60 = vpop.f32.mrb[18].mxu1 }
 0x274   : > { %v8914_v57 = vpop.f32.mrb[19].mxu1 }
 0x279   : > { %v8916_v29 = vpop.f32.mrb[20].mxu1 }
 0x27a   : > { %v8918_v53 = vpop.f32.mrb[21].mxu1 }
 0x27b   : > { %v8920_v13 = vpop.f32.mrb[22].mxu1 }
 0x27c   : > { %v8922_v9 = vpop.f32.mrb[23].mxu1 }
 0x281   : > { %v8924_v28 = vpop.f32.mrb[24].mxu1 }
 0x282   : > { %v8926_v27 = vpop.f32.mrb[25].mxu1  ;;  %v8928_v2 = vpop.f32.mrb[60].mxu0 }
 0x283   : > { %v8930_v15 = vpop.f32.mrb[26].mxu1  ;;  %v8932_v42 = vpop.f32.mrb[61].mxu0 }
 0x284   : > { %v8934_v62 = vpop.f32.mrb[27].mxu1  ;;  %v6679_v44 = vpop.f32.mrb[62].mxu0 }
 0x285   : > { %v8936_v41 = vpop.f32.mrb[63].mxu0 }
 0x28a   : > { %v6698_v25 = vpop.f32.mrb[0].mxu0 }
 0x28b   : > { %v6768_v32 = vadd.f32 %v6698_v25, %v6338_v26  ;;  %v5004_v40 = vpop.f32.mrb[1].mxu0 }
 0x28c   : > { %v6769_v1 = vadd.f32 %v5004_v40, %v2133_v14  ;;  %v6699_v24 = vpop.f32.mrb[2].mxu0 }
 0x28d   : > { %v5290_v43 = vadd.f32 %v6768_v32, %v8942_v10  ;;  %v6770_v54 = vadd.f32 %v6699_v24, %v6339_v33  ;;  %v5007_v56 = vpop.f32.mrb[3].mxu0 }
 0x28e   : > { %v5288_v7 = vadd.f32 %v6769_v1, %v8942_v10  ;;  %v6771_v51 = vadd.f32 %v5007_v56, %v2136_v4 }
 0x28f   : > { %5345 = vst [vmem:[%s8947_s11 + $0x10] sm:$0xff] %v5290_v43  ;;  %v5291_v52 = vadd.f32 %v6770_v54, %v8942_v10 }
 0x290   : > { %5343 = vst [vmem:[%s8947_s11] sm:$0xff] %v5288_v7  ;;  %v5289_v59 = vadd.f32 %v6771_v51, %v8942_v10 }
 0x291   : > { %5346 = vst [vmem:[%s8947_s11 + $0x18] sm:$0xff] %v5291_v52 }
 0x292   : > { %5344 = vst [vmem:[%s8947_s11 + $0x8] sm:$0xff] %v5289_v59  ;;  %v6702_v38 = vpop.f32.mrb[4].mxu0 }
 0x293   : > { %v6772_v49 = vadd.f32 %v6702_v38, %v6342_v6  ;;  %v5020_v45 = vpop.f32.mrb[5].mxu0 }
 0x294   : > { %v6773_v17 = vadd.f32 %v5020_v45, %v2149_v16  ;;  %v6703_v19 = vpop.f32.mrb[6].mxu0 }
 0x295   : > { %v5294_v61 = vadd.f32 %v6772_v49, %v8942_v10  ;;  %v6774_v50 = vadd.f32 %v6703_v19, %v6343_v31  ;;  %v5023_v0 = vpop.f32.mrb[7].mxu0 }
 0x296   : > { %v5292_v58 = vadd.f32 %v6773_v17, %v8942_v10  ;;  %v6775_v35 = vadd.f32 %v5023_v0, %v2152_v36 }
 0x297   : > { %5349 = vst [vmem:[%s8947_s11 + $0x30] sm:$0xff] %v5294_v61  ;;  %v5295_v26 = vadd.f32 %v6774_v50, %v8942_v10 }
 0x298   : > { %5347 = vst [vmem:[%s8947_s11 + $0x20] sm:$0xff] %v5292_v58  ;;  %v5293_v14 = vadd.f32 %v6775_v35, %v8942_v10 }
 0x299   : > { %5350 = vst [vmem:[%s8947_s11 + $0x38] sm:$0xff] %v5295_v26 }
 0x29a   : > { %5348 = vst [vmem:[%s8947_s11 + $0x28] sm:$0xff] %v5293_v14  ;;  %v6706_v33 = vpop.f32.mrb[8].mxu0 }
 0x29b   : > { %v6776_v4 = vadd.f32 %v6706_v33, %v6346_v48  ;;  %v5036_v6 = vpop.f32.mrb[9].mxu0 }
 0x29c   : > { %v6777_v16 = vadd.f32 %v5036_v6, %v2165_v18  ;;  %v6707_v31 = vpop.f32.mrb[10].mxu0 }
 0x29d   : > { %v5298_v44 = vadd.f32 %v6776_v4, %v8942_v10  ;;  %v6778_v36 = vadd.f32 %v6707_v31, %v8896_v63  ;;  %v5039_v25 = vpop.f32.mrb[11].mxu0 }
 0x29e   : > { %v5296_v32 = vadd.f32 %v6777_v16, %v8942_v10  ;;  %v6779_v40 = vadd.f32 %v5039_v25, %v8898_v37 }
 0x29f   : > { %5353 = vst [vmem:[%s8947_s11 + $0x50] sm:$0xff] %v5298_v44  ;;  %v5299_v1 = vadd.f32 %v6778_v36, %v8942_v10 }
 0x2a0   : > { %5351 = vst [vmem:[%s8947_s11 + $0x40] sm:$0xff] %v5296_v32  ;;  %v5297_v48 = vadd.f32 %v6779_v40, %v8942_v10 }
 0x2a1   : > { %5354 = vst [vmem:[%s8947_s11 + $0x58] sm:$0xff] %v5299_v1 }
 0x2a2   : > { %5352 = vst [vmem:[%s8947_s11 + $0x48] sm:$0xff] %v5297_v48  ;;  %v6710_v18 = vpop.f32.mrb[12].mxu0 }
 0x2a3   : > { %v6780_v63 = vadd.f32 %v6710_v18, %v8900_v3  ;;  %v5052_v24 = vpop.f32.mrb[13].mxu0 }
 0x2a4   : > { %v6781_v43 = vadd.f32 %v5052_v24, %v8902_v12  ;;  %v6711_v54 = vpop.f32.mrb[14].mxu0 }
 0x2a5   : > { %v5302_v37 = vadd.f32 %v6780_v63, %v8942_v10  ;;  %v6782_v56 = vadd.f32 %v6711_v54, %v8904_v21  ;;  %v5055_v7 = vpop.f32.mrb[15].mxu0 }
 0x2a6   : > { %v5300_v51 = vadd.f32 %v6781_v43, %v8942_v10  ;;  %v6783_v52 = vadd.f32 %v5055_v7, %v8906_v46 }
 0x2a7   : > { %5357 = vst [vmem:[%s8947_s11 + $0x70] sm:$0xff] %v5302_v37  ;;  %v5303_v59 = vadd.f32 %v6782_v56, %v8942_v10 }
 0x2a8   : > { %5355 = vst [vmem:[%s8947_s11 + $0x60] sm:$0xff] %v5300_v51  ;;  %v5301_v3 = vadd.f32 %v6783_v52, %v8942_v10 }
 0x2a9   : > { %5358 = vst [vmem:[%s8947_s11 + $0x78] sm:$0xff] %v5303_v59 }
 0x2aa   : > { %5356 = vst [vmem:[%s8947_s11 + $0x68] sm:$0xff] %v5301_v3  ;;  %v6714_v12 = vpop.f32.mrb[16].mxu0 }
 0x2ab   : > { %v6784_v21 = vadd.f32 %v6714_v12, %v8908_v22  ;;  %v5068_v38 = vpop.f32.mrb[17].mxu0 }
 0x2ac   : > { %v6785_v49 = vadd.f32 %v5068_v38, %v8910_v39  ;;  %v6715_v45 = vpop.f32.mrb[18].mxu0 }
 0x2ad   : > { %v5306_v46 = vadd.f32 %v6784_v21, %v8942_v10  ;;  %v6786_v17 = vadd.f32 %v6715_v45, %v8912_v60  ;;  %v5071_v19 = vpop.f32.mrb[19].mxu0 }
 0x2ae   : > { %v5304_v61 = vadd.f32 %v6785_v49, %v8942_v10  ;;  %v6787_v50 = vadd.f32 %v5071_v19, %v8914_v57 }
 0x2af   : > { %5361 = vst [vmem:[%s8947_s11 + $0x90] sm:$0xff] %v5306_v46  ;;  %v5307_v0 = vadd.f32 %v6786_v17, %v8942_v10 }
 0x2b0   : > { %5359 = vst [vmem:[%s8947_s11 + $0x80] sm:$0xff] %v5304_v61  ;;  %v5305_v22 = vadd.f32 %v6787_v50, %v8942_v10 }
 0x2b1   : > { %5362 = vst [vmem:[%s8947_s11 + $0x98] sm:$0xff] %v5307_v0 }
 0x2b2   : > { %5360 = vst [vmem:[%s8947_s11 + $0x88] sm:$0xff] %v5305_v22  ;;  %v6718_v39 = vpop.f32.mrb[20].mxu0 }
 0x2b3   : > { %v6788_v60 = vadd.f32 %v6718_v39, %v8916_v29  ;;  %v5084_v58 = vpop.f32.mrb[21].mxu0 }
 0x2b4   : > { %v6789_v35 = vadd.f32 %v5084_v58, %v8918_v53  ;;  %v6719_v26 = vpop.f32.mrb[22].mxu0 }
 0x2b5   : > { %v5310_v57 = vadd.f32 %v6788_v60, %v8942_v10  ;;  %v6790_v14 = vadd.f32 %v6719_v26, %v8920_v13  ;;  %v5087_v33 = vpop.f32.mrb[23].mxu0 }
 0x2b6   : > { %v5308_v4 = vadd.f32 %v6789_v35, %v8942_v10  ;;  %v6791_v6 = vadd.f32 %v5087_v33, %v8922_v9 }
 0x2b7   : > { %5365 = vst [vmem:[%s8947_s11 + $0xb0] sm:$0xff] %v5310_v57  ;;  %v5311_v16 = vadd.f32 %v6790_v14, %v8942_v10 }
 0x2b8   : > { %5363 = vst [vmem:[%s8947_s11 + $0xa0] sm:$0xff] %v5308_v4  ;;  %v5309_v31 = vadd.f32 %v6791_v6, %v8942_v10 }
 0x2b9   : > { %5366 = vst [vmem:[%s8947_s11 + $0xb8] sm:$0xff] %v5311_v16  ;;  %v6390_v29 = vpop.f32.mrb[64].mxu1 }
 0x2ba   : > { %5364 = vst [vmem:[%s8947_s11 + $0xa8] sm:$0xff] %v5309_v31  ;;  %v9012_v53 = vadd.f32 %v6390_v29, %v8888_v23  ;;  %v6722_v44 = vpop.f32.mrb[24].mxu0  ;;  %v2341_v13 = vpop.f32.mrb[65].mxu1 }
 0x2bb   : > { %v6792_v36 = vadd.f32 %v6722_v44, %v8924_v28  ;;  %v9016_v9 = vadd.f32 %v2341_v13, %v8891_v5  ;;  %v5100_v25 = vpop.f32.mrb[25].mxu0  ;;  %v6391_v32 = vpop.f32.mrb[66].mxu1 }
 0x2bc   : > { %v6793_v40 = vadd.f32 %v5100_v25, %v8926_v27  ;;  %v6723_v1 = vpop.f32.mrb[26].mxu0  ;;  %v2344_v48 = vpop.f32.mrb[67].mxu1 }
 0x2bd   : > { %v5314_v23 = vadd.f32 %v6792_v36, %v8942_v10  ;;  %v6794_v18 = vadd.f32 %v6723_v1, %v8930_v15  ;;  %v9022_v63 = vadd.f32 %v2344_v48, %v8894_v47  ;;  %v5103_v24 = vpop.f32.mrb[27].mxu0 }
 0x2be   : > { %v5312_v28 = vadd.f32 %v6793_v40, %v8942_v10  ;;  %v6795_v5 = vadd.f32 %v5103_v24, %v8934_v62 }
 0x2bf   : > { %5369 = vst [vmem:[%s8947_s11 + $0xd0] sm:$0xff] %v5314_v23  ;;  %v5315_v43 = vadd.f32 %v6794_v18, %v8942_v10 }
 0x2c0   : > { %5367 = vst [vmem:[%s8947_s11 + $0xc0] sm:$0xff] %v5312_v28  ;;  %v5313_v27 = vadd.f32 %v6795_v5, %v8942_v10 }
 0x2c1   : > { %5370 = vst [vmem:[%s8947_s11 + $0xd8] sm:$0xff] %v5315_v43  ;;  %v6438_v54 = vpop.f32.mrb[28].mxu1 }
 0x2c2   : > { %5368 = vst [vmem:[%s8947_s11 + $0xc8] sm:$0xff] %v5313_v27  ;;  %v6726_v15 = vpop.f32.mrb[28].mxu0  ;;  %v2905_v37 = vpop.f32.mrb[29].mxu1 }
 0x2c3   : > { %v6796_v47 = vadd.f32 %v6726_v15, %v6438_v54  ;;  %v5116_v56 = vpop.f32.mrb[29].mxu0  ;;  %v6439_v7 = vpop.f32.mrb[30].mxu1 }
 0x2c4   : > { %v6797_v51 = vadd.f32 %v5116_v56, %v2905_v37  ;;  %v6727_v62 = vpop.f32.mrb[30].mxu0  ;;  %v2908_v52 = vpop.f32.mrb[31].mxu1 }
 0x2c5   : > { %v5318_v59 = vadd.f32 %v6796_v47, %v8942_v10  ;;  %v6798_v3 = vadd.f32 %v6727_v62, %v6439_v7  ;;  %v5119_v12 = vpop.f32.mrb[31].mxu0 }
 0x2c6   : > { %v5316_v21 = vadd.f32 %v6797_v51, %v8942_v10  ;;  %v6799_v38 = vadd.f32 %v5119_v12, %v2908_v52 }
 0x2c7   : > { %5373 = vst [vmem:[%s8947_s11 + $0xf0] sm:$0xff] %v5318_v59  ;;  %v5319_v49 = vadd.f32 %v6798_v3, %v8942_v10 }
 0x2c8   : > { %5371 = vst [vmem:[%s8947_s11 + $0xe0] sm:$0xff] %v5316_v21  ;;  %v5317_v45 = vadd.f32 %v6799_v38, %v8942_v10 }
 0x2c9   : > { %5374 = vst [vmem:[%s8947_s11 + $0xf8] sm:$0xff] %v5319_v49  ;;  %v6442_v46 = vpop.f32.mrb[32].mxu1 }
 0x2ca   : > { %5372 = vst [vmem:[%s8947_s11 + $0xe8] sm:$0xff] %v5317_v45  ;;  %v6730_v17 = vpop.f32.mrb[32].mxu0  ;;  %v2921_v19 = vpop.f32.mrb[33].mxu1 }
 0x2cb   : > { %v6800_v61 = vadd.f32 %v6730_v17, %v6442_v46  ;;  %v5132_v50 = vpop.f32.mrb[33].mxu0  ;;  %v6443_v0 = vpop.f32.mrb[34].mxu1 }
 0x2cc   : > { %v6801_v22 = vadd.f32 %v5132_v50, %v2921_v19  ;;  %v6731_v39 = vpop.f32.mrb[34].mxu0  ;;  %v2924_v60 = vpop.f32.mrb[35].mxu1 }
 0x2cd   : > { %v5322_v58 = vadd.f32 %v6800_v61, %v8942_v10  ;;  %v6802_v35 = vadd.f32 %v6731_v39, %v6443_v0  ;;  %v5135_v26 = vpop.f32.mrb[35].mxu0 }
 0x2ce   : > { %v5320_v57 = vadd.f32 %v6801_v22, %v8942_v10  ;;  %v6803_v14 = vadd.f32 %v5135_v26, %v2924_v60 }
 0x2cf   : > { %5377 = vst [vmem:[%s8947_s11 + $0x110] sm:$0xff] %v5322_v58  ;;  %v5323_v33 = vadd.f32 %v6802_v35, %v8942_v10 }
 0x2d0   : > { %5375 = vst [vmem:[%s8947_s11 + $0x100] sm:$0xff] %v5320_v57  ;;  %v5321_v4 = vadd.f32 %v6803_v14, %v8942_v10 }
 0x2d1   : > { %5378 = vst [vmem:[%s8947_s11 + $0x118] sm:$0xff] %v5323_v33  ;;  %v6446_v6 = vpop.f32.mrb[36].mxu1 }
 0x2d2   : > { %5376 = vst [vmem:[%s8947_s11 + $0x108] sm:$0xff] %v5321_v4  ;;  %v6734_v16 = vpop.f32.mrb[36].mxu0  ;;  %v2937_v31 = vpop.f32.mrb[37].mxu1 }
 0x2d3   : > { %v6804_v29 = vadd.f32 %v6734_v16, %v6446_v6  ;;  %v5148_v44 = vpop.f32.mrb[37].mxu0  ;;  %v6447_v13 = vpop.f32.mrb[38].mxu1 }
 0x2d4   : > { %v6805_v36 = vadd.f32 %v5148_v44, %v2937_v31  ;;  %v6735_v25 = vpop.f32.mrb[38].mxu0  ;;  %v2940_v32 = vpop.f32.mrb[39].mxu1 }
 0x2d5   : > { %v5326_v40 = vadd.f32 %v6804_v29, %v8942_v10  ;;  %v6806_v1 = vadd.f32 %v6735_v25, %v6447_v13  ;;  %v5151_v48 = vpop.f32.mrb[39].mxu0 }
 0x2d6   : > { %v5324_v23 = vadd.f32 %v6805_v36, %v8942_v10  ;;  %v6807_v18 = vadd.f32 %v5151_v48, %v2940_v32 }
 0x2d7   : > { %5381 = vst [vmem:[%s8947_s11 + $0x130] sm:$0xff] %v5326_v40  ;;  %v5327_v24 = vadd.f32 %v6806_v1, %v8942_v10 }
 0x2d8   : > { %5379 = vst [vmem:[%s8947_s11 + $0x120] sm:$0xff] %v5324_v23  ;;  %v5325_v28 = vadd.f32 %v6807_v18, %v8942_v10 }
 0x2d9   : > { %5382 = vst [vmem:[%s8947_s11 + $0x138] sm:$0xff] %v5327_v24  ;;  %v6450_v5 = vpop.f32.mrb[40].mxu1 }
 0x2da   : > { %5380 = vst [vmem:[%s8947_s11 + $0x128] sm:$0xff] %v5325_v28  ;;  %v6738_v43 = vpop.f32.mrb[40].mxu0  ;;  %v2953_v27 = vpop.f32.mrb[41].mxu1 }
 0x2db   : > { %v6808_v54 = vadd.f32 %v6738_v43, %v6450_v5  ;;  %v5164_v15 = vpop.f32.mrb[41].mxu0  ;;  %v6451_v37 = vpop.f32.mrb[42].mxu1 }
 0x2dc   : > { %v6809_v47 = vadd.f32 %v5164_v15, %v2953_v27  ;;  %v6739_v56 = vpop.f32.mrb[42].mxu0  ;;  %v2956_v7 = vpop.f32.mrb[43].mxu1 }
 0x2dd   : > { %v5330_v51 = vadd.f32 %v6808_v54, %v8942_v10  ;;  %v6810_v62 = vadd.f32 %v6739_v56, %v6451_v37  ;;  %v5167_v52 = vpop.f32.mrb[43].mxu0 }
 0x2de   : > { %v5328_v59 = vadd.f32 %v6809_v47, %v8942_v10  ;;  %v6811_v3 = vadd.f32 %v5167_v52, %v2956_v7 }
 0x2df   : > { %5385 = vst [vmem:[%s8947_s11 + $0x150] sm:$0xff] %v5330_v51  ;;  %v5331_v12 = vadd.f32 %v6810_v62, %v8942_v10 }
 0x2e0   : > { %5383 = vst [vmem:[%s8947_s11 + $0x140] sm:$0xff] %v5328_v59  ;;  %v5329_v21 = vadd.f32 %v6811_v3, %v8942_v10 }
 0x2e1   : > { %5386 = vst [vmem:[%s8947_s11 + $0x158] sm:$0xff] %v5331_v12  ;;  %v6454_v38 = vpop.f32.mrb[44].mxu1 }
 0x2e2   : > { %5384 = vst [vmem:[%s8947_s11 + $0x148] sm:$0xff] %v5329_v21  ;;  %v6742_v49 = vpop.f32.mrb[44].mxu0  ;;  %v2969_v45 = vpop.f32.mrb[45].mxu1 }
 0x2e3   : > { %v6812_v46 = vadd.f32 %v6742_v49, %v6454_v38  ;;  %v5180_v17 = vpop.f32.mrb[45].mxu0  ;;  %v6455_v19 = vpop.f32.mrb[46].mxu1 }
 0x2e4   : > { %v6813_v61 = vadd.f32 %v5180_v17, %v2969_v45  ;;  %v6743_v50 = vpop.f32.mrb[46].mxu0  ;;  %v2972_v0 = vpop.f32.mrb[47].mxu1 }
 0x2e5   : > { %v5334_v22 = vadd.f32 %v6812_v46, %v8942_v10  ;;  %v6814_v39 = vadd.f32 %v6743_v50, %v6455_v19  ;;  %v5183_v60 = vpop.f32.mrb[47].mxu0 }
 0x2e6   : > { %v5332_v58 = vadd.f32 %v6813_v61, %v8942_v10  ;;  %v6815_v35 = vadd.f32 %v5183_v60, %v2972_v0 }
 0x2e7   : > { %5389 = vst [vmem:[%s8947_s11 + $0x170] sm:$0xff] %v5334_v22  ;;  %v5335_v26 = vadd.f32 %v6814_v39, %v8942_v10 }
 0x2e8   : > { %5387 = vst [vmem:[%s8947_s11 + $0x160] sm:$0xff] %v5332_v58  ;;  %v5333_v57 = vadd.f32 %v6815_v35, %v8942_v10 }
 0x2e9   : > { %5390 = vst [vmem:[%s8947_s11 + $0x178] sm:$0xff] %v5335_v26  ;;  %v6458_v14 = vpop.f32.mrb[48].mxu1 }
 0x2ea   : > { %5388 = vst [vmem:[%s8947_s11 + $0x168] sm:$0xff] %v5333_v57  ;;  %v6746_v33 = vpop.f32.mrb[48].mxu0  ;;  %v2985_v4 = vpop.f32.mrb[49].mxu1 }
 0x2eb   : > { %v6816_v6 = vadd.f32 %v6746_v33, %v6458_v14  ;;  %v5196_v16 = vpop.f32.mrb[49].mxu0  ;;  %v6459_v31 = vpop.f32.mrb[50].mxu1 }
 0x2ec   : > { %v6817_v29 = vadd.f32 %v5196_v16, %v2985_v4  ;;  %v6747_v44 = vpop.f32.mrb[50].mxu0  ;;  %v2988_v13 = vpop.f32.mrb[51].mxu1 }
 0x2ed   : > { %v5338_v36 = vadd.f32 %v6816_v6, %v8942_v10  ;;  %v6818_v25 = vadd.f32 %v6747_v44, %v6459_v31  ;;  %v5199_v32 = vpop.f32.mrb[51].mxu0 }
 0x2ee   : > { %v5336_v40 = vadd.f32 %v6817_v29, %v8942_v10  ;;  %v6819_v1 = vadd.f32 %v5199_v32, %v2988_v13 }
 0x2ef   : > { %5393 = vst [vmem:[%s8947_s11 + $0x190] sm:$0xff] %v5338_v36  ;;  %v5339_v48 = vadd.f32 %v6818_v25, %v8942_v10 }
 0x2f0   : > { %5391 = vst [vmem:[%s8947_s11 + $0x180] sm:$0xff] %v5336_v40  ;;  %v5337_v23 = vadd.f32 %v6819_v1, %v8942_v10 }
 0x2f1   : > { %5394 = vst [vmem:[%s8947_s11 + $0x198] sm:$0xff] %v5339_v48  ;;  %v6462_v18 = vpop.f32.mrb[68].mxu1 }
 0x2f2   : > { %5392 = vst [vmem:[%s8947_s11 + $0x188] sm:$0xff] %v5337_v23  ;;  %v3069_v24 = vadd.f32 %v6462_v18, %v9012_v53  ;;  %v3001_v28 = vpop.f32.mrb[69].mxu1  ;;  %v6750_v5 = vpop.f32.mrb[64].mxu0 }
 0x2f3   : > { %v3067_v43 = vadd.f32 %v3001_v28, %v9016_v9  ;;  %v6463_v27 = vpop.f32.mrb[70].mxu1  ;;  %v5212_v54 = vpop.f32.mrb[65].mxu0 }
 0x2f4   : > { %v3501_v15 = vadd.f32 %v8769_v30, %v3069_v24  ;;  %v3004_v37 = vpop.f32.mrb[71].mxu1  ;;  %v6751_v47 = vpop.f32.mrb[66].mxu0 }
 0x2f5   : > { %v3499_v56 = vadd.f32 %v8773_v8, %v3067_v43  ;;  %v3068_v7 = vadd.f32 %v3004_v37, %v9022_v63  ;;  %v5215_v51 = vpop.f32.mrb[67].mxu0 }
 0x2f6   : > { %v4157_v53 = vadd.f32 %v8876_v55, %v3501_v15 }
 0x2f7   : > { %v3500_v62 = vadd.f32 %v8777_v20, %v3068_v7  ;;  %v4155_v9 = vadd.f32 %v8878_v11, %v3499_v56 }
 0x2f8   : > { %v4817_v52 = vadd.f32 %v8928_v2, %v4157_v53 }
 0x2f9   : > { %v4815_v30 = vadd.f32 %v8932_v42, %v4155_v9  ;;  %v4156_v59 = vadd.f32 %v8881_v34, %v3500_v62 }
 0x2fa   : > { %v5280_v3 = vadd.f32 %v6750_v5, %v4817_v52 }
 0x2fb   : > { %v5278_v12 = vadd.f32 %v5212_v54, %v4815_v30  ;;  %v4816_v8 = vadd.f32 %v8936_v41, %v4156_v59 }
 0x2fc   : > { %v5342_v63 = vadd.f32 %v8942_v10, %v5280_v3 }
 0x2fd   : > { %v5340_v21 = vadd.f32 %v8942_v10, %v5278_v12  ;;  %v5279_v38 = vadd.f32 %v5215_v51, %v4816_v8 }
 0x2fe   : > { %5397 = vst [vmem:[%s8947_s11 + $0x1b0] sm:$0xff] %v5342_v63 }
 0x2ff   : > { %5395 = vst [vmem:[%s8947_s11 + $0x1a0] sm:$0xff] %v5340_v21  ;;  %v5341_v20 = vadd.f32 %v8942_v10, %v5279_v38 }
 0x301   : > { %5396 = vst [vmem:[%s8947_s11 + $0x1a8] sm:$0xff] %v5341_v20 }
 0x302 PF: > { %s13_s12 = sadd.s32 1, %s7453_s12  }
 0x303   : > { %p10_p4 = scmp.ge.s32.totalorder %s13_s12, 4  }
 0x305   :  { %12 = sbr.rel (!%p10_p4) target bundleno = 1 (0x1), region = 70 }

</bundles_post_ra>
